<compile_context>
chip_gen: v5e
topology: v5e:2x2
jax: 0.10.0
libtpu: 0.0.40
codegen_flags: <defaults>
</compile_context>

<pallas_src>
import functools

import jax
import jax.numpy as jnp
from jax.experimental import pallas as pl
from jax.experimental.pallas import tpu as pltpu


# ----------------------------------- Pallas kernel --------------------------------------

def _cga_kernel(x_ref, qw_ref, kw_ref, vw_ref, qb_ref, kb_ref, vb_ref,
                pw_ref, pb_ref, out_ref, *, num_heads):
    # x_ref block: (bb, num_heads, N, kd) for the current batch slab.
    bb = x_ref.shape[0]
    n = x_ref.shape[2]
    kd = x_ref.shape[3]
    dct = pw_ref.shape[2]
    bn = bb * n

    # proj bias initializes the accumulator (flattened over batch*pixels).
    acc = jnp.broadcast_to(pb_ref[...], (bn, dct)).astype(jnp.float32)

    # head 0 input chunk; leading-dim index on the ref is a free view (no lane slicing).
    feat = x_ref[:, 0].reshape(bn, kd)                                     # (bb*N, kd)

    for i in range(num_heads):
        if i > 0:
            # cascade: previous head's attention output + next input chunk
            feat = feat + x_ref[:, i].reshape(bn, kd)

        # fused 1x1 conv + BN, per-pixel matmuls on the flattened (bb*N, kd) slab.
        # dw (depthwise 1x1 + BN) and the softmax scale are pre-folded into qw/qb on host.
        q = jnp.dot(feat, qw_ref[i], preferred_element_type=jnp.float32) + qb_ref[i]
        k = jnp.dot(feat, kw_ref[i], preferred_element_type=jnp.float32) + kb_ref[i]
        v = jnp.dot(feat, vw_ref[i], preferred_element_type=jnp.float32) + vb_ref[i]

        q3 = q.reshape(bb, n, kd)
        k3 = k.reshape(bb, n, kd)
        v3 = v.reshape(bb, n, kd)

        # attn scores: contract the feature (last) dim directly -> no explicit k transpose.
        s = jnp.einsum('bnd,bmd->bnm', q3, k3,
                       preferred_element_type=jnp.float32)                 # (bb, N, N)
        s = s - jnp.max(s, axis=-1, keepdims=True)
        p = jnp.exp(s)
        row_sum = jnp.sum(p, axis=-1, keepdims=True)                       # (bb, N, 1)

        # deferred softmax normalization: normalize the (N, kd) output, not the (N, N) matrix.
        o3 = jnp.einsum('bnm,bmd->bnd', p, v3,
                        preferred_element_type=jnp.float32)                # (bb, N, kd)
        o3 = o3 * pl.reciprocal(row_sum, approx=True)

        feat = o3.reshape(bn, kd)

        # proj = ReLU -> 1x1 conv -> BN on concat of head outputs, done incrementally:
        # relu(concat)@W == sum_i relu(feat_i) @ W[i]  (W pre-stacked per head on host).
        acc = acc + jnp.dot(jnp.maximum(feat, 0.0), pw_ref[i],
                            preferred_element_type=jnp.float32)

    out_ref[...] = acc.reshape(bb, n, dct).astype(out_ref.dtype)


def _prefer_per_batch_grid():
    """v7x has 2 TensorCores per chip -> keep a parallel batch grid; otherwise fuse B."""
    try:
        kind = jax.devices()[0].device_kind.lower()
    except Exception:
        return False
    return "v7" in kind


def cascaded_group_attention(x_bnhd, kernel_params, *, num_heads, key_dim,
                             batch_block=None):
    """x_bnhd: (B, num_heads, N, key_dim) float32.  Returns (B, N, dct) float32."""
    B, nh, N, kd = x_bnhd.shape
    assert nh == num_heads and kd == key_dim
    qw, kw, vw, qb, kb, vb, pw, pb = kernel_params
    dct = pw.shape[-1]

    if batch_block is None:
        # Single-TC chips (v5e/v6e): fuse the whole batch into one grid step to avoid
        # per-step pipeline overhead.  Multi-TC chips (v7x): one batch element per step,
        # parallel grid axis so both TensorCores are used.
        batch_block = 1 if (_prefer_per_batch_grid() and B > 1) else B
    bb = batch_block
    assert B % bb == 0
    grid = (B // bb,)

    kernel = functools.partial(_cga_kernel, num_heads=num_heads)

    return pl.pallas_call(
        kernel,
        out_shape=jax.ShapeDtypeStruct((B, N, dct), jnp.float32),
        grid=grid,
        in_specs=[
            pl.BlockSpec((bb, nh, N, kd), lambda g: (g, 0, 0, 0)),    # x, head-major
            pl.BlockSpec((nh, kd, kd), lambda g: (0, 0, 0)),          # q weights (dw+scale folded)
            pl.BlockSpec((nh, kd, kd), lambda g: (0, 0, 0)),          # k weights
            pl.BlockSpec((nh, kd, kd), lambda g: (0, 0, 0)),          # v weights
            pl.BlockSpec((nh, 1, kd), lambda g: (0, 0, 0)),           # q bias
            pl.BlockSpec((nh, 1, kd), lambda g: (0, 0, 0)),           # k bias
            pl.BlockSpec((nh, 1, kd), lambda g: (0, 0, 0)),           # v bias
            pl.BlockSpec((nh, kd, dct), lambda g: (0, 0, 0)),         # proj weight, head-stacked
            pl.BlockSpec((1, dct), lambda g: (0, 0)),                 # proj bias
        ],
        out_specs=pl.BlockSpec((bb, N, dct), lambda g: (g, 0, 0)),
        compiler_params=pltpu.CompilerParams(dimension_semantics=("parallel",)),
    )(x_bnhd, qw, kw, vw, qb, kb, vb, pw, pb)


# ----------------------- parameter construction (glue, plain JAX) -----------------------

def _bn_fold_scale_bias(key, c, eps=1e-5):
    k1, k2, k3, k4 = jax.random.split(key, 4)
    gamma = 1.0 + 0.1 * jax.random.normal(k1, (c,), jnp.float32)
    beta = 0.1 * jax.random.normal(k2, (c,), jnp.float32)
    mean = 0.1 * jax.random.normal(k3, (c,), jnp.float32)
    var = jax.random.uniform(k4, (c,), jnp.float32, 0.5, 1.5)
    s = gamma / jnp.sqrt(var + eps)
    b = beta - mean * s
    return s, b


def make_params(key, *, num_heads, key_dim, dct_channels):
    """Deterministic synthetic module-style parameters with BN folded into the 1x1 convs."""
    dim = num_heads * key_dim
    kd = key_dim
    keys = jax.random.split(key, 4 * num_heads + 2)

    qkv_w, qkv_b, dw_s, dw_b = [], [], [], []
    for i in range(num_heads):
        kw_, kb_ = keys[4 * i], keys[4 * i + 1]
        w = 0.2 * jax.random.normal(kw_, (kd, 3 * kd), jnp.float32)   # (in, out) layout
        b = 0.1 * jax.random.normal(kb_, (3 * kd,), jnp.float32)
        s_bn, b_bn = _bn_fold_scale_bias(keys[4 * i + 2], 3 * kd)
        qkv_w.append(w * s_bn[None, :])
        qkv_b.append(b * s_bn + b_bn)

        # depthwise 1x1 conv (groups=kd) + BN  ->  per-channel scale & bias
        kdw = keys[4 * i + 3]
        k1, k2, k3 = jax.random.split(kdw, 3)
        dww = 0.5 + 0.2 * jax.random.normal(k1, (kd,), jnp.float32)
        dwbias = 0.1 * jax.random.normal(k2, (kd,), jnp.float32)
        s_bn2, b_bn2 = _bn_fold_scale_bias(k3, kd)
        dw_s.append(dww * s_bn2)
        dw_b.append(dwbias * s_bn2 + b_bn2)

    kpw, kpb = keys[-2], keys[-1]
    k1, k2 = jax.random.split(kpw, 2)
    pw = 0.2 * jax.random.normal(k1, (dim, dct_channels), jnp.float32)
    pbias = 0.1 * jax.random.normal(k2, (dct_channels,), jnp.float32)
    s_bn3, b_bn3 = _bn_fold_scale_bias(kpb, dct_channels)
    proj_w = pw * s_bn3[None, :]
    proj_b = (pbias * s_bn3 + b_bn3)[None, :]                         # (1, dct)

    return (jnp.stack(qkv_w), jnp.stack(qkv_b),
            jnp.stack(dw_s), jnp.stack(dw_b), proj_w, proj_b)


def prepare_kernel_params(params, *, num_heads, key_dim):
    """Host-side layout plumbing: split q/k/v weights, fold dw affine + softmax scale into
    the q branch, stack proj weight per head, reshape biases for leading-dim indexing."""
    qkv_w, qkv_b, dw_s, dw_b, proj_w, proj_b = params
    kd = key_dim
    scale = float(key_dim) ** (-0.5)

    qw = qkv_w[:, :, :kd]
    kw = qkv_w[:, :, kd:2 * kd]
    vw = qkv_w[:, :, 2 * kd:]
    qb = qkv_b[:, :kd]
    kb = qkv_b[:, kd:2 * kd]
    vb = qkv_b[:, 2 * kd:]

    # fold depthwise 1x1 conv + BN (per-channel affine) and the softmax scale into q.
    qw_f = qw * (dw_s * scale)[:, None, :]
    qb_f = (qb * dw_s + dw_b) * scale

    pw = proj_w.reshape(num_heads, kd, -1)                            # (nh, kd, dct)

    return (qw_f, kw, vw,
            qb_f[:, None, :], kb[:, None, :], vb[:, None, :],
            pw, proj_b)


# ----------------------------- pure-JAX reference (for check) ---------------------------

def reference(x_bnc, params, *, num_heads, key_dim):
    qkv_w, qkv_b, dw_s, dw_b, proj_w, proj_b = params
    scale = float(key_dim) ** (-0.5)
    B, N, dim = x_bnc.shape
    outs = []
    for b in range(B):
        x = x_bnc[b]
        feats = []
        feat = x[:, :key_dim]
        for i in range(num_heads):
            if i > 0:
                feat = feat + x[:, i * key_dim:(i + 1) * key_dim]
            qkv = feat @ qkv_w[i] + qkv_b[i]
            q = qkv[:, :key_dim] * dw_s[i] + dw_b[i]
            k = qkv[:, key_dim:2 * key_dim]
            v = qkv[:, 2 * key_dim:3 * key_dim]
            attn = jax.nn.softmax((q @ k.T) * scale, axis=-1)
            feat = attn @ v
            feats.append(feat)
        cat = jnp.concatenate(feats, axis=-1)
        outs.append(jnp.maximum(cat, 0.0) @ proj_w + proj_b)
    return jnp.stack(outs)


if __name__ == "__main__":
    # Small shapes consistent with the module: dim = num_heads * key_dim is required by the
    # cascade (feat + feats_in[i]); kernels=[1,1,1] default.
    B, H, W = 2, 8, 8
    num_heads, key_dim, dct_channels = 3, 4, 16
    dim = num_heads * key_dim
    N = H * W

    root = jax.random.PRNGKey(0)
    kx, kp = jax.random.split(root)
    # torch-style input is (B, dim, H, W); move to kernel layout (B, num_heads, N, key_dim).
    x_nchw = jax.random.normal(kx, (B, dim, H, W), jnp.float32)
    x_bnc = jnp.transpose(x_nchw, (0, 2, 3, 1)).reshape(B, N, dim)
    x_bnhd = x_bnc.reshape(B, N, num_heads, key_dim).transpose(0, 2, 1, 3)

    params = make_params(kp, num_heads=num_heads, key_dim=key_dim,
                         dct_channels=dct_channels)
    kparams = prepare_kernel_params(params, num_heads=num_heads, key_dim=key_dim)

    out = cascaded_group_attention(x_bnhd, kparams, num_heads=num_heads, key_dim=key_dim)
    out = jax.block_until_ready(out)

    ref = reference(x_bnc, params, num_heads=num_heads, key_dim=key_dim)
    assert out.shape == (B, N, dct_channels)
    max_err = float(jnp.max(jnp.abs(out - ref)))
    # tolerance widened slightly for pl.reciprocal(approx=True)
    assert jnp.allclose(out, ref, rtol=1e-2, atol=1e-2), max_err

    print("KERNEL_OK")
</pallas_src>

<mosaic_0001>
module attributes {stable_mosaic.version = 11 : i64} {
  func.func @_cga_kernel(%arg0: i32, %arg1: memref<2x3x64x4xf32, #tpu.memory_space<vmem>>, %arg2: memref<3x4x4xf32, #tpu.memory_space<vmem>>, %arg3: memref<3x4x4xf32, #tpu.memory_space<vmem>>, %arg4: memref<3x4x4xf32, #tpu.memory_space<vmem>>, %arg5: memref<3x1x4xf32, #tpu.memory_space<vmem>>, %arg6: memref<3x1x4xf32, #tpu.memory_space<vmem>>, %arg7: memref<3x1x4xf32, #tpu.memory_space<vmem>>, %arg8: memref<3x4x16xf32, #tpu.memory_space<vmem>>, %arg9: memref<1x16xf32, #tpu.memory_space<vmem>>, %arg10: memref<2x64x16xf32, #tpu.memory_space<vmem>>) attributes {dimension_semantics = [#tpu.dimension_semantics<parallel>], iteration_bounds = array<i64: 1>, scalar_prefetch = 0 : i64, scratch_operands = 0 : i64, tpu.core_type = #tpu.core_type<tc>, window_params = [{transform_indices = @transform_0, window_bounds = array<i64: 2, 3, 64, 4>}, {pipeline_mode = #tpu.pipeline_mode<synchronous>, transform_indices = @transform_1, window_bounds = array<i64: 3, 4, 4>}, {pipeline_mode = #tpu.pipeline_mode<synchronous>, transform_indices = @transform_2, window_bounds = array<i64: 3, 4, 4>}, {pipeline_mode = #tpu.pipeline_mode<synchronous>, transform_indices = @transform_3, window_bounds = array<i64: 3, 4, 4>}, {pipeline_mode = #tpu.pipeline_mode<synchronous>, transform_indices = @transform_4, window_bounds = array<i64: 3, 1, 4>}, {pipeline_mode = #tpu.pipeline_mode<synchronous>, transform_indices = @transform_5, window_bounds = array<i64: 3, 1, 4>}, {pipeline_mode = #tpu.pipeline_mode<synchronous>, transform_indices = @transform_6, window_bounds = array<i64: 3, 1, 4>}, {pipeline_mode = #tpu.pipeline_mode<synchronous>, transform_indices = @transform_7, window_bounds = array<i64: 3, 4, 16>}, {pipeline_mode = #tpu.pipeline_mode<synchronous>, transform_indices = @transform_8, window_bounds = array<i64: 1, 16>}, {transform_indices = @transform_9, window_bounds = array<i64: 2, 64, 16>}]} {
    %c0 = arith.constant 0 : index
    %c0_0 = arith.constant 0 : index
    %0 = vector.load %arg9[%c0, %c0_0] : memref<1x16xf32, #tpu.memory_space<vmem>>, vector<1x16xf32>
    %1 = vector.shape_cast %0 : vector<1x16xf32> to vector<1x16xf32>
    %2 = vector.broadcast %1 : vector<1x16xf32> to vector<128x16xf32>
    %c0_1 = arith.constant 0 : index
    %c0_2 = arith.constant 0 : index
    %c0_3 = arith.constant 0 : index
    %c0_4 = arith.constant 0 : index
    %3 = vector.load %arg1[%c0_1, %c0_2, %c0_3, %c0_4] : memref<2x3x64x4xf32, #tpu.memory_space<vmem>>, vector<2x1x64x4xf32>
    %4 = vector.shape_cast %3 : vector<2x1x64x4xf32> to vector<2x64x4xf32>
    %5 = vector.shape_cast %4 : vector<2x64x4xf32> to vector<128x4xf32>
    %c0_5 = arith.constant 0 : index
    %c0_6 = arith.constant 0 : index
    %c0_7 = arith.constant 0 : index
    %6 = vector.load %arg2[%c0_5, %c0_6, %c0_7] : memref<3x4x4xf32, #tpu.memory_space<vmem>>, vector<1x4x4xf32>
    %7 = vector.shape_cast %6 : vector<1x4x4xf32> to vector<4x4xf32>
    %cst = arith.constant dense<0.000000e+00> : vector<128x4xf32>
    %8 = tpu.matmul %5, %7, %cst {dimension_numbers = #tpu.dot_dimension_numbers<[1], [0], [0], [1], [0, 0, 1, 1], [], []>} : vector<128x4xf32>, vector<4x4xf32>, vector<128x4xf32> -> vector<128x4xf32>
    %c0_8 = arith.constant 0 : index
    %c0_9 = arith.constant 0 : index
    %c0_10 = arith.constant 0 : index
    %9 = vector.load %arg5[%c0_8, %c0_9, %c0_10] : memref<3x1x4xf32, #tpu.memory_space<vmem>>, vector<1x1x4xf32>
    %10 = vector.shape_cast %9 : vector<1x1x4xf32> to vector<1x4xf32>
    %11 = vector.broadcast %10 : vector<1x4xf32> to vector<128x4xf32>
    %12 = arith.addf %8, %11 : vector<128x4xf32>
    %c0_11 = arith.constant 0 : index
    %c0_12 = arith.constant 0 : index
    %c0_13 = arith.constant 0 : index
    %13 = vector.load %arg3[%c0_11, %c0_12, %c0_13] : memref<3x4x4xf32, #tpu.memory_space<vmem>>, vector<1x4x4xf32>
    %14 = vector.shape_cast %13 : vector<1x4x4xf32> to vector<4x4xf32>
    %cst_14 = arith.constant dense<0.000000e+00> : vector<128x4xf32>
    %15 = tpu.matmul %5, %14, %cst_14 {dimension_numbers = #tpu.dot_dimension_numbers<[1], [0], [0], [1], [0, 0, 1, 1], [], []>} : vector<128x4xf32>, vector<4x4xf32>, vector<128x4xf32> -> vector<128x4xf32>
    %c0_15 = arith.constant 0 : index
    %c0_16 = arith.constant 0 : index
    %c0_17 = arith.constant 0 : index
    %16 = vector.load %arg6[%c0_15, %c0_16, %c0_17] : memref<3x1x4xf32, #tpu.memory_space<vmem>>, vector<1x1x4xf32>
    %17 = vector.shape_cast %16 : vector<1x1x4xf32> to vector<1x4xf32>
    %18 = vector.broadcast %17 : vector<1x4xf32> to vector<128x4xf32>
    %19 = arith.addf %15, %18 : vector<128x4xf32>
    %c0_18 = arith.constant 0 : index
    %c0_19 = arith.constant 0 : index
    %c0_20 = arith.constant 0 : index
    %20 = vector.load %arg4[%c0_18, %c0_19, %c0_20] : memref<3x4x4xf32, #tpu.memory_space<vmem>>, vector<1x4x4xf32>
    %21 = vector.shape_cast %20 : vector<1x4x4xf32> to vector<4x4xf32>
    %cst_21 = arith.constant dense<0.000000e+00> : vector<128x4xf32>
    %22 = tpu.matmul %5, %21, %cst_21 {dimension_numbers = #tpu.dot_dimension_numbers<[1], [0], [0], [1], [0, 0, 1, 1], [], []>} : vector<128x4xf32>, vector<4x4xf32>, vector<128x4xf32> -> vector<128x4xf32>
    %c0_22 = arith.constant 0 : index
    %c0_23 = arith.constant 0 : index
    %c0_24 = arith.constant 0 : index
    %23 = vector.load %arg7[%c0_22, %c0_23, %c0_24] : memref<3x1x4xf32, #tpu.memory_space<vmem>>, vector<1x1x4xf32>
    %24 = vector.shape_cast %23 : vector<1x1x4xf32> to vector<1x4xf32>
    %25 = vector.broadcast %24 : vector<1x4xf32> to vector<128x4xf32>
    %26 = arith.addf %22, %25 : vector<128x4xf32>
    %27 = vector.shape_cast %12 : vector<128x4xf32> to vector<2x64x4xf32>
    %28 = vector.shape_cast %19 : vector<128x4xf32> to vector<2x64x4xf32>
    %29 = vector.shape_cast %26 : vector<128x4xf32> to vector<2x64x4xf32>
    "tpu.trace_start"() <{level = 10 : i32, message = "bnd,bmd->bnm"}> : () -> ()
    %cst_25 = arith.constant dense<0.000000e+00> : vector<2x64x64xf32>
    %30 = tpu.matmul %27, %28, %cst_25 {dimension_numbers = #tpu.dot_dimension_numbers<[2], [2], [1], [1], [0, 0, 0, 1, 1, 1], [0], [0]>} : vector<2x64x4xf32>, vector<2x64x4xf32>, vector<2x64x64xf32> -> vector<2x64x64xf32>
    "tpu.trace_stop"() : () -> ()
    %cst_26 = arith.constant dense<0xFF800000> : vector<2x64xf32>
    %31 = vector.multi_reduction <maximumf>, %30, %cst_26 [2] : vector<2x64x64xf32> to vector<2x64xf32>
    %32 = vector.shape_cast %31 : vector<2x64xf32> to vector<2x64x1xf32>
    %33 = vector.broadcast %32 : vector<2x64x1xf32> to vector<2x64x64xf32>
    %34 = arith.subf %30, %33 : vector<2x64x64xf32>
    %35 = math.exp %34 : vector<2x64x64xf32>
    %cst_27 = arith.constant dense<0.000000e+00> : vector<2x64xf32>
    %36 = vector.multi_reduction <add>, %35, %cst_27 [2] : vector<2x64x64xf32> to vector<2x64xf32>
    %37 = vector.shape_cast %36 : vector<2x64xf32> to vector<2x64x1xf32>
    "tpu.trace_start"() <{level = 10 : i32, message = "bnm,bmd->bnd"}> : () -> ()
    %cst_28 = arith.constant dense<0.000000e+00> : vector<2x64x4xf32>
    %38 = tpu.matmul %35, %29, %cst_28 {dimension_numbers = #tpu.dot_dimension_numbers<[2], [1], [1], [2], [0, 0, 0, 1, 1, 2], [0], [0]>} : vector<2x64x64xf32>, vector<2x64x4xf32>, vector<2x64x4xf32> -> vector<2x64x4xf32>
    "tpu.trace_stop"() : () -> ()
    %39 = tpu.reciprocal %37 {approx = true} : vector<2x64x1xf32> -> vector<2x64x1xf32>
    %40 = vector.broadcast %39 : vector<2x64x1xf32> to vector<2x64x4xf32>
    %41 = arith.mulf %38, %40 : vector<2x64x4xf32>
    %42 = vector.shape_cast %41 : vector<2x64x4xf32> to vector<128x4xf32>
    %cst_29 = arith.constant 0.000000e+00 : f32
    %43 = vector.broadcast %cst_29 : f32 to vector<128x4xf32>
    %44 = arith.maximumf %42, %43 : vector<128x4xf32>
    %c0_30 = arith.constant 0 : index
    %c0_31 = arith.constant 0 : index
    %c0_32 = arith.constant 0 : index
    %45 = vector.load %arg8[%c0_30, %c0_31, %c0_32] : memref<3x4x16xf32, #tpu.memory_space<vmem>>, vector<1x4x16xf32>
    %46 = vector.shape_cast %45 : vector<1x4x16xf32> to vector<4x16xf32>
    %cst_33 = arith.constant dense<0.000000e+00> : vector<128x16xf32>
    %47 = tpu.matmul %44, %46, %cst_33 {dimension_numbers = #tpu.dot_dimension_numbers<[1], [0], [0], [1], [0, 0, 1, 1], [], []>} : vector<128x4xf32>, vector<4x16xf32>, vector<128x16xf32> -> vector<128x16xf32>
    %48 = arith.addf %2, %47 : vector<128x16xf32>
    %c0_34 = arith.constant 0 : index
    %c1 = arith.constant 1 : index
    %c0_35 = arith.constant 0 : index
    %c0_36 = arith.constant 0 : index
    %49 = vector.load %arg1[%c0_34, %c1, %c0_35, %c0_36] : memref<2x3x64x4xf32, #tpu.memory_space<vmem>>, vector<2x1x64x4xf32>
    %50 = vector.shape_cast %49 : vector<2x1x64x4xf32> to vector<2x64x4xf32>
    %51 = vector.shape_cast %50 : vector<2x64x4xf32> to vector<128x4xf32>
    %52 = arith.addf %42, %51 : vector<128x4xf32>
    %c1_37 = arith.constant 1 : index
    %c0_38 = arith.constant 0 : index
    %c0_39 = arith.constant 0 : index
    %53 = vector.load %arg2[%c1_37, %c0_38, %c0_39] : memref<3x4x4xf32, #tpu.memory_space<vmem>>, vector<1x4x4xf32>
    %54 = vector.shape_cast %53 : vector<1x4x4xf32> to vector<4x4xf32>
    %cst_40 = arith.constant dense<0.000000e+00> : vector<128x4xf32>
    %55 = tpu.matmul %52, %54, %cst_40 {dimension_numbers = #tpu.dot_dimension_numbers<[1], [0], [0], [1], [0, 0, 1, 1], [], []>} : vector<128x4xf32>, vector<4x4xf32>, vector<128x4xf32> -> vector<128x4xf32>
    %c1_41 = arith.constant 1 : index
    %c0_42 = arith.constant 0 : index
    %c0_43 = arith.constant 0 : index
    %56 = vector.load %arg5[%c1_41, %c0_42, %c0_43] : memref<3x1x4xf32, #tpu.memory_space<vmem>>, vector<1x1x4xf32>
    %57 = vector.shape_cast %56 : vector<1x1x4xf32> to vector<1x4xf32>
    %58 = vector.broadcast %57 : vector<1x4xf32> to vector<128x4xf32>
    %59 = arith.addf %55, %58 : vector<128x4xf32>
    %c1_44 = arith.constant 1 : index
    %c0_45 = arith.constant 0 : index
    %c0_46 = arith.constant 0 : index
    %60 = vector.load %arg3[%c1_44, %c0_45, %c0_46] : memref<3x4x4xf32, #tpu.memory_space<vmem>>, vector<1x4x4xf32>
    %61 = vector.shape_cast %60 : vector<1x4x4xf32> to vector<4x4xf32>
    %cst_47 = arith.constant dense<0.000000e+00> : vector<128x4xf32>
    %62 = tpu.matmul %52, %61, %cst_47 {dimension_numbers = #tpu.dot_dimension_numbers<[1], [0], [0], [1], [0, 0, 1, 1], [], []>} : vector<128x4xf32>, vector<4x4xf32>, vector<128x4xf32> -> vector<128x4xf32>
    %c1_48 = arith.constant 1 : index
    %c0_49 = arith.constant 0 : index
    %c0_50 = arith.constant 0 : index
    %63 = vector.load %arg6[%c1_48, %c0_49, %c0_50] : memref<3x1x4xf32, #tpu.memory_space<vmem>>, vector<1x1x4xf32>
    %64 = vector.shape_cast %63 : vector<1x1x4xf32> to vector<1x4xf32>
    %65 = vector.broadcast %64 : vector<1x4xf32> to vector<128x4xf32>
    %66 = arith.addf %62, %65 : vector<128x4xf32>
    %c1_51 = arith.constant 1 : index
    %c0_52 = arith.constant 0 : index
    %c0_53 = arith.constant 0 : index
    %67 = vector.load %arg4[%c1_51, %c0_52, %c0_53] : memref<3x4x4xf32, #tpu.memory_space<vmem>>, vector<1x4x4xf32>
    %68 = vector.shape_cast %67 : vector<1x4x4xf32> to vector<4x4xf32>
    %cst_54 = arith.constant dense<0.000000e+00> : vector<128x4xf32>
    %69 = tpu.matmul %52, %68, %cst_54 {dimension_numbers = #tpu.dot_dimension_numbers<[1], [0], [0], [1], [0, 0, 1, 1], [], []>} : vector<128x4xf32>, vector<4x4xf32>, vector<128x4xf32> -> vector<128x4xf32>
    %c1_55 = arith.constant 1 : index
    %c0_56 = arith.constant 0 : index
    %c0_57 = arith.constant 0 : index
    %70 = vector.load %arg7[%c1_55, %c0_56, %c0_57] : memref<3x1x4xf32, #tpu.memory_space<vmem>>, vector<1x1x4xf32>
    %71 = vector.shape_cast %70 : vector<1x1x4xf32> to vector<1x4xf32>
    %72 = vector.broadcast %71 : vector<1x4xf32> to vector<128x4xf32>
    %73 = arith.addf %69, %72 : vector<128x4xf32>
    %74 = vector.shape_cast %59 : vector<128x4xf32> to vector<2x64x4xf32>
    %75 = vector.shape_cast %66 : vector<128x4xf32> to vector<2x64x4xf32>
    %76 = vector.shape_cast %73 : vector<128x4xf32> to vector<2x64x4xf32>
    "tpu.trace_start"() <{level = 10 : i32, message = "bnd,bmd->bnm"}> : () -> ()
    %cst_58 = arith.constant dense<0.000000e+00> : vector<2x64x64xf32>
    %77 = tpu.matmul %74, %75, %cst_58 {dimension_numbers = #tpu.dot_dimension_numbers<[2], [2], [1], [1], [0, 0, 0, 1, 1, 1], [0], [0]>} : vector<2x64x4xf32>, vector<2x64x4xf32>, vector<2x64x64xf32> -> vector<2x64x64xf32>
    "tpu.trace_stop"() : () -> ()
    %cst_59 = arith.constant dense<0xFF800000> : vector<2x64xf32>
    %78 = vector.multi_reduction <maximumf>, %77, %cst_59 [2] : vector<2x64x64xf32> to vector<2x64xf32>
    %79 = vector.shape_cast %78 : vector<2x64xf32> to vector<2x64x1xf32>
    %80 = vector.broadcast %79 : vector<2x64x1xf32> to vector<2x64x64xf32>
    %81 = arith.subf %77, %80 : vector<2x64x64xf32>
    %82 = math.exp %81 : vector<2x64x64xf32>
    %cst_60 = arith.constant dense<0.000000e+00> : vector<2x64xf32>
    %83 = vector.multi_reduction <add>, %82, %cst_60 [2] : vector<2x64x64xf32> to vector<2x64xf32>
    %84 = vector.shape_cast %83 : vector<2x64xf32> to vector<2x64x1xf32>
    "tpu.trace_start"() <{level = 10 : i32, message = "bnm,bmd->bnd"}> : () -> ()
    %cst_61 = arith.constant dense<0.000000e+00> : vector<2x64x4xf32>
    %85 = tpu.matmul %82, %76, %cst_61 {dimension_numbers = #tpu.dot_dimension_numbers<[2], [1], [1], [2], [0, 0, 0, 1, 1, 2], [0], [0]>} : vector<2x64x64xf32>, vector<2x64x4xf32>, vector<2x64x4xf32> -> vector<2x64x4xf32>
    "tpu.trace_stop"() : () -> ()
    %86 = tpu.reciprocal %84 {approx = true} : vector<2x64x1xf32> -> vector<2x64x1xf32>
    %87 = vector.broadcast %86 : vector<2x64x1xf32> to vector<2x64x4xf32>
    %88 = arith.mulf %85, %87 : vector<2x64x4xf32>
    %89 = vector.shape_cast %88 : vector<2x64x4xf32> to vector<128x4xf32>
    %cst_62 = arith.constant 0.000000e+00 : f32
    %90 = vector.broadcast %cst_62 : f32 to vector<128x4xf32>
    %91 = arith.maximumf %89, %90 : vector<128x4xf32>
    %c1_63 = arith.constant 1 : index
    %c0_64 = arith.constant 0 : index
    %c0_65 = arith.constant 0 : index
    %92 = vector.load %arg8[%c1_63, %c0_64, %c0_65] : memref<3x4x16xf32, #tpu.memory_space<vmem>>, vector<1x4x16xf32>
    %93 = vector.shape_cast %92 : vector<1x4x16xf32> to vector<4x16xf32>
    %cst_66 = arith.constant dense<0.000000e+00> : vector<128x16xf32>
    %94 = tpu.matmul %91, %93, %cst_66 {dimension_numbers = #tpu.dot_dimension_numbers<[1], [0], [0], [1], [0, 0, 1, 1], [], []>} : vector<128x4xf32>, vector<4x16xf32>, vector<128x16xf32> -> vector<128x16xf32>
    %95 = arith.addf %48, %94 : vector<128x16xf32>
    %c0_67 = arith.constant 0 : index
    %c2 = arith.constant 2 : index
    %c0_68 = arith.constant 0 : index
    %c0_69 = arith.constant 0 : index
    %96 = vector.load %arg1[%c0_67, %c2, %c0_68, %c0_69] : memref<2x3x64x4xf32, #tpu.memory_space<vmem>>, vector<2x1x64x4xf32>
    %97 = vector.shape_cast %96 : vector<2x1x64x4xf32> to vector<2x64x4xf32>
    %98 = vector.shape_cast %97 : vector<2x64x4xf32> to vector<128x4xf32>
    %99 = arith.addf %89, %98 : vector<128x4xf32>
    %c2_70 = arith.constant 2 : index
    %c0_71 = arith.constant 0 : index
    %c0_72 = arith.constant 0 : index
    %100 = vector.load %arg2[%c2_70, %c0_71, %c0_72] : memref<3x4x4xf32, #tpu.memory_space<vmem>>, vector<1x4x4xf32>
    %101 = vector.shape_cast %100 : vector<1x4x4xf32> to vector<4x4xf32>
    %cst_73 = arith.constant dense<0.000000e+00> : vector<128x4xf32>
    %102 = tpu.matmul %99, %101, %cst_73 {dimension_numbers = #tpu.dot_dimension_numbers<[1], [0], [0], [1], [0, 0, 1, 1], [], []>} : vector<128x4xf32>, vector<4x4xf32>, vector<128x4xf32> -> vector<128x4xf32>
    %c2_74 = arith.constant 2 : index
    %c0_75 = arith.constant 0 : index
    %c0_76 = arith.constant 0 : index
    %103 = vector.load %arg5[%c2_74, %c0_75, %c0_76] : memref<3x1x4xf32, #tpu.memory_space<vmem>>, vector<1x1x4xf32>
    %104 = vector.shape_cast %103 : vector<1x1x4xf32> to vector<1x4xf32>
    %105 = vector.broadcast %104 : vector<1x4xf32> to vector<128x4xf32>
    %106 = arith.addf %102, %105 : vector<128x4xf32>
    %c2_77 = arith.constant 2 : index
    %c0_78 = arith.constant 0 : index
    %c0_79 = arith.constant 0 : index
    %107 = vector.load %arg3[%c2_77, %c0_78, %c0_79] : memref<3x4x4xf32, #tpu.memory_space<vmem>>, vector<1x4x4xf32>
    %108 = vector.shape_cast %107 : vector<1x4x4xf32> to vector<4x4xf32>
    %cst_80 = arith.constant dense<0.000000e+00> : vector<128x4xf32>
    %109 = tpu.matmul %99, %108, %cst_80 {dimension_numbers = #tpu.dot_dimension_numbers<[1], [0], [0], [1], [0, 0, 1, 1], [], []>} : vector<128x4xf32>, vector<4x4xf32>, vector<128x4xf32> -> vector<128x4xf32>
    %c2_81 = arith.constant 2 : index
    %c0_82 = arith.constant 0 : index
    %c0_83 = arith.constant 0 : index
    %110 = vector.load %arg6[%c2_81, %c0_82, %c0_83] : memref<3x1x4xf32, #tpu.memory_space<vmem>>, vector<1x1x4xf32>
    %111 = vector.shape_cast %110 : vector<1x1x4xf32> to vector<1x4xf32>
    %112 = vector.broadcast %111 : vector<1x4xf32> to vector<128x4xf32>
    %113 = arith.addf %109, %112 : vector<128x4xf32>
    %c2_84 = arith.constant 2 : index
    %c0_85 = arith.constant 0 : index
    %c0_86 = arith.constant 0 : index
    %114 = vector.load %arg4[%c2_84, %c0_85, %c0_86] : memref<3x4x4xf32, #tpu.memory_space<vmem>>, vector<1x4x4xf32>
    %115 = vector.shape_cast %114 : vector<1x4x4xf32> to vector<4x4xf32>
    %cst_87 = arith.constant dense<0.000000e+00> : vector<128x4xf32>
    %116 = tpu.matmul %99, %115, %cst_87 {dimension_numbers = #tpu.dot_dimension_numbers<[1], [0], [0], [1], [0, 0, 1, 1], [], []>} : vector<128x4xf32>, vector<4x4xf32>, vector<128x4xf32> -> vector<128x4xf32>
    %c2_88 = arith.constant 2 : index
    %c0_89 = arith.constant 0 : index
    %c0_90 = arith.constant 0 : index
    %117 = vector.load %arg7[%c2_88, %c0_89, %c0_90] : memref<3x1x4xf32, #tpu.memory_space<vmem>>, vector<1x1x4xf32>
    %118 = vector.shape_cast %117 : vector<1x1x4xf32> to vector<1x4xf32>
    %119 = vector.broadcast %118 : vector<1x4xf32> to vector<128x4xf32>
    %120 = arith.addf %116, %119 : vector<128x4xf32>
    %121 = vector.shape_cast %106 : vector<128x4xf32> to vector<2x64x4xf32>
    %122 = vector.shape_cast %113 : vector<128x4xf32> to vector<2x64x4xf32>
    %123 = vector.shape_cast %120 : vector<128x4xf32> to vector<2x64x4xf32>
    "tpu.trace_start"() <{level = 10 : i32, message = "bnd,bmd->bnm"}> : () -> ()
    %cst_91 = arith.constant dense<0.000000e+00> : vector<2x64x64xf32>
    %124 = tpu.matmul %121, %122, %cst_91 {dimension_numbers = #tpu.dot_dimension_numbers<[2], [2], [1], [1], [0, 0, 0, 1, 1, 1], [0], [0]>} : vector<2x64x4xf32>, vector<2x64x4xf32>, vector<2x64x64xf32> -> vector<2x64x64xf32>
    "tpu.trace_stop"() : () -> ()
    %cst_92 = arith.constant dense<0xFF800000> : vector<2x64xf32>
    %125 = vector.multi_reduction <maximumf>, %124, %cst_92 [2] : vector<2x64x64xf32> to vector<2x64xf32>
    %126 = vector.shape_cast %125 : vector<2x64xf32> to vector<2x64x1xf32>
    %127 = vector.broadcast %126 : vector<2x64x1xf32> to vector<2x64x64xf32>
    %128 = arith.subf %124, %127 : vector<2x64x64xf32>
    %129 = math.exp %128 : vector<2x64x64xf32>
    %cst_93 = arith.constant dense<0.000000e+00> : vector<2x64xf32>
    %130 = vector.multi_reduction <add>, %129, %cst_93 [2] : vector<2x64x64xf32> to vector<2x64xf32>
    %131 = vector.shape_cast %130 : vector<2x64xf32> to vector<2x64x1xf32>
    "tpu.trace_start"() <{level = 10 : i32, message = "bnm,bmd->bnd"}> : () -> ()
    %cst_94 = arith.constant dense<0.000000e+00> : vector<2x64x4xf32>
    %132 = tpu.matmul %129, %123, %cst_94 {dimension_numbers = #tpu.dot_dimension_numbers<[2], [1], [1], [2], [0, 0, 0, 1, 1, 2], [0], [0]>} : vector<2x64x64xf32>, vector<2x64x4xf32>, vector<2x64x4xf32> -> vector<2x64x4xf32>
    "tpu.trace_stop"() : () -> ()
    %133 = tpu.reciprocal %131 {approx = true} : vector<2x64x1xf32> -> vector<2x64x1xf32>
    %134 = vector.broadcast %133 : vector<2x64x1xf32> to vector<2x64x4xf32>
    %135 = arith.mulf %132, %134 : vector<2x64x4xf32>
    %136 = vector.shape_cast %135 : vector<2x64x4xf32> to vector<128x4xf32>
    %cst_95 = arith.constant 0.000000e+00 : f32
    %137 = vector.broadcast %cst_95 : f32 to vector<128x4xf32>
    %138 = arith.maximumf %136, %137 : vector<128x4xf32>
    %c2_96 = arith.constant 2 : index
    %c0_97 = arith.constant 0 : index
    %c0_98 = arith.constant 0 : index
    %139 = vector.load %arg8[%c2_96, %c0_97, %c0_98] : memref<3x4x16xf32, #tpu.memory_space<vmem>>, vector<1x4x16xf32>
    %140 = vector.shape_cast %139 : vector<1x4x16xf32> to vector<4x16xf32>
    %cst_99 = arith.constant dense<0.000000e+00> : vector<128x16xf32>
    %141 = tpu.matmul %138, %140, %cst_99 {dimension_numbers = #tpu.dot_dimension_numbers<[1], [0], [0], [1], [0, 0, 1, 1], [], []>} : vector<128x4xf32>, vector<4x16xf32>, vector<128x16xf32> -> vector<128x16xf32>
    %142 = arith.addf %95, %141 : vector<128x16xf32>
    %143 = vector.shape_cast %142 : vector<128x16xf32> to vector<2x64x16xf32>
    %c0_100 = arith.constant 0 : index
    %c0_101 = arith.constant 0 : index
    %c0_102 = arith.constant 0 : index
    %144 = vector.load %arg10[%c0_100, %c0_101, %c0_102] : memref<2x64x16xf32, #tpu.memory_space<vmem>>, vector<2x64x16xf32>
    tpu.vector_store %arg10[%c0_100, %c0_101, %c0_102], %143 {strides = array<i32>} : memref<2x64x16xf32, #tpu.memory_space<vmem>>, vector<2x64x16xf32>,
    return
  }
  func.func @transform_0(%arg0: i32) -> (i32, i32, i32, i32) {
    %c0_i32 = arith.constant 0 : i32
    %c0_i32_0 = arith.constant 0 : i32
    %c0_i32_1 = arith.constant 0 : i32
    %c0_i32_2 = arith.constant 0 : i32
    return %arg0, %c0_i32, %c0_i32_0, %c0_i32_1 : i32, i32, i32, i32
  }
  func.func @transform_1(%arg0: i32) -> (i32, i32, i32) {
    %c0_i32 = arith.constant 0 : i32
    %c0_i32_0 = arith.constant 0 : i32
    %c0_i32_1 = arith.constant 0 : i32
    %c0_i32_2 = arith.constant 0 : i32
    return %c0_i32, %c0_i32_0, %c0_i32_1 : i32, i32, i32
  }
  func.func @transform_2(%arg0: i32) -> (i32, i32, i32) {
    %c0_i32 = arith.constant 0 : i32
    %c0_i32_0 = arith.constant 0 : i32
    %c0_i32_1 = arith.constant 0 : i32
    %c0_i32_2 = arith.constant 0 : i32
    return %c0_i32, %c0_i32_0, %c0_i32_1 : i32, i32, i32
  }
  func.func @transform_3(%arg0: i32) -> (i32, i32, i32) {
    %c0_i32 = arith.constant 0 : i32
    %c0_i32_0 = arith.constant 0 : i32
    %c0_i32_1 = arith.constant 0 : i32
    %c0_i32_2 = arith.constant 0 : i32
    return %c0_i32, %c0_i32_0, %c0_i32_1 : i32, i32, i32
  }
  func.func @transform_4(%arg0: i32) -> (i32, i32, i32) {
    %c0_i32 = arith.constant 0 : i32
    %c0_i32_0 = arith.constant 0 : i32
    %c0_i32_1 = arith.constant 0 : i32
    %c0_i32_2 = arith.constant 0 : i32
    return %c0_i32, %c0_i32_0, %c0_i32_1 : i32, i32, i32
  }
  func.func @transform_5(%arg0: i32) -> (i32, i32, i32) {
    %c0_i32 = arith.constant 0 : i32
    %c0_i32_0 = arith.constant 0 : i32
    %c0_i32_1 = arith.constant 0 : i32
    %c0_i32_2 = arith.constant 0 : i32
    return %c0_i32, %c0_i32_0, %c0_i32_1 : i32, i32, i32
  }
  func.func @transform_6(%arg0: i32) -> (i32, i32, i32) {
    %c0_i32 = arith.constant 0 : i32
    %c0_i32_0 = arith.constant 0 : i32
    %c0_i32_1 = arith.constant 0 : i32
    %c0_i32_2 = arith.constant 0 : i32
    return %c0_i32, %c0_i32_0, %c0_i32_1 : i32, i32, i32
  }
  func.func @transform_7(%arg0: i32) -> (i32, i32, i32) {
    %c0_i32 = arith.constant 0 : i32
    %c0_i32_0 = arith.constant 0 : i32
    %c0_i32_1 = arith.constant 0 : i32
    %c0_i32_2 = arith.constant 0 : i32
    return %c0_i32, %c0_i32_0, %c0_i32_1 : i32, i32, i32
  }
  func.func @transform_8(%arg0: i32) -> (i32, i32) {
    %c0_i32 = arith.constant 0 : i32
    %c0_i32_0 = arith.constant 0 : i32
    %c0_i32_1 = arith.constant 0 : i32
    return %c0_i32, %c0_i32_0 : i32, i32
  }
  func.func @transform_9(%arg0: i32) -> (i32, i32, i32) {
    %c0_i32 = arith.constant 0 : i32
    %c0_i32_0 = arith.constant 0 : i32
    %c0_i32_1 = arith.constant 0 : i32
    return %arg0, %c0_i32, %c0_i32_0 : i32, i32, i32
  }
}

</mosaic_0001>

<bundles_post_ra>
// kernel: tpu_custom_call.1
= control target key start
LH: loop header
LB: loop body
LE: loop exit
PB: predicated region body
PF: predicated region fallthrough
CT: control target
= control target key end

     0   :  { %vm106_vm0 = vcmask 1043456   ;;  %vm57_vm1 = vcmask 31744   ;;  %vm499_vm2 = vcmask 523264   ;;  %vm2835_vm3 = vcmask 130048   ;;  %s4687_s2 = inlined_call_operand.vmem [shape: f32[3,4,4], index: 2, kind: input, shape index: {}]   ;;  %s4688_s0 = inlined_call_operand.vmem [shape: f32[2,3,64,4], index: 0, kind: input, shape index: {}]   ;;  %s4689_s5 = inlined_call_operand.vmem [shape: f32[3,1,4], index: 5, kind: input, shape index: {}]   ;;  %s4690_s3 = inlined_call_operand.vmem [shape: f32[3,4,4], index: 3, kind: input, shape index: {}]   ;;  %s4691_s1 = inlined_call_operand.vmem [shape: f32[3,4,4], index: 1, kind: input, shape index: {}]   ;;  %s4692_s4 = inlined_call_operand.vmem [shape: f32[3,1,4], index: 4, kind: input, shape index: {}]   ;;  %s4693_s6 = inlined_call_operand.vmem [shape: f32[3,1,4], index: 6, kind: input, shape index: {}]   ;;  %s4694_s7 = inlined_call_operand.vmem [shape: f32[3,4,16], index: 7, kind: input, shape index: {}]   ;;  %s4695_s8 = inlined_call_operand.vmem [shape: f32[1,16], index: 8, kind: input, shape index: {}]   ;;  %s4696_s9 = inlined_call_operand.vmem [shape: f32[2,64,16], index: 9, kind: output, shape index: {}]  }
   0x1   :  { %v175_v0 = vld [vmem:[%s4687_s2] sm:$0xf]  ;;  %v37_v2 = vld [vmem:[%s4688_s0 + $0x8] sm:$0xff]  ;;  %v38_v3 = vld [vmem:[%s4688_s0 + $0x10] sm:$0xff] }
   0x2   :  { %2873 = vmatpush.msk.msra.mxu1 %vm106_vm0, %v175_v0  ;;  %v36_v1 = vld [vmem:[%s4688_s0] sm:$0xff]  ;;  %v39_v4 = vld [vmem:[%s4688_s0 + $0x18] sm:$0xff]  ;;  %v41_v6 = vld [vmem:[%s4688_s0 + $0x28] sm:$0xff] }
   0x3   :  { %2874 = vmatmul.msk.f32.vlgmr.msra.gmra.mxu1 %vm57_vm1, %v36_v1  ;;  %v40_v5 = vld [vmem:[%s4688_s0 + $0x20] sm:$0xff]  ;;  %v42_v7 = vld [vmem:[%s4688_s0 + $0x30] sm:$0xff]  ;;  %v43_v11 = vld [vmem:[%s4688_s0 + $0x38] sm:$0xff] }
   0x4   :  { %v248_v8 = vld [vmem:[%s4690_s3] sm:$0xf]  ;;  %v45_v12 = vld [vmem:[%s4688_s0 + $0xc8] sm:$0xff]  ;;  %v46_v13 = vld [vmem:[%s4688_s0 + $0xd0] sm:$0xff] }
   0x5   :  { %v44_v9 = vld [vmem:[%s4688_s0 + $0xc0] sm:$0xff]  ;;  %3250 = vmatpush.msk.msra.mxu3 %vm106_vm0, %v248_v8  ;;  %2890 = vmatpush.msk.msra.mxu2 %vm106_vm0, %v248_v8  ;;  %v47_v14 = vld [vmem:[%s4688_s0 + $0xd8] sm:$0xff]  ;;  %v49_v16 = vld [vmem:[%s4688_s0 + $0xe8] sm:$0xff] }
   0x6   :  { %v52_v10 = vld [vmem:[%s4691_s1] sm:$0xf]  ;;  %2899 = vmatmul.msk.f32.vlgmr.msra.gmra.mxu3 %vm57_vm1, %v44_v9  ;;  %2891 = vmatmul.msk.f32.vlgmr.msra.gmra.mxu2 %vm57_vm1, %v36_v1  ;;  %v50_v17 = vld [vmem:[%s4688_s0 + $0xf0] sm:$0xff]  ;;  %v51_v18 = vld [vmem:[%s4688_s0 + $0xf8] sm:$0xff] }
   0x7   :  { %2856 = vmatpush.msk.msra.mxu0 %vm106_vm0, %v52_v10  ;;  %v48_v15 = vld [vmem:[%s4688_s0 + $0xe0] sm:$0xff] }
   0x8   :  { %2857 = vmatmul.msk.f32.vlgmr.msra.gmra.mxu0 %vm57_vm1, %v36_v1  ;;  %v3615_v27 = vld [vmem:[%s4689_s5] ss:$0 sm:$0xff] }
   0x9   :  { %v3641_v45 = vld [vmem:[%s4692_s4] ss:$0 sm:$0xff] }
   0xa   :  { %v3656_v60 = vld [vmem:[%s4693_s6] ss:$0 sm:$0xff] }
   0xb   :  { %2875 = vmatmul.msk.f32.gmra.mxu1 %vm57_vm1, %v37_v2 }
   0xe   :  { %2900 = vmatmul.msk.f32.gmra.mxu3 %vm57_vm1, %v45_v12  ;;  %2892 = vmatmul.msk.f32.gmra.mxu2 %vm57_vm1, %v37_v2 }
  0x10   :  { %2858 = vmatmul.msk.f32.gmra.mxu0 %vm57_vm1, %v37_v2 }
  0x13   :  { %2876 = vmatmul.msk.f32.gmra.mxu1 %vm57_vm1, %v38_v3 }
  0x16   :  { %2901 = vmatmul.msk.f32.gmra.mxu3 %vm57_vm1, %v46_v13  ;;  %2893 = vmatmul.msk.f32.gmra.mxu2 %vm57_vm1, %v38_v3 }
  0x18   :  { %2859 = vmatmul.msk.f32.gmra.mxu0 %vm57_vm1, %v38_v3 }
  0x1b   :  { %2877 = vmatmul.msk.f32.gmra.mxu1 %vm57_vm1, %v39_v4 }
  0x1e   :  { %2902 = vmatmul.msk.f32.gmra.mxu3 %vm57_vm1, %v47_v14  ;;  %2894 = vmatmul.msk.f32.gmra.mxu2 %vm57_vm1, %v39_v4 }
  0x20   :  { %2860 = vmatmul.msk.f32.gmra.mxu0 %vm57_vm1, %v39_v4 }
  0x23   :  { %2878 = vmatmul.msk.f32.gmra.mxu1 %vm57_vm1, %v40_v5 }
  0x26   :  { %2903 = vmatmul.msk.f32.gmra.mxu3 %vm57_vm1, %v48_v15  ;;  %2895 = vmatmul.msk.f32.gmra.mxu2 %vm57_vm1, %v40_v5 }
  0x28   :  { %2861 = vmatmul.msk.f32.gmra.mxu0 %vm57_vm1, %v40_v5 }
  0x2b   :  { %2879 = vmatmul.msk.f32.gmra.mxu1 %vm57_vm1, %v41_v6 }
  0x2e   :  { %2904 = vmatmul.msk.f32.gmra.mxu3 %vm57_vm1, %v49_v16  ;;  %2896 = vmatmul.msk.f32.gmra.mxu2 %vm57_vm1, %v41_v6 }
  0x30   :  { %2862 = vmatmul.msk.f32.gmra.mxu0 %vm57_vm1, %v41_v6 }
  0x33   :  { %2880 = vmatmul.msk.f32.gmra.mxu1 %vm57_vm1, %v42_v7 }
  0x36   :  { %2905 = vmatmul.msk.f32.gmra.mxu3 %vm57_vm1, %v50_v17  ;;  %2897 = vmatmul.msk.f32.gmra.mxu2 %vm57_vm1, %v42_v7 }
  0x38   :  { %2863 = vmatmul.msk.f32.gmra.mxu0 %vm57_vm1, %v42_v7 }
  0x3b   :  { %2881 = vmatmul.msk.f32.gmra.mxu1 %vm57_vm1, %v43_v11 }
  0x3e   :  { %2906 = vmatmul.msk.f32.gmra.mxu3 %vm57_vm1, %v51_v18  ;;  %2898 = vmatmul.msk.f32.gmra.mxu2 %vm57_vm1, %v43_v11 }
  0x40   :  { %2864 = vmatmul.msk.f32.gmra.mxu0 %vm57_vm1, %v43_v11 }
  0x43   :  { %2882 = vmatmul.msk.f32.gmra.mxu1 %vm57_vm1, %v44_v9 }
  0x48   :  { %2865 = vmatmul.msk.f32.gmra.mxu0 %vm57_vm1, %v44_v9 }
  0x4b   :  { %2883 = vmatmul.msk.f32.gmra.mxu1 %vm57_vm1, %v45_v12 }
  0x50   :  { %2866 = vmatmul.msk.f32.gmra.mxu0 %vm57_vm1, %v45_v12 }
  0x53   :  { %2884 = vmatmul.msk.f32.gmra.mxu1 %vm57_vm1, %v46_v13 }
  0x58   :  { %2867 = vmatmul.msk.f32.gmra.mxu0 %vm57_vm1, %v46_v13  ;;  %v3026_v13 = vld [vmem:[%s4690_s3 + $0x4] sm:$0xf] }
  0x5b   :  { %2885 = vmatmul.msk.f32.gmra.mxu1 %vm57_vm1, %v47_v14 }
  0x60   :  { %2868 = vmatmul.msk.f32.gmra.mxu0 %vm57_vm1, %v47_v14 }
  0x63   :  { %2886 = vmatmul.msk.f32.gmra.mxu1 %vm57_vm1, %v48_v15 }
  0x68   :  { %2869 = vmatmul.msk.f32.gmra.mxu0 %vm57_vm1, %v48_v15 }
  0x6b   :  { %2887 = vmatmul.msk.f32.gmra.mxu1 %vm57_vm1, %v49_v16 }
  0x70   :  { %2870 = vmatmul.msk.f32.gmra.mxu0 %vm57_vm1, %v49_v16 }
  0x73   :  { %2888 = vmatmul.msk.f32.gmra.mxu1 %vm57_vm1, %v50_v17 }
  0x78   :  { %2871 = vmatmul.msk.f32.gmra.mxu0 %vm57_vm1, %v50_v17 }
  0x7b   :  { %2889 = vmatmul.msk.f32.gmra.mxu1 %vm57_vm1, %v51_v18 }
  0x80   :  { %v200_v19 = vpop.f32.mrf.mxu1  ;;  %2872 = vmatmul.msk.f32.gmra.mxu0 %vm57_vm1, %v51_v18 }
  0x81   :  { %v201_v47 = vadd.f32 %v3615_v27, %v200_v19 }
  0x85   :  { %v127_v26 = vpop.f32.mrf.mxu0 }
  0x86   :  { %v128_v48 = vadd.f32 %v3641_v45, %v127_v26 }
  0x88   :  { %v203_v20 = vpop.f32.mrf.mxu1 }
  0x89   :  { %v3617_v28 = vpop.f32.mrf.mxu3  ;;  %v204_v44 = vadd.f32 %v3615_v27, %v203_v20 }
  0x8a   :  { %v298_v11 = vadd.f32 %v3656_v60, %v3617_v28 }
  0x8d   :  { %v130_v32 = vpop.f32.mrf.mxu0 }
  0x8e   :  { %v131_v52 = vadd.f32 %v3641_v45, %v130_v32 }
  0x90   :  { %v206_v21 = vpop.f32.mrf.mxu1 }
  0x91   :  { %v300_v33 = vpop.f32.mrf.mxu3  ;;  %v207_v41 = vadd.f32 %v3615_v27, %v206_v21 }
  0x92   :  { %v301_v9 = vadd.f32 %v3656_v60, %v300_v33 }
  0x95   :  { %v133_v40 = vpop.f32.mrf.mxu0 }
  0x96   :  { %v134_v55 = vadd.f32 %v3641_v45, %v133_v40 }
  0x98   :  { %v209_v22 = vpop.f32.mrf.mxu1 }
  0x99   :  { %v303_v37 = vpop.f32.mrf.mxu3  ;;  %v210_v39 = vadd.f32 %v3615_v27, %v209_v22 }
  0x9a   :  { %v304_v8 = vadd.f32 %v3656_v60, %v303_v37 }
  0x9d   :  { %v136_v46 = vpop.f32.mrf.mxu0 }
  0x9e   :  { %v137_v59 = vadd.f32 %v3641_v45, %v136_v46 }
  0xa0   :  { %v212_v23 = vpop.f32.mrf.mxu1 }
  0xa1   :  { %v213_v36 = vadd.f32 %v3615_v27, %v212_v23  ;;  %v306_v42 = vpop.f32.mrf.mxu3 }
  0xa2   :  { %v307_v6 = vadd.f32 %v3656_v60, %v306_v42 }
  0xa5   :  { %v139_v51 = vpop.f32.mrf.mxu0 }
  0xa6   :  { %v140_v3 = vadd.f32 %v3641_v45, %v139_v51 }
  0xa8   :  { %v215_v24 = vpop.f32.mrf.mxu1 }
  0xa9   :  { %v216_v35 = vadd.f32 %v3615_v27, %v215_v24  ;;  %v309_v49 = vpop.f32.mrf.mxu3  ;;  %v2988_v24 = vld [vmem:[%s4691_s1 + $0x4] sm:$0xf] }
  0xaa   :  { %v310_v4 = vadd.f32 %v3656_v60, %v309_v49 }
  0xad   :  { %v142_v56 = vpop.f32.mrf.mxu0 }
  0xae   :  { %v143_v14 = vadd.f32 %v3641_v45, %v142_v56 }
  0xb0   :  { %v218_v25 = vpop.f32.mrf.mxu1 }
  0xb1   :  { %v219_v31 = vadd.f32 %v3615_v27, %v218_v25  ;;  %v312_v53 = vpop.f32.mrf.mxu3 }
  0xb2   :  { %v313_v2 = vadd.f32 %v3656_v60, %v312_v53 }
  0xb5   :  { %v145_v0 = vpop.f32.mrf.mxu0 }
  0xb6   :  { %v146_v18 = vadd.f32 %v3641_v45, %v145_v0 }
  0xb8   :  { %v221_v29 = vpop.f32.mrf.mxu1 }
  0xb9   :  { %v222_v30 = vadd.f32 %v3615_v27, %v221_v29  ;;  %v315_v57 = vpop.f32.mrf.mxu3  ;;  %v273_v29 = vpop.f32.mrf.mxu2 }
  0xba   :  { %v316_v1 = vadd.f32 %v3656_v60, %v315_v57 }
  0xbb   :  { %2907 = vmatpush.xpose.msk.msrb.mxu3 %vm57_vm1, %v222_v30 }
  0xbd   :  { %v148_v10 = vpop.f32.mrf.mxu0 }
  0xbe   :  { %v149_v21 = vadd.f32 %v3641_v45, %v148_v10 }
  0xbf   :  { %2908 = vmatpush.xpose.msk.msrb.mxu3 %vm57_vm1, %v219_v31 }
  0xc0   :  { %v3623_v34 = vpop.f32.mrf.mxu1 }
  0xc1   :  { %v318_v61 = vpop.f32.mrf.mxu3  ;;  %v225_v25 = vadd.f32 %v3615_v27, %v3623_v34  ;;  %v276_v31 = vpop.f32.mrf.mxu2 }
  0xc2   :  { %v319_v63 = vadd.f32 %v3656_v60, %v318_v61  ;;  %v277_v57 = vadd.f32 %v3656_v60, %v276_v31  ;;  %v3007_v61 = vld [vmem:[%s4687_s2 + $0x4] sm:$0xf] }
  0xc3   :  { %2909 = vmatpush.xpose.msk.msrb.mxu3 %vm57_vm1, %v216_v35 }
  0xc4   :  { %741 = vmatpush.msrb.mxu1 %v319_v63 }
  0xc5   :  { %v151_v17 = vpop.f32.mrf.mxu0 }
  0xc6   :  { %742 = vmatpush.msrb.mxu1 %v316_v1  ;;  %v152_v26 = vadd.f32 %v3641_v45, %v151_v17 }
  0xc7   :  { %2910 = vmatpush.xpose.msk.msrb.mxu3 %vm57_vm1, %v213_v36 }
  0xc8   :  { %v3629_v38 = vpop.f32.mrf.mxu1  ;;  %743 = vmatpush.msrb.mxu1 %v313_v2 }
  0xc9   :  { %v228_v23 = vadd.f32 %v3615_v27, %v3629_v38 }
  0xca   :  { %744 = vmatpush.msrb.mxu1 %v310_v4 }
  0xcb   :  { %2911 = vmatpush.xpose.msk.msrb.mxu3 %vm57_vm1, %v210_v39 }
  0xcc   :  { %745 = vmatpush.msrb.mxu1 %v307_v6 }
  0xcd   :  { %v154_v22 = vpop.f32.mrf.mxu0 }
  0xce   :  { %746 = vmatpush.msrb.mxu1 %v304_v8  ;;  %v155_v30 = vadd.f32 %v3641_v45, %v154_v22 }
  0xcf   :  { %2912 = vmatpush.xpose.msk.msrb.mxu3 %vm57_vm1, %v207_v41 }
  0xd0   :  { %v3635_v43 = vpop.f32.mrf.mxu1  ;;  %747 = vmatpush.msrb.mxu1 %v301_v9 }
  0xd1   :  { %v231_v20 = vadd.f32 %v3615_v27, %v3635_v43 }
  0xd2   :  { %748 = vmatpush.msrb.mxu1 %v298_v11 }
  0xd3   :  { %2913 = vmatpush.xpose.msk.msrb.mxu3 %vm57_vm1, %v204_v44 }
  0xd4   :  { %3028 = vmatpush.msk.msra.mxu1 %vm106_vm0, %v3026_v13 }
  0xd5   :  { %v157_v28 = vpop.f32.mrf.mxu0 }
  0xd6   :  { %v158_v33 = vadd.f32 %v3641_v45, %v157_v28 }
  0xd7   :  { %2914 = vmatpush.xpose.msk.msrb.mxu3 %vm57_vm1, %v201_v47 }
  0xd8   :  { %v233_v50 = vpop.f32.mrf.mxu1 }
  0xd9   :  { %v234_v19 = vadd.f32 %v3615_v27, %v233_v50 }
  0xda   :  { %2915 = vmatmul.msk.f32.vlgmr.msrb.gmra.mxu3 %vm57_vm1, %v128_v48 }
  0xdd   :  { %v160_v32 = vpop.f32.mrf.mxu0 }
  0xde   :  { %v161_v35 = vadd.f32 %v3641_v45, %v160_v32 }
  0xe0   :  { %v236_v54 = vpop.f32.mrf.mxu1 }
  0xe1   :  { %v237_v16 = vadd.f32 %v3615_v27, %v236_v54 }
  0xe2   :  { %2916 = vmatmul.msk.f32.gmra.mxu3 %vm57_vm1, %v131_v52 }
  0xe5   :  { %v163_v34 = vpop.f32.mrf.mxu0 }
  0xe6   :  { %v164_v37 = vadd.f32 %v3641_v45, %v163_v34 }
  0xe8   :  { %v239_v58 = vpop.f32.mrf.mxu1 }
  0xe9   :  { %v240_v15 = vadd.f32 %v3615_v27, %v239_v58  ;;  %v274_v58 = vadd.f32 %v3656_v60, %v273_v29 }
  0xea   :  { %2917 = vmatmul.msk.f32.gmra.mxu3 %vm57_vm1, %v134_v55 }
  0xed   :  { %v166_v38 = vpop.f32.mrf.mxu0 }
  0xee   :  { %v167_v40 = vadd.f32 %v3641_v45, %v166_v38 }
  0xf0   :  { %v242_v62 = vpop.f32.mrf.mxu1 }
  0xf1   :  { %v243_v12 = vadd.f32 %v3615_v27, %v242_v62 }
  0xf2   :  { %2918 = vmatmul.msk.f32.gmra.mxu3 %vm57_vm1, %v137_v59 }
  0xf5   :  { %v169_v41 = vpop.f32.mrf.mxu0 }
  0xf6   :  { %v170_v43 = vadd.f32 %v3641_v45, %v169_v41 }
  0xf8   :  { %v245_v5 = vpop.f32.mrf.mxu1 }
  0xf9   :  { %v246_v7 = vadd.f32 %v3615_v27, %v245_v5  ;;  %v279_v27 = vpop.f32.mrf.mxu2 }
  0xfa   :  { %2919 = vmatmul.msk.f32.gmra.mxu3 %vm57_vm1, %v140_v3  ;;  %v280_v55 = vadd.f32 %v3656_v60, %v279_v27 }
  0xfb   :  { %2923 = vmatpush.xpose.msk.msra.mxu3 %vm57_vm1, %v246_v7 }
  0xfd   :  { %v172_v44 = vpop.f32.mrf.mxu0 }
  0xfe   :  { %v173_v47 = vadd.f32 %v3641_v45, %v172_v44 }
  0xff   :  { %2924 = vmatpush.xpose.msk.msra.mxu3 %vm57_vm1, %v243_v12 }
 0x101   :  { %v282_v36 = vpop.f32.mrf.mxu2 }
 0x102   :  { %2920 = vmatmul.msk.f32.gmra.mxu3 %vm57_vm1, %v143_v14  ;;  %v283_v45 = vadd.f32 %v3656_v60, %v282_v36 }
 0x103   :  { %2925 = vmatpush.xpose.msk.msra.mxu3 %vm57_vm1, %v240_v15 }
 0x107   :  { %2926 = vmatpush.xpose.msk.msra.mxu3 %vm57_vm1, %v237_v16 }
 0x109   :  { %v285_v39 = vpop.f32.mrf.mxu2 }
 0x10a   :  { %2921 = vmatmul.msk.f32.gmra.mxu3 %vm57_vm1, %v146_v18  ;;  %v286_v53 = vadd.f32 %v3656_v60, %v285_v39 }
 0x10b   :  { %2927 = vmatpush.xpose.msk.msra.mxu3 %vm57_vm1, %v234_v19 }
 0x10f   :  { %2928 = vmatpush.xpose.msk.msra.mxu3 %vm57_vm1, %v231_v20 }
 0x111   :  { %v288_v42 = vpop.f32.mrf.mxu2 }
 0x112   :  { %2922 = vmatmul.msk.f32.gmra.mxu3 %vm57_vm1, %v149_v21  ;;  %v289_v52 = vadd.f32 %v3656_v60, %v288_v42 }
 0x113   :  { %2929 = vmatpush.xpose.msk.msra.mxu3 %vm57_vm1, %v228_v23 }
 0x117   :  { %2930 = vmatpush.xpose.msk.msra.mxu3 %vm57_vm1, %v225_v25 }
 0x119   :  { %v291_v46 = vpop.f32.mrf.mxu2 }
 0x11a   :  { %2931 = vmatmul.msk.f32.vlgmr.msra.gmra.mxu3 %vm57_vm1, %v152_v26  ;;  %v292_v50 = vadd.f32 %v3656_v60, %v291_v46 }
 0x11b   :  { %2990 = vmatpush.msk.msrb.mxu3 %vm106_vm0, %v2988_v24 }
 0x121   :  { %v294_v48 = vpop.f32.mrf.mxu2 }
 0x122   :  { %2932 = vmatmul.msk.f32.gmra.mxu3 %vm57_vm1, %v155_v30  ;;  %v295_v49 = vadd.f32 %v3656_v60, %v294_v48 }
 0x124   :  { %676 = vmatpush.msrb.mxu0 %v295_v49 }
 0x126   :  { %677 = vmatpush.msrb.mxu0 %v292_v50 }
 0x128   :  { %678 = vmatpush.msrb.mxu0 %v289_v52 }
 0x12a   :  { %2933 = vmatmul.msk.f32.gmra.mxu3 %vm57_vm1, %v158_v33  ;;  %679 = vmatpush.msrb.mxu0 %v286_v53 }
 0x12c   :  { %680 = vmatpush.msrb.mxu0 %v283_v45 }
 0x12e   :  { %681 = vmatpush.msrb.mxu0 %v280_v55 }
 0x130   :  { %682 = vmatpush.msrb.mxu0 %v277_v57 }
 0x132   :  { %2934 = vmatmul.msk.f32.gmra.mxu3 %vm57_vm1, %v161_v35  ;;  %683 = vmatpush.msrb.mxu0 %v274_v58 }
 0x134   :  { %3009 = vmatpush.msk.msra.mxu0 %vm106_vm0, %v3007_v61 }
 0x13a   :  { %2935 = vmatmul.msk.f32.gmra.mxu3 %vm57_vm1, %v164_v37 }
 0x142   :  { %2936 = vmatmul.msk.f32.gmra.mxu3 %vm57_vm1, %v167_v40 }
 0x14a   :  { %2937 = vmatmul.msk.f32.gmra.mxu3 %vm57_vm1, %v170_v43 }
 0x152   :  { %2938 = vmatmul.msk.f32.gmra.mxu3 %vm57_vm1, %v173_v47 }
 0x15d   :  { %v386_v51 = vpop.f32.mrf.mxu3 }
 0x15e   :  { %v500_v54 = vsel %vm499_vm2, %v386_v51, -inf }
 0x15f   :  { %501 = vmax.xlane.f32.xlu0 %v500_v54 }
 0x165   :  { %v389_v56 = vpop.f32.mrf.mxu3 }
 0x166   :  { %v503_v59 = vsel %vm499_vm2, %v389_v56, -inf }
 0x167   :  { %504 = vmax.xlane.f32.xlu0 %v503_v59 }
 0x16d   :  { %v392_v62 = vpop.f32.mrf.mxu3 }
 0x16e   :  { %v506_v63 = vsel %vm499_vm2, %v392_v62, -inf }
 0x16f   :  { %507 = vmax.xlane.f32.xlu1 %v506_v63 }
 0x175   :  { %v395_v0 = vpop.f32.mrf.mxu3 }
 0x176   :  { %v509_v1 = vsel %vm499_vm2, %v395_v0, -inf }
 0x177   :  { %510 = vmax.xlane.f32.xlu1 %v509_v1 }
 0x17d   :  { %v3735_v60 = vpop.f32.mrf.mxu3 }
 0x17e   :  { %v512_v2 = vsel %vm499_vm2, %v3735_v60, -inf }
 0x17f   :  { %513 = vmax.xlane.f32.xlu2 %v512_v2 }
 0x185   :  { %v3739_v3 = vpop.f32.mrf.mxu3 }
 0x186   :  { %v515_v4 = vsel %vm499_vm2, %v3739_v3, -inf }
 0x187   :  { %516 = vmax.xlane.f32.xlu2 %v515_v4 }
 0x18d   :  { %v3743_v5 = vpop.f32.mrf.mxu3 }
 0x18e   :  { %v518_v6 = vsel %vm499_vm2, %v3743_v5, -inf }
 0x18f   :  { %519 = vmax.xlane.f32.xlu0 %v518_v6 }
 0x195   :  { %v3747_v7 = vpop.f32.mrf.mxu3 }
 0x196   :  { %v521_v8 = vsel %vm499_vm2, %v3747_v7, -inf }
 0x197   :  { %522 = vmax.xlane.f32.xlu1 %v521_v8 }
 0x19d   :  { %v3751_v9 = vpop.f32.mrf.mxu3 }
 0x19e   :  { %v524_v10 = vsel %vm499_vm2, %v3751_v9, -inf }
 0x19f   :  { %525 = vmax.xlane.f32.xlu2 %v524_v10 }
 0x1a5   :  { %v3755_v11 = vpop.f32.mrf.mxu3 }
 0x1a6   :  { %v527_v12 = vsel %vm499_vm2, %v3755_v11, -inf }
 0x1a7   :  { %528 = vmax.xlane.f32.xlu0 %v527_v12 }
 0x1ad   :  { %v3759_v13 = vpop.f32.mrf.mxu3 }
 0x1ae   :  { %v530_v14 = vsel %vm499_vm2, %v3759_v13, -inf }
 0x1af   :  { %531 = vmax.xlane.f32.xlu1 %v530_v14 }
 0x1b5   :  { %v3763_v15 = vpop.f32.mrf.mxu3 }
 0x1b6   :  { %v533_v16 = vsel %vm499_vm2, %v3763_v15, -inf }
 0x1b7   :  { %534 = vmax.xlane.f32.xlu2 %v533_v16 }
 0x1bd   :  { %v3767_v17 = vpop.f32.mrf.mxu3 }
 0x1be   :  { %v536_v18 = vsel %vm499_vm2, %v3767_v17, -inf }
 0x1bf   :  { %537 = vmax.xlane.f32.xlu0 %v536_v18 }
 0x1c5   :  { %v3771_v19 = vpop.f32.mrf.mxu3 }
 0x1c6   :  { %v539_v20 = vsel %vm499_vm2, %v3771_v19, -inf }
 0x1c7   :  { %540 = vmax.xlane.f32.xlu1 %v539_v20 }
 0x1cd   :  { %v3775_v21 = vpop.f32.mrf.mxu3 }
 0x1ce   :  { %v542_v22 = vsel %vm499_vm2, %v3775_v21, -inf }
 0x1cf   :  { %543 = vmax.xlane.f32.xlu2 %v542_v22 }
 0x1d2   :  { %v502_v23 = vpop.xlane.xlu0 %501 }
 0x1d3   :  { %v548_v24 = vsub.f32 %v386_v51, %v502_v23 }
 0x1d5   :  { %v564_v25 = vmul.f32 1.442695, %v548_v24  ;;  %v3779_v26 = vpop.f32.mrf.mxu3 }
 0x1d6   :  { %v545_v28 = vsel %vm499_vm2, %v3779_v26, -inf }
 0x1d7   :  { %3261 = vpow2.f32 %v564_v25  ;;  %546 = vmax.xlane.f32.xlu0 %v545_v28 }
 0x1da   :  { %v505_v29 = vpop.xlane.xlu0 %504 }
 0x1db   :  { %v549_v30 = vsub.f32 %v389_v56, %v505_v29 }
 0x1dd   :  { %v3262_v31 = vpop.eup %3261  ;;  %v566_v32 = vmul.f32 1.442695, %v549_v30 }
 0x1de   :  { %2939 = vmatmul.msk.f32.vlgmr.msrb.gmra.mxu0 %vm499_vm2, %v3262_v31  ;;  %v596_v33 = vsel %vm499_vm2, %v3262_v31, 0.0 }
 0x1df   :  { %3263 = vpow2.f32 %v566_v32  ;;  %597 = vadd.xlane.f32.xlu1 %v596_v33 }
 0x1e2   :  { %v508_v27 = vpop.xlane.xlu1 %507 }
 0x1e3   :  { %v550_v34 = vsub.f32 %v392_v62, %v508_v27 }
 0x1e5   :  { %v3264_v35 = vpop.eup %3263  ;;  %v568_v36 = vmul.f32 1.442695, %v550_v34 }
 0x1e6   :  { %2940 = vmatmul.msk.f32.gmra.mxu0 %vm499_vm2, %v3264_v35  ;;  %v599_v37 = vsel %vm499_vm2, %v3264_v35, 0.0 }
 0x1e7   :  { %3265 = vpow2.f32 %v568_v36  ;;  %600 = vadd.xlane.f32.xlu2 %v599_v37 }
 0x1ea   :  { %v511_v38 = vpop.xlane.xlu1 %510 }
 0x1eb   :  { %v551_v39 = vsub.f32 %v395_v0, %v511_v38 }
 0x1ed   :  { %v3266_v40 = vpop.eup %3265  ;;  %v570_v41 = vmul.f32 1.442695, %v551_v39 }
 0x1ee   :  { %2941 = vmatmul.msk.f32.gmra.mxu0 %vm499_vm2, %v3266_v40  ;;  %v602_v42 = vsel %vm499_vm2, %v3266_v40, 0.0 }
 0x1ef   :  { %3267 = vpow2.f32 %v570_v41  ;;  %603 = vadd.xlane.f32.xlu0 %v602_v42 }
 0x1f2   :  { %v514_v43 = vpop.xlane.xlu2 %513 }
 0x1f3   :  { %v552_v44 = vsub.f32 %v3735_v60, %v514_v43 }
 0x1f5   :  { %v3268_v46 = vpop.eup %3267  ;;  %v572_v47 = vmul.f32 1.442695, %v552_v44 }
 0x1f6   :  { %2942 = vmatmul.msk.f32.gmra.mxu0 %vm499_vm2, %v3268_v46  ;;  %v605_v48 = vsel %vm499_vm2, %v3268_v46, 0.0 }
 0x1f7   :  { %3269 = vpow2.f32 %v572_v47  ;;  %606 = vadd.xlane.f32.xlu1 %v605_v48 }
 0x1fa   :  { %v517_v49 = vpop.xlane.xlu2 %516 }
 0x1fb   :  { %v553_v50 = vsub.f32 %v3739_v3, %v517_v49 }
 0x1fd   :  { %v3270_v51 = vpop.eup %3269  ;;  %v574_v52 = vmul.f32 1.442695, %v553_v50 }
 0x1fe   :  { %2943 = vmatmul.msk.f32.gmra.mxu0 %vm499_vm2, %v3270_v51  ;;  %v608_v53 = vsel %vm499_vm2, %v3270_v51, 0.0 }
 0x1ff   :  { %3271 = vpow2.f32 %v574_v52  ;;  %609 = vadd.xlane.f32.xlu2 %v608_v53 }
 0x202   :  { %v520_v54 = vpop.xlane.xlu0 %519 }
 0x203   :  { %v554_v45 = vsub.f32 %v3743_v5, %v520_v54  ;;  %v2973_v54 = vld [vmem:[%s4688_s0 + $0x48] sm:$0xff] }
 0x205   :  { %v3272_v55 = vpop.eup %3271  ;;  %v576_v56 = vmul.f32 1.442695, %v554_v45 }
 0x206   :  { %2944 = vmatmul.msk.f32.gmra.mxu0 %vm499_vm2, %v3272_v55  ;;  %v611_v57 = vsel %vm499_vm2, %v3272_v55, 0.0 }
 0x207   :  { %3273 = vpow2.f32 %v576_v56  ;;  %612 = vadd.xlane.f32.xlu0 %v611_v57 }
 0x20a   :  { %v523_v58 = vpop.xlane.xlu1 %522 }
 0x20b   :  { %v555_v59 = vsub.f32 %v3747_v7, %v523_v58 }
 0x20d   :  { %v3274_v61 = vpop.eup %3273  ;;  %v578_v62 = vmul.f32 1.442695, %v555_v59 }
 0x20e   :  { %2945 = vmatmul.msk.f32.gmra.mxu0 %vm499_vm2, %v3274_v61  ;;  %v614_v63 = vsel %vm499_vm2, %v3274_v61, 0.0  ;;  %v2974_v61 = vld [vmem:[%s4688_s0 + $0x50] sm:$0xff] }
 0x20f   :  { %3275 = vpow2.f32 %v578_v62  ;;  %615 = vadd.xlane.f32.xlu1 %v614_v63 }
 0x212   :  { %v526_v0 = vpop.xlane.xlu2 %525 }
 0x213   :  { %v556_v1 = vsub.f32 %v3751_v9, %v526_v0 }
 0x215   :  { %v3276_v60 = vpop.eup %3275  ;;  %v580_v2 = vmul.f32 1.442695, %v556_v1 }
 0x216   :  { %2946 = vmatmul.msk.f32.gmra.mxu0 %vm499_vm2, %v3276_v60  ;;  %v617_v3 = vsel %vm499_vm2, %v3276_v60, 0.0 }
 0x217   :  { %3277 = vpow2.f32 %v580_v2  ;;  %618 = vadd.xlane.f32.xlu2 %v617_v3  ;;  %v2975_v3 = vld [vmem:[%s4688_s0 + $0x58] sm:$0xff] }
 0x21a   :  { %v529_v4 = vpop.xlane.xlu0 %528 }
 0x21b   :  { %v557_v5 = vsub.f32 %v3755_v11, %v529_v4 }
 0x21d   :  { %v3278_v6 = vpop.eup %3277  ;;  %v582_v7 = vmul.f32 1.442695, %v557_v5 }
 0x21e   :  { %2947 = vmatmul.msk.f32.vlgmr.msrb.gmra.mxu1 %vm499_vm2, %v3278_v6  ;;  %v620_v8 = vsel %vm499_vm2, %v3278_v6, 0.0 }
 0x21f   :  { %3279 = vpow2.f32 %v582_v7  ;;  %621 = vadd.xlane.f32.xlu0 %v620_v8 }
 0x222   :  { %v532_v9 = vpop.xlane.xlu1 %531 }
 0x223   :  { %v558_v10 = vsub.f32 %v3759_v13, %v532_v9 }
 0x225   :  { %v3280_v12 = vpop.eup %3279  ;;  %v584_v14 = vmul.f32 1.442695, %v558_v10  ;;  %v2976_v10 = vld [vmem:[%s4688_s0 + $0x60] sm:$0xff] }
 0x226   :  { %2948 = vmatmul.msk.f32.gmra.mxu1 %vm499_vm2, %v3280_v12  ;;  %v623_v16 = vsel %vm499_vm2, %v3280_v12, 0.0 }
 0x227   :  { %3281 = vpow2.f32 %v584_v14  ;;  %624 = vadd.xlane.f32.xlu1 %v623_v16 }
 0x22a   :  { %v535_v11 = vpop.xlane.xlu2 %534 }
 0x22b   :  { %v559_v18 = vsub.f32 %v3763_v15, %v535_v11 }
 0x22d   :  { %v3282_v20 = vpop.eup %3281  ;;  %v586_v22 = vmul.f32 1.442695, %v559_v18 }
 0x22e   :  { %2949 = vmatmul.msk.f32.gmra.mxu1 %vm499_vm2, %v3282_v20  ;;  %v626_v23 = vsel %vm499_vm2, %v3282_v20, 0.0 }
 0x22f   :  { %3283 = vpow2.f32 %v586_v22  ;;  %627 = vadd.xlane.f32.xlu2 %v626_v23  ;;  %v2977_v22 = vld [vmem:[%s4688_s0 + $0x68] sm:$0xff] }
 0x232   :  { %v538_v13 = vpop.xlane.xlu0 %537 }
 0x233   :  { %v560_v24 = vsub.f32 %v3767_v17, %v538_v13  ;;  %v822_v17 = vld [vmem:[%s4694_s7] sm:$0xf] }
 0x234   :  { %2955 = vmatpush.msk.msrb.mxu2 %vm106_vm0, %v822_v17 }
 0x235   :  { %v3284_v25 = vpop.eup %3283  ;;  %v588_v28 = vmul.f32 1.442695, %v560_v24 }
 0x236   :  { %2950 = vmatmul.msk.f32.gmra.mxu1 %vm499_vm2, %v3284_v25  ;;  %v629_v29 = vsel %vm499_vm2, %v3284_v25, 0.0 }
 0x237   :  { %3285 = vpow2.f32 %v588_v28  ;;  %630 = vadd.xlane.f32.xlu0 %v629_v29 }
 0x23a   :  { %v541_v15 = vpop.xlane.xlu1 %540 }
 0x23b   :  { %v561_v30 = vsub.f32 %v3771_v19, %v541_v15  ;;  %v2978_v15 = vld [vmem:[%s4688_s0 + $0x70] sm:$0xff] }
 0x23d   :  { %v3286_v31 = vpop.eup %3285  ;;  %v590_v32 = vmul.f32 1.442695, %v561_v30 }
 0x23e   :  { %2951 = vmatmul.msk.f32.gmra.mxu1 %vm499_vm2, %v3286_v31  ;;  %v632_v33 = vsel %vm499_vm2, %v3286_v31, 0.0 }
 0x23f   :  { %3287 = vpow2.f32 %v590_v32  ;;  %633 = vadd.xlane.f32.xlu1 %v632_v33 }
 0x242   :  { %v544_v27 = vpop.xlane.xlu2 %543 }
 0x243   :  { %v562_v34 = vsub.f32 %v3775_v21, %v544_v27 }
 0x245   :  { %v3288_v35 = vpop.eup %3287  ;;  %v592_v36 = vmul.f32 1.442695, %v562_v34  ;;  %v2979_v34 = vld [vmem:[%s4688_s0 + $0x78] sm:$0xff] }
 0x246   :  { %2952 = vmatmul.msk.f32.gmra.mxu1 %vm499_vm2, %v3288_v35  ;;  %v635_v19 = vsel %vm499_vm2, %v3288_v35, 0.0 }
 0x247   :  { %3289 = vpow2.f32 %v592_v36  ;;  %636 = vadd.xlane.f32.xlu2 %v635_v19 }
 0x24a   :  { %v547_v37 = vpop.xlane.xlu0 %546 }
 0x24b   :  { %v563_v38 = vsub.f32 %v3779_v26, %v547_v37  ;;  %v2972_v26 = vld [vmem:[%s4688_s0 + $0x40] sm:$0xff] }
 0x24d   :  { %v3290_v39 = vpop.eup %3289  ;;  %v594_v40 = vmul.f32 1.442695, %v563_v38 }
 0x24e   :  { %2953 = vmatmul.msk.f32.gmra.mxu1 %vm499_vm2, %v3290_v39  ;;  %v638_v41 = vsel %vm499_vm2, %v3290_v39, 0.0 }
 0x24f   :  { %3291 = vpow2.f32 %v594_v40  ;;  %639 = vadd.xlane.f32.xlu0 %v638_v41  ;;  %v2980_v40 = vld [vmem:[%s4688_s0 + $0x100] sm:$0xff] }
 0x252   :  { %v598_v21 = vpop.xlane.xlu1 %597 }
 0x253   :  { %3293 = vrcp.f32 %v598_v21 }
 0x255   :  { %v3292_v42 = vpop.eup %3291 }
 0x256   :  { %2954 = vmatmul.msk.f32.gmra.mxu1 %vm499_vm2, %v3292_v42  ;;  %v641_v43 = vsel %vm499_vm2, %v3292_v42, 0.0 }
 0x257   :  { %642 = vadd.xlane.f32.xlu1 %v641_v43 }
 0x259   :  { %v3294_v46 = vpop.eup %3293 }
 0x25a   :  { %v601_v44 = vpop.xlane.xlu2 %600 }
 0x25b   :  { %v685_v47 = vpop.f32.mrf.mxu0  ;;  %3295 = vrcp.f32 %v601_v44 }
 0x25c   :  { %v790_v48 = vmul.f32 %v3294_v46, %v685_v47  ;;  %v2981_v47 = vld [vmem:[%s4688_s0 + $0x108] sm:$0xff] }
 0x25e   :  { %v806_v49 = vmax.f32 %v790_v48, 0.0  ;;  %v972_v50 = vadd.f32 %v2972_v26, %v790_v48 }
 0x260   :  { %2956 = vmatmul.msk.f32.vlgmr.msrb.gmra.mxu2 %vm57_vm1, %v806_v49  ;;  %2991 = vmatmul.msk.f32.vlgmr.msrb.gmra.mxu3 %vm57_vm1, %v972_v50 }
 0x261   :  { %3010 = vmatmul.msk.f32.vlgmr.msra.gmra.mxu0 %vm57_vm1, %v972_v50  ;;  %3029 = vmatmul.msk.f32.vlgmr.msra.gmra.mxu1 %vm57_vm1, %v972_v50  ;;  %v3296_v52 = vpop.eup %3295 }
 0x262   :  { %v604_v51 = vpop.xlane.xlu0 %603 }
 0x263   :  { %v688_v53 = vpop.f32.mrf.mxu0  ;;  %3297 = vrcp.f32 %v604_v51 }
 0x264   :  { %v791_v45 = vmul.f32 %v3296_v52, %v688_v53  ;;  %v2982_v53 = vld [vmem:[%s4688_s0 + $0x110] sm:$0xff] }
 0x266   :  { %v807_v55 = vmax.f32 %v791_v45, 0.0  ;;  %v973_v56 = vadd.f32 %v2973_v54, %v791_v45 }
 0x268   :  { %2957 = vmatmul.msk.f32.gmra.mxu2 %vm57_vm1, %v807_v55  ;;  %2992 = vmatmul.msk.f32.gmra.mxu3 %vm57_vm1, %v973_v56 }
 0x269   :  { %3011 = vmatmul.msk.f32.gmra.mxu0 %vm57_vm1, %v973_v56  ;;  %3030 = vmatmul.msk.f32.gmra.mxu1 %vm57_vm1, %v973_v56  ;;  %v3298_v58 = vpop.eup %3297 }
 0x26a   :  { %v607_v57 = vpop.xlane.xlu1 %606 }
 0x26b   :  { %v691_v59 = vpop.f32.mrf.mxu0  ;;  %3299 = vrcp.f32 %v607_v57 }
 0x26c   :  { %v792_v62 = vmul.f32 %v3298_v58, %v691_v59  ;;  %v2983_v59 = vld [vmem:[%s4688_s0 + $0x118] sm:$0xff] }
 0x26e   :  { %v808_v63 = vmax.f32 %v792_v62, 0.0  ;;  %v974_v0 = vadd.f32 %v2974_v61, %v792_v62 }
 0x270   :  { %2958 = vmatmul.msk.f32.gmra.mxu2 %vm57_vm1, %v808_v63  ;;  %2993 = vmatmul.msk.f32.gmra.mxu3 %vm57_vm1, %v974_v0 }
 0x271   :  { %3012 = vmatmul.msk.f32.gmra.mxu0 %vm57_vm1, %v974_v0  ;;  %3031 = vmatmul.msk.f32.gmra.mxu1 %vm57_vm1, %v974_v0  ;;  %v3300_v60 = vpop.eup %3299 }
 0x272   :  { %v610_v1 = vpop.xlane.xlu2 %609 }
 0x273   :  { %v694_v2 = vpop.f32.mrf.mxu0  ;;  %3301 = vrcp.f32 %v610_v1 }
 0x274   :  { %v793_v4 = vmul.f32 %v3300_v60, %v694_v2  ;;  %v2984_v2 = vld [vmem:[%s4688_s0 + $0x120] sm:$0xff] }
 0x276   :  { %v809_v5 = vmax.f32 %v793_v4, 0.0  ;;  %v975_v6 = vadd.f32 %v2975_v3, %v793_v4 }
 0x278   :  { %2959 = vmatmul.msk.f32.gmra.mxu2 %vm57_vm1, %v809_v5  ;;  %2994 = vmatmul.msk.f32.gmra.mxu3 %vm57_vm1, %v975_v6 }
 0x279   :  { %3013 = vmatmul.msk.f32.gmra.mxu0 %vm57_vm1, %v975_v6  ;;  %3032 = vmatmul.msk.f32.gmra.mxu1 %vm57_vm1, %v975_v6  ;;  %v3302_v8 = vpop.eup %3301 }
 0x27a   :  { %v613_v7 = vpop.xlane.xlu0 %612 }
 0x27b   :  { %v697_v9 = vpop.f32.mrf.mxu0  ;;  %3303 = vrcp.f32 %v613_v7 }
 0x27c   :  { %v794_v12 = vmul.f32 %v3302_v8, %v697_v9  ;;  %v2985_v9 = vld [vmem:[%s4688_s0 + $0x128] sm:$0xff] }
 0x27e   :  { %v810_v14 = vmax.f32 %v794_v12, 0.0  ;;  %v976_v16 = vadd.f32 %v2976_v10, %v794_v12 }
 0x280   :  { %2960 = vmatmul.msk.f32.gmra.mxu2 %vm57_vm1, %v810_v14  ;;  %2995 = vmatmul.msk.f32.gmra.mxu3 %vm57_vm1, %v976_v16 }
 0x281   :  { %3014 = vmatmul.msk.f32.gmra.mxu0 %vm57_vm1, %v976_v16  ;;  %3033 = vmatmul.msk.f32.gmra.mxu1 %vm57_vm1, %v976_v16  ;;  %v3304_v18 = vpop.eup %3303 }
 0x282   :  { %v616_v11 = vpop.xlane.xlu1 %615 }
 0x283   :  { %v700_v20 = vpop.f32.mrf.mxu0  ;;  %3305 = vrcp.f32 %v616_v11 }
 0x284   :  { %v795_v23 = vmul.f32 %v3304_v18, %v700_v20  ;;  %v2986_v20 = vld [vmem:[%s4688_s0 + $0x130] sm:$0xff] }
 0x286   :  { %v811_v13 = vmax.f32 %v795_v23, 0.0  ;;  %v977_v24 = vadd.f32 %v2977_v22, %v795_v23 }
 0x288   :  { %2961 = vmatmul.msk.f32.gmra.mxu2 %vm57_vm1, %v811_v13  ;;  %2996 = vmatmul.msk.f32.gmra.mxu3 %vm57_vm1, %v977_v24 }
 0x289   :  { %3015 = vmatmul.msk.f32.gmra.mxu0 %vm57_vm1, %v977_v24  ;;  %3034 = vmatmul.msk.f32.gmra.mxu1 %vm57_vm1, %v977_v24  ;;  %v3306_v28 = vpop.eup %3305 }
 0x28a   :  { %v619_v25 = vpop.xlane.xlu2 %618 }
 0x28b   :  { %v703_v29 = vpop.f32.mrf.mxu0  ;;  %3307 = vrcp.f32 %v619_v25 }
 0x28c   :  { %v796_v30 = vmul.f32 %v3306_v28, %v703_v29  ;;  %v2987_v28 = vld [vmem:[%s4688_s0 + $0x138] sm:$0xff] }
 0x28e   :  { %v812_v31 = vmax.f32 %v796_v30, 0.0  ;;  %v978_v32 = vadd.f32 %v2978_v15, %v796_v30 }
 0x290   :  { %2962 = vmatmul.msk.f32.gmra.mxu2 %vm57_vm1, %v812_v31  ;;  %2997 = vmatmul.msk.f32.gmra.mxu3 %vm57_vm1, %v978_v32 }
 0x291   :  { %3016 = vmatmul.msk.f32.gmra.mxu0 %vm57_vm1, %v978_v32  ;;  %3035 = vmatmul.msk.f32.gmra.mxu1 %vm57_vm1, %v978_v32  ;;  %v3308_v17 = vpop.eup %3307 }
 0x292   :  { %v622_v33 = vpop.xlane.xlu0 %621 }
 0x293   :  { %v706_v27 = vpop.f32.mrf.mxu0  ;;  %3309 = vrcp.f32 %v622_v33 }
 0x294   :  { %v797_v35 = vmul.f32 %v3308_v17, %v706_v27 }
 0x296   :  { %v813_v36 = vmax.f32 %v797_v35, 0.0  ;;  %v979_v19 = vadd.f32 %v2979_v34, %v797_v35 }
 0x298   :  { %2963 = vmatmul.msk.f32.gmra.mxu2 %vm57_vm1, %v813_v36  ;;  %2998 = vmatmul.msk.f32.gmra.mxu3 %vm57_vm1, %v979_v19 }
 0x299   :  { %3017 = vmatmul.msk.f32.gmra.mxu0 %vm57_vm1, %v979_v19  ;;  %3036 = vmatmul.msk.f32.gmra.mxu1 %vm57_vm1, %v979_v19  ;;  %v3310_v38 = vpop.eup %3309 }
 0x29a   :  { %v625_v37 = vpop.xlane.xlu1 %624 }
 0x29b   :  { %v750_v39 = vpop.f32.mrf.mxu1  ;;  %3311 = vrcp.f32 %v625_v37 }
 0x29c   :  { %v798_v41 = vmul.f32 %v3310_v38, %v750_v39 }
 0x29e   :  { %v814_v21 = vmax.f32 %v798_v41, 0.0  ;;  %v980_v42 = vadd.f32 %v2980_v40, %v798_v41 }
 0x2a0   :  { %2964 = vmatmul.msk.f32.gmra.mxu2 %vm57_vm1, %v814_v21  ;;  %2999 = vmatmul.msk.f32.gmra.mxu3 %vm57_vm1, %v980_v42  ;;  %v3948_v21 = vld [vmem:[%s4689_s5 + $0x1] ss:$0 sm:$0xff] }
 0x2a1   :  { %3018 = vmatmul.msk.f32.gmra.mxu0 %vm57_vm1, %v980_v42  ;;  %3037 = vmatmul.msk.f32.gmra.mxu1 %vm57_vm1, %v980_v42  ;;  %v3312_v44 = vpop.eup %3311  ;;  %v3953_v42 = vld [vmem:[%s4693_s6 + $0x1] ss:$0 sm:$0xff] }
 0x2a2   :  { %v628_v43 = vpop.xlane.xlu2 %627 }
 0x2a3   :  { %v753_v46 = vpop.f32.mrf.mxu1  ;;  %3313 = vrcp.f32 %v628_v43 }
 0x2a4   :  { %v799_v26 = vmul.f32 %v3312_v44, %v753_v46 }
 0x2a6   :  { %v815_v48 = vmax.f32 %v799_v26, 0.0  ;;  %v981_v49 = vadd.f32 %v2981_v47, %v799_v26 }
 0x2a8   :  { %2965 = vmatmul.msk.f32.gmra.mxu2 %vm57_vm1, %v815_v48  ;;  %3000 = vmatmul.msk.f32.gmra.mxu3 %vm57_vm1, %v981_v49 }
 0x2a9   :  { %3019 = vmatmul.msk.f32.gmra.mxu0 %vm57_vm1, %v981_v49  ;;  %3038 = vmatmul.msk.f32.gmra.mxu1 %vm57_vm1, %v981_v49  ;;  %v3314_v51 = vpop.eup %3313 }
 0x2aa   :  { %v631_v50 = vpop.xlane.xlu0 %630 }
 0x2ab   :  { %v756_v52 = vpop.f32.mrf.mxu1  ;;  %3315 = vrcp.f32 %v631_v50 }
 0x2ac   :  { %v800_v54 = vmul.f32 %v3314_v51, %v756_v52 }
 0x2ae   :  { %v816_v45 = vmax.f32 %v800_v54, 0.0  ;;  %v982_v55 = vadd.f32 %v2982_v53, %v800_v54 }
 0x2b0   :  { %2966 = vmatmul.msk.f32.gmra.mxu2 %vm57_vm1, %v816_v45  ;;  %3001 = vmatmul.msk.f32.gmra.mxu3 %vm57_vm1, %v982_v55 }
 0x2b1   :  { %3020 = vmatmul.msk.f32.gmra.mxu0 %vm57_vm1, %v982_v55  ;;  %3039 = vmatmul.msk.f32.gmra.mxu1 %vm57_vm1, %v982_v55  ;;  %v3316_v57 = vpop.eup %3315 }
 0x2b2   :  { %v634_v56 = vpop.xlane.xlu1 %633 }
 0x2b3   :  { %v759_v58 = vpop.f32.mrf.mxu1  ;;  %3317 = vrcp.f32 %v634_v56 }
 0x2b4   :  { %v801_v61 = vmul.f32 %v3316_v57, %v759_v58 }
 0x2b6   :  { %v817_v62 = vmax.f32 %v801_v61, 0.0  ;;  %v983_v63 = vadd.f32 %v2983_v59, %v801_v61  ;;  %v3146_v61 = vld [vmem:[%s4687_s2 + $0x8] sm:$0xf] }
 0x2b8   :  { %2967 = vmatmul.msk.f32.gmra.mxu2 %vm57_vm1, %v817_v62  ;;  %3002 = vmatmul.msk.f32.gmra.mxu3 %vm57_vm1, %v983_v63 }
 0x2b9   :  { %3021 = vmatmul.msk.f32.gmra.mxu0 %vm57_vm1, %v983_v63  ;;  %3040 = vmatmul.msk.f32.gmra.mxu1 %vm57_vm1, %v983_v63  ;;  %v3318_v1 = vpop.eup %3317 }
 0x2ba   :  { %v637_v0 = vpop.xlane.xlu2 %636 }
 0x2bb   :  { %v762_v60 = vpop.f32.mrf.mxu1  ;;  %3319 = vrcp.f32 %v637_v0 }
 0x2bc   :  { %v802_v3 = vmul.f32 %v3318_v1, %v762_v60 }
 0x2be   :  { %v818_v4 = vmax.f32 %v802_v3, 0.0  ;;  %v984_v5 = vadd.f32 %v2984_v2, %v802_v3 }
 0x2c0   :  { %2968 = vmatmul.msk.f32.gmra.mxu2 %vm57_vm1, %v818_v4  ;;  %3003 = vmatmul.msk.f32.gmra.mxu3 %vm57_vm1, %v984_v5 }
 0x2c1   :  { %3022 = vmatmul.msk.f32.gmra.mxu0 %vm57_vm1, %v984_v5  ;;  %3041 = vmatmul.msk.f32.gmra.mxu1 %vm57_vm1, %v984_v5  ;;  %v3320_v7 = vpop.eup %3319 }
 0x2c2   :  { %v640_v6 = vpop.xlane.xlu0 %639 }
 0x2c3   :  { %v765_v8 = vpop.f32.mrf.mxu1  ;;  %3321 = vrcp.f32 %v640_v6 }
 0x2c4   :  { %v803_v10 = vmul.f32 %v3320_v7, %v765_v8  ;;  %v4000_v8 = vld [vmem:[%s4692_s4 + $0x1] ss:$0 sm:$0xff] }
 0x2c6   :  { %v819_v12 = vmax.f32 %v803_v10, 0.0  ;;  %v985_v14 = vadd.f32 %v2985_v9, %v803_v10 }
 0x2c8   :  { %2969 = vmatmul.msk.f32.gmra.mxu2 %vm57_vm1, %v819_v12  ;;  %3004 = vmatmul.msk.f32.gmra.mxu3 %vm57_vm1, %v985_v14 }
 0x2c9   :  { %3023 = vmatmul.msk.f32.gmra.mxu0 %vm57_vm1, %v985_v14  ;;  %3042 = vmatmul.msk.f32.gmra.mxu1 %vm57_vm1, %v985_v14  ;;  %v3322_v11 = vpop.eup %3321 }
 0x2ca   :  { %v643_v16 = vpop.xlane.xlu1 %642 }
 0x2cb   :  { %v768_v18 = vpop.f32.mrf.mxu1  ;;  %3323 = vrcp.f32 %v643_v16 }
 0x2cc   :  { %v804_v22 = vmul.f32 %v3322_v11, %v768_v18 }
 0x2ce   :  { %v820_v23 = vmax.f32 %v804_v22, 0.0  ;;  %v986_v13 = vadd.f32 %v2986_v20, %v804_v22 }
 0x2d0   :  { %2970 = vmatmul.msk.f32.gmra.mxu2 %vm57_vm1, %v820_v23  ;;  %3005 = vmatmul.msk.f32.gmra.mxu3 %vm57_vm1, %v986_v13 }
 0x2d1   :  { %3024 = vmatmul.msk.f32.gmra.mxu0 %vm57_vm1, %v986_v13  ;;  %3043 = vmatmul.msk.f32.gmra.mxu1 %vm57_vm1, %v986_v13  ;;  %v3324_v24 = vpop.eup %3323 }
 0x2d3   :  { %v771_v25 = vpop.f32.mrf.mxu1 }
 0x2d4   :  { %v805_v29 = vmul.f32 %v3324_v24, %v771_v25 }
 0x2d6   :  { %v821_v15 = vmax.f32 %v805_v29, 0.0  ;;  %v987_v30 = vadd.f32 %v2987_v28, %v805_v29 }
 0x2d8   :  { %2971 = vmatmul.msk.f32.gmra.mxu2 %vm57_vm1, %v821_v15  ;;  %3006 = vmatmul.msk.f32.gmra.mxu3 %vm57_vm1, %v987_v30 }
 0x2d9   :  { %3025 = vmatmul.msk.f32.gmra.mxu0 %vm57_vm1, %v987_v30  ;;  %3044 = vmatmul.msk.f32.gmra.mxu1 %vm57_vm1, %v987_v30 }
 0x2de   :  { %v3943_v31 = vpop.f32.mrf.mxu0  ;;  %v1213_v32 = vpop.f32.mrf.mxu1 }
 0x2df   :  { %v1214_v62 = vadd.f32 %v3953_v42, %v1213_v32  ;;  %v1139_v9 = vadd.f32 %v3948_v21, %v3943_v31 }
 0x2e3   :  { %v1063_v43 = vpop.f32.mrf.mxu3  ;;  %v3961_v51 = vpop.f32.mrf.mxu2 }
 0x2e4   :  { %v1064_v12 = vadd.f32 %v4000_v8, %v1063_v43 }
 0x2e6   :  { %v1141_v33 = vpop.f32.mrf.mxu0  ;;  %v1216_v17 = vpop.f32.mrf.mxu1 }
 0x2e7   :  { %v1217_v58 = vadd.f32 %v3953_v42, %v1216_v17  ;;  %v1142_v6 = vadd.f32 %v3948_v21, %v1141_v33 }
 0x2eb   :  { %v1066_v45 = vpop.f32.mrf.mxu3  ;;  %v3984_v1 = vpop.f32.mrf.mxu2 }
 0x2ec   :  { %v1067_v20 = vadd.f32 %v4000_v8, %v1066_v45 }
 0x2ee   :  { %v1144_v27 = vpop.f32.mrf.mxu0  ;;  %v1219_v34 = vpop.f32.mrf.mxu1 }
 0x2ef   :  { %v1220_v57 = vadd.f32 %v3953_v42, %v1219_v34  ;;  %v1145_v3 = vadd.f32 %v3948_v21, %v1144_v27 }
 0x2f3   :  { %v1069_v2 = vpop.f32.mrf.mxu3  ;;  %v3994_v7 = vpop.f32.mrf.mxu2 }
 0x2f4   :  { %v1070_v24 = vadd.f32 %v4000_v8, %v1069_v2 }
 0x2f6   :  { %v1147_v35 = vpop.f32.mrf.mxu0  ;;  %v1222_v36 = vpop.f32.mrf.mxu1 }
 0x2f7   :  { %v1223_v55 = vadd.f32 %v3953_v42, %v1222_v36  ;;  %v1148_v60 = vadd.f32 %v3948_v21, %v1147_v35 }
 0x2fb   :  { %v1072_v10 = vpop.f32.mrf.mxu3  ;;  %v4007_v11 = vpop.f32.mrf.mxu2 }
 0x2fc   :  { %v1073_v15 = vadd.f32 %v4000_v8, %v1072_v10 }
 0x2fe   :  { %v1150_v19 = vpop.f32.mrf.mxu0  ;;  %v1225_v37 = vpop.f32.mrf.mxu1 }
 0x2ff   :  { %v1226_v52 = vadd.f32 %v3953_v42, %v1225_v37  ;;  %v1151_v59 = vadd.f32 %v3948_v21, %v1150_v19 }
 0x303   :  { %v1075_v18 = vpop.f32.mrf.mxu3  ;;  %v4011_v13 = vpop.f32.mrf.mxu2 }
 0x304   :  { %v1076_v17 = vadd.f32 %v4000_v8, %v1075_v18 }
 0x306   :  { %v1153_v38 = vpop.f32.mrf.mxu0  ;;  %v1228_v39 = vpop.f32.mrf.mxu1 }
 0x307   :  { %v1229_v49 = vadd.f32 %v3953_v42, %v1228_v39  ;;  %v1154_v56 = vadd.f32 %v3948_v21, %v1153_v38 }
 0x30b   :  { %v1078_v29 = vpop.f32.mrf.mxu3  ;;  %v4016_v32 = vpop.f32.mrf.mxu2 }
 0x30c   :  { %v1079_v43 = vadd.f32 %v4000_v8, %v1078_v29 }
 0x30e   :  { %v1156_v40 = vpop.f32.mrf.mxu0  ;;  %v1231_v41 = vpop.f32.mrf.mxu1 }
 0x30f   :  { %v1232_v48 = vadd.f32 %v3953_v42, %v1231_v41  ;;  %v1157_v50 = vadd.f32 %v3948_v21, %v1156_v40 }
 0x313   :  { %v1081_v33 = vpop.f32.mrf.mxu3  ;;  %v4023_v19 = vpop.f32.mrf.mxu2 }
 0x316   :  { %v1159_v44 = vpop.f32.mrf.mxu0  ;;  %v1234_v46 = vpop.f32.mrf.mxu1 }
 0x317   :  { %v1160_v47 = vadd.f32 %v3948_v21, %v1159_v44  ;;  %v1235_v26 = vadd.f32 %v3953_v42, %v1234_v46 }
 0x319   :  { %3045 = vmatpush.xpose.msk.msra.mxu2 %vm57_vm1, %v1160_v47  ;;  %1615 = vmatpush.msrb.mxu0 %v1235_v26 }
 0x31b   :  { %1616 = vmatpush.msrb.mxu0 %v1232_v48  ;;  %v1084_v38 = vpop.f32.mrf.mxu3  ;;  %v4037_v26 = vpop.f32.mrf.mxu2 }
 0x31d   :  { %3046 = vmatpush.xpose.msk.msra.mxu2 %vm57_vm1, %v1157_v50  ;;  %1617 = vmatpush.msrb.mxu0 %v1229_v49  ;;  %v3165_v50 = vld [vmem:[%s4690_s3 + $0x8] sm:$0xf] }
 0x31e   :  { %v3965_v53 = vpop.f32.mrf.mxu0  ;;  %v3967_v54 = vpop.f32.mrf.mxu1 }
 0x31f   :  { %1618 = vmatpush.msrb.mxu0 %v1226_v52  ;;  %v1238_v52 = vadd.f32 %v3953_v42, %v3967_v54 }
 0x321   :  { %3047 = vmatpush.xpose.msk.msra.mxu2 %vm57_vm1, %v1154_v56  ;;  %1619 = vmatpush.msrb.mxu0 %v1223_v55  ;;  %v1082_v55 = vadd.f32 %v4000_v8, %v1081_v33 }
 0x323   :  { %1620 = vmatpush.msrb.mxu0 %v1220_v57  ;;  %v1087_v45 = vpop.f32.mrf.mxu3 }
 0x325   :  { %3048 = vmatpush.xpose.msk.msra.mxu2 %vm57_vm1, %v1151_v59  ;;  %1621 = vmatpush.msrb.mxu0 %v1217_v58  ;;  %v4055_v58 = vpop.f32.mrf.mxu2 }
 0x326   :  { %v3980_v63 = vpop.f32.mrf.mxu0  ;;  %v3982_v0 = vpop.f32.mrf.mxu1 }
 0x327   :  { %1622 = vmatpush.msrb.mxu0 %v1214_v62  ;;  %v1241_v48 = vadd.f32 %v3953_v42, %v3982_v0  ;;  %v1166_v54 = vadd.f32 %v3948_v21, %v3980_v63  ;;  %v1163_v62 = vadd.f32 %v3948_v21, %v3965_v53  ;;  %v1088_v0 = vadd.f32 %v4000_v8, %v1087_v45 }
 0x329   :  { %3148 = vmatpush.msk.msra.mxu0 %vm106_vm0, %v3146_v61  ;;  %3049 = vmatpush.xpose.msk.msra.mxu2 %vm57_vm1, %v1148_v60  ;;  %v3127_v61 = vld [vmem:[%s4691_s1 + $0x8] sm:$0xf] }
 0x32b   :  { %v1090_v59 = vpop.f32.mrf.mxu3 }
 0x32c   :  { %v1091_v2 = vadd.f32 %v4000_v8, %v1090_v59 }
 0x32d   :  { %3050 = vmatpush.xpose.msk.msra.mxu2 %vm57_vm1, %v1145_v3  ;;  %v4071_v60 = vpop.f32.mrf.mxu2 }
 0x32e   :  { %v3991_v4 = vpop.f32.mrf.mxu0  ;;  %v1243_v5 = vpop.f32.mrf.mxu1 }
 0x32f   :  { %v1244_v47 = vadd.f32 %v3953_v42, %v1243_v5  ;;  %v1169_v57 = vadd.f32 %v3948_v21, %v3991_v4 }
 0x331   :  { %3051 = vmatpush.xpose.msk.msra.mxu2 %vm57_vm1, %v1142_v6 }
 0x333   :  { %v1093_v63 = vpop.f32.mrf.mxu3 }
 0x335   :  { %3052 = vmatpush.xpose.msk.msra.mxu2 %vm57_vm1, %v1139_v9  ;;  %v4076_v3 = vpop.f32.mrf.mxu2 }
 0x336   :  { %v1171_v14 = vpop.f32.mrf.mxu0  ;;  %v1246_v16 = vpop.f32.mrf.mxu1 }
 0x337   :  { %v1247_v44 = vadd.f32 %v3953_v42, %v1246_v16  ;;  %v1172_v56 = vadd.f32 %v3948_v21, %v1171_v14 }
 0x338   :  { %3053 = vmatmul.msk.f32.vlgmr.msra.gmra.mxu2 %vm57_vm1, %v1064_v12 }
 0x33b   :  { %v1096_v4 = vpop.f32.mrf.mxu3 }
 0x33c   :  { %v1097_v6 = vadd.f32 %v4000_v8, %v1096_v4 }
 0x33d   :  { %v4080_v53 = vpop.f32.mrf.mxu2 }
 0x33e   :  { %v1174_v22 = vpop.f32.mrf.mxu0  ;;  %v1249_v23 = vpop.f32.mrf.mxu1 }
 0x33f   :  { %v1250_v41 = vadd.f32 %v3953_v42, %v1249_v23  ;;  %v1175_v49 = vadd.f32 %v3948_v21, %v1174_v22 }
 0x340   :  { %3054 = vmatmul.msk.f32.gmra.mxu2 %vm57_vm1, %v1067_v20 }
 0x343   :  { %v1099_v5 = vpop.f32.mrf.mxu3 }
 0x344   :  { %v1100_v10 = vadd.f32 %v4000_v8, %v1099_v5 }
 0x345   :  { %v4084_v9 = vpop.f32.mrf.mxu2 }
 0x346   :  { %v1177_v25 = vpop.f32.mrf.mxu0  ;;  %v1252_v28 = vpop.f32.mrf.mxu1 }
 0x347   :  { %v1253_v39 = vadd.f32 %v3953_v42, %v1252_v28  ;;  %v1178_v46 = vadd.f32 %v3948_v21, %v1177_v25 }
 0x348   :  { %3055 = vmatmul.msk.f32.gmra.mxu2 %vm57_vm1, %v1070_v24 }
 0x34b   :  { %v1102_v12 = vpop.f32.mrf.mxu3 }
 0x34c   :  { %v1103_v14 = vadd.f32 %v4000_v8, %v1102_v12 }
 0x34d   :  { %v4089_v16 = vpop.f32.mrf.mxu2 }
 0x34e   :  { %v1180_v30 = vpop.f32.mrf.mxu0  ;;  %v1255_v31 = vpop.f32.mrf.mxu1 }
 0x34f   :  { %v1256_v37 = vadd.f32 %v3953_v42, %v1255_v31  ;;  %v1181_v40 = vadd.f32 %v3948_v21, %v1180_v30 }
 0x350   :  { %3056 = vmatmul.msk.f32.gmra.mxu2 %vm57_vm1, %v1073_v15 }
 0x353   :  { %v1105_v18 = vpop.f32.mrf.mxu3 }
 0x354   :  { %v1106_v20 = vadd.f32 %v4000_v8, %v1105_v18 }
 0x355   :  { %v4094_v22 = vpop.f32.mrf.mxu2 }
 0x356   :  { %v1183_v27 = vpop.f32.mrf.mxu0  ;;  %v1258_v34 = vpop.f32.mrf.mxu1 }
 0x357   :  { %v1184_v35 = vadd.f32 %v3948_v21, %v1183_v27  ;;  %v1259_v36 = vadd.f32 %v3953_v42, %v1258_v34  ;;  %v1085_v42 = vadd.f32 %v4000_v8, %v1084_v38  ;;  %v1094_v21 = vadd.f32 %v4000_v8, %v1093_v63 }
 0x358   :  { %3057 = vmatmul.msk.f32.gmra.mxu2 %vm57_vm1, %v1076_v17 }
 0x359   :  { %3061 = vmatpush.xpose.msk.msra.mxu3 %vm57_vm1, %v1184_v35  ;;  %1680 = vmatpush.msrb.mxu1 %v1259_v36 }
 0x35b   :  { %1681 = vmatpush.msrb.mxu1 %v1256_v37  ;;  %v1108_v23 = vpop.f32.mrf.mxu3 }
 0x35c   :  { %v1109_v24 = vadd.f32 %v4000_v8, %v1108_v23 }
 0x35d   :  { %3062 = vmatpush.xpose.msk.msra.mxu3 %vm57_vm1, %v1181_v40  ;;  %1682 = vmatpush.msrb.mxu1 %v1253_v39  ;;  %v4098_v25 = vpop.f32.mrf.mxu2 }
 0x35f   :  { %1683 = vmatpush.msrb.mxu1 %v1250_v41 }
 0x360   :  { %3058 = vmatmul.msk.f32.gmra.mxu2 %vm57_vm1, %v1079_v43 }
 0x361   :  { %3063 = vmatpush.xpose.msk.msra.mxu3 %vm57_vm1, %v1178_v46  ;;  %1684 = vmatpush.msrb.mxu1 %v1247_v44 }
 0x363   :  { %1685 = vmatpush.msrb.mxu1 %v1244_v47 }
 0x365   :  { %3064 = vmatpush.xpose.msk.msra.mxu3 %vm57_vm1, %v1175_v49  ;;  %1686 = vmatpush.msrb.mxu1 %v1241_v48 }
 0x367   :  { %1687 = vmatpush.msrb.mxu1 %v1238_v52 }
 0x368   :  { %3059 = vmatmul.msk.f32.gmra.mxu2 %vm57_vm1, %v1082_v55 }
 0x369   :  { %3167 = vmatpush.msk.msra.mxu1 %vm106_vm0, %v3165_v50  ;;  %3065 = vmatpush.xpose.msk.msra.mxu3 %vm57_vm1, %v1172_v56 }
 0x36d   :  { %3066 = vmatpush.xpose.msk.msra.mxu3 %vm57_vm1, %v1169_v57 }
 0x370   :  { %3060 = vmatmul.msk.f32.gmra.mxu2 %vm57_vm1, %v1085_v42 }
 0x371   :  { %3067 = vmatpush.xpose.msk.msra.mxu3 %vm57_vm1, %v1166_v54 }
 0x375   :  { %3068 = vmatpush.xpose.msk.msra.mxu3 %vm57_vm1, %v1163_v62 }
 0x378   :  { %3069 = vmatmul.msk.f32.vlgmr.msra.gmra.mxu3 %vm57_vm1, %v1088_v0 }
 0x379   :  { %3129 = vmatpush.msk.msrb.mxu3 %vm106_vm0, %v3127_v61 }
 0x380   :  { %3070 = vmatmul.msk.f32.gmra.mxu3 %vm57_vm1, %v1091_v2 }
 0x388   :  { %3071 = vmatmul.msk.f32.gmra.mxu3 %vm57_vm1, %v1094_v21 }
 0x390   :  { %3072 = vmatmul.msk.f32.gmra.mxu3 %vm57_vm1, %v1097_v6 }
 0x398   :  { %3073 = vmatmul.msk.f32.gmra.mxu3 %vm57_vm1, %v1100_v10 }
 0x3a0   :  { %3074 = vmatmul.msk.f32.gmra.mxu3 %vm57_vm1, %v1103_v14 }
 0x3a8   :  { %3075 = vmatmul.msk.f32.gmra.mxu3 %vm57_vm1, %v1106_v20 }
 0x3b0   :  { %3076 = vmatmul.msk.f32.gmra.mxu3 %vm57_vm1, %v1109_v24 }
 0x3bb   :  { %v1326_v28 = vpop.f32.mrf.mxu2 }
 0x3bc   :  { %v1439_v29 = vsel %vm499_vm2, %v1326_v28, -inf }
 0x3bd   :  { %1440 = vmax.xlane.f32.xlu2 %v1439_v29 }
 0x3c3   :  { %v1329_v15 = vpop.f32.mrf.mxu2 }
 0x3c4   :  { %v1442_v30 = vsel %vm499_vm2, %v1329_v15, -inf }
 0x3c5   :  { %1443 = vmax.xlane.f32.xlu0 %v1442_v30 }
 0x3cb   :  { %v1332_v31 = vpop.f32.mrf.mxu2 }
 0x3cc   :  { %v1445_v33 = vsel %vm499_vm2, %v1332_v31, -inf }
 0x3cd   :  { %1446 = vmax.xlane.f32.xlu1 %v1445_v33 }
 0x3d3   :  { %v1335_v17 = vpop.f32.mrf.mxu2 }
 0x3d4   :  { %v1448_v27 = vsel %vm499_vm2, %v1335_v17, -inf }
 0x3d5   :  { %1449 = vmax.xlane.f32.xlu2 %v1448_v27 }
 0x3db   :  { %v4104_v8 = vpop.f32.mrf.mxu2 }
 0x3dc   :  { %v1451_v34 = vsel %vm499_vm2, %v4104_v8, -inf }
 0x3dd   :  { %1452 = vmax.xlane.f32.xlu0 %v1451_v34 }
 0x3e3   :  { %v4108_v35 = vpop.f32.mrf.mxu2 }
 0x3e4   :  { %v1454_v36 = vsel %vm499_vm2, %v4108_v35, -inf }
 0x3e5   :  { %1455 = vmax.xlane.f32.xlu1 %v1454_v36 }
 0x3eb   :  { %v4112_v37 = vpop.f32.mrf.mxu2 }
 0x3ec   :  { %v1457_v38 = vsel %vm499_vm2, %v4112_v37, -inf }
 0x3ed   :  { %1458 = vmax.xlane.f32.xlu2 %v1457_v38 }
 0x3f3   :  { %v4116_v39 = vpop.f32.mrf.mxu2 }
 0x3f4   :  { %v1460_v40 = vsel %vm499_vm2, %v4116_v39, -inf }
 0x3f5   :  { %1461 = vmax.xlane.f32.xlu0 %v1460_v40 }
 0x3fb   :  { %v4120_v41 = vpop.f32.mrf.mxu3 }
 0x3fc   :  { %v1463_v43 = vsel %vm499_vm2, %v4120_v41, -inf }
 0x3fd   :  { %1464 = vmax.xlane.f32.xlu1 %v1463_v43 }
 0x403   :  { %v4124_v44 = vpop.f32.mrf.mxu3 }
 0x404   :  { %v1466_v46 = vsel %vm499_vm2, %v4124_v44, -inf }
 0x405   :  { %1467 = vmax.xlane.f32.xlu2 %v1466_v46 }
 0x40b   :  { %v4128_v47 = vpop.f32.mrf.mxu3 }
 0x40c   :  { %v1469_v48 = vsel %vm499_vm2, %v4128_v47, -inf }
 0x40d   :  { %1470 = vmax.xlane.f32.xlu0 %v1469_v48 }
 0x413   :  { %v4132_v49 = vpop.f32.mrf.mxu3 }
 0x414   :  { %v1472_v50 = vsel %vm499_vm2, %v4132_v49, -inf }
 0x415   :  { %1473 = vmax.xlane.f32.xlu1 %v1472_v50 }
 0x41b   :  { %v4136_v52 = vpop.f32.mrf.mxu3 }
 0x41c   :  { %v1475_v45 = vsel %vm499_vm2, %v4136_v52, -inf }
 0x41d   :  { %1476 = vmax.xlane.f32.xlu2 %v1475_v45 }
 0x423   :  { %v4140_v55 = vpop.f32.mrf.mxu3 }
 0x424   :  { %v1478_v56 = vsel %vm499_vm2, %v4140_v55, -inf }
 0x425   :  { %1479 = vmax.xlane.f32.xlu0 %v1478_v56 }
 0x42b   :  { %v4144_v57 = vpop.f32.mrf.mxu3 }
 0x42c   :  { %v1481_v42 = vsel %vm499_vm2, %v4144_v57, -inf }
 0x42d   :  { %1482 = vmax.xlane.f32.xlu1 %v1481_v42 }
 0x430   :  { %v1441_v54 = vpop.xlane.xlu2 %1440 }
 0x431   :  { %v1487_v59 = vsub.f32 %v1326_v28, %v1441_v54 }
 0x433   :  { %v1503_v61 = vmul.f32 1.442695, %v1487_v59  ;;  %v4148_v62 = vpop.f32.mrf.mxu3 }
 0x434   :  { %v1484_v0 = vsel %vm499_vm2, %v4148_v62, -inf }
 0x435   :  { %3325 = vpow2.f32 %v1503_v61  ;;  %1485 = vmax.xlane.f32.xlu2 %v1484_v0 }
 0x438   :  { %v1444_v63 = vpop.xlane.xlu0 %1443 }
 0x439   :  { %v1488_v2 = vsub.f32 %v1329_v15, %v1444_v63 }
 0x43b   :  { %v3326_v4 = vpop.eup %3325  ;;  %v1505_v21 = vmul.f32 1.442695, %v1488_v2 }
 0x43c   :  { %3077 = vmatmul.msk.f32.vlgmr.msrb.gmra.mxu0 %vm499_vm2, %v3326_v4  ;;  %v1535_v5 = vsel %vm499_vm2, %v3326_v4, 0.0 }
 0x43d   :  { %3327 = vpow2.f32 %v1505_v21  ;;  %1536 = vadd.xlane.f32.xlu0 %v1535_v5 }
 0x440   :  { %v1447_v6 = vpop.xlane.xlu1 %1446 }
 0x441   :  { %v1489_v10 = vsub.f32 %v1332_v31, %v1447_v6 }
 0x443   :  { %v3328_v12 = vpop.eup %3327  ;;  %v1507_v14 = vmul.f32 1.442695, %v1489_v10 }
 0x444   :  { %3078 = vmatmul.msk.f32.gmra.mxu0 %vm499_vm2, %v3328_v12  ;;  %v1538_v18 = vsel %vm499_vm2, %v3328_v12, 0.0 }
 0x445   :  { %3329 = vpow2.f32 %v1507_v14  ;;  %1539 = vadd.xlane.f32.xlu1 %v1538_v18 }
 0x448   :  { %v1450_v20 = vpop.xlane.xlu2 %1449 }
 0x449   :  { %v1490_v23 = vsub.f32 %v1335_v17, %v1450_v20 }
 0x44b   :  { %v3330_v24 = vpop.eup %3329  ;;  %v1509_v28 = vmul.f32 1.442695, %v1490_v23 }
 0x44c   :  { %3079 = vmatmul.msk.f32.gmra.mxu0 %vm499_vm2, %v3330_v24  ;;  %v1541_v29 = vsel %vm499_vm2, %v3330_v24, 0.0 }
 0x44d   :  { %3331 = vpow2.f32 %v1509_v28  ;;  %1542 = vadd.xlane.f32.xlu2 %v1541_v29 }
 0x450   :  { %v1453_v15 = vpop.xlane.xlu0 %1452 }
 0x451   :  { %v1491_v30 = vsub.f32 %v4104_v8, %v1453_v15 }
 0x453   :  { %v3332_v31 = vpop.eup %3331  ;;  %v1511_v33 = vmul.f32 1.442695, %v1491_v30 }
 0x454   :  { %3080 = vmatmul.msk.f32.gmra.mxu0 %vm499_vm2, %v3332_v31  ;;  %v1544_v27 = vsel %vm499_vm2, %v3332_v31, 0.0 }
 0x455   :  { %3333 = vpow2.f32 %v1511_v33  ;;  %1545 = vadd.xlane.f32.xlu0 %v1544_v27 }
 0x458   :  { %v1456_v17 = vpop.xlane.xlu1 %1455 }
 0x459   :  { %v1492_v34 = vsub.f32 %v4108_v35, %v1456_v17 }
 0x45b   :  { %v3334_v36 = vpop.eup %3333  ;;  %v1513_v38 = vmul.f32 1.442695, %v1492_v34 }
 0x45c   :  { %3081 = vmatmul.msk.f32.gmra.mxu0 %vm499_vm2, %v3334_v36  ;;  %v1547_v40 = vsel %vm499_vm2, %v3334_v36, 0.0 }
 0x45d   :  { %3335 = vpow2.f32 %v1513_v38  ;;  %1548 = vadd.xlane.f32.xlu1 %v1547_v40 }
 0x460   :  { %v1459_v8 = vpop.xlane.xlu2 %1458 }
 0x461   :  { %v1493_v43 = vsub.f32 %v4112_v37, %v1459_v8 }
 0x463   :  { %v3336_v46 = vpop.eup %3335  ;;  %v1515_v48 = vmul.f32 1.442695, %v1493_v43 }
 0x464   :  { %3082 = vmatmul.msk.f32.gmra.mxu0 %vm499_vm2, %v3336_v46  ;;  %v1550_v50 = vsel %vm499_vm2, %v3336_v46, 0.0 }
 0x465   :  { %3337 = vpow2.f32 %v1515_v48  ;;  %1551 = vadd.xlane.f32.xlu2 %v1550_v50 }
 0x468   :  { %v1462_v35 = vpop.xlane.xlu0 %1461 }
 0x469   :  { %v1494_v45 = vsub.f32 %v4116_v39, %v1462_v35 }
 0x46b   :  { %v3338_v56 = vpop.eup %3337  ;;  %v1517_v42 = vmul.f32 1.442695, %v1494_v45 }
 0x46c   :  { %3083 = vmatmul.msk.f32.gmra.mxu0 %vm499_vm2, %v3338_v56  ;;  %v1553_v54 = vsel %vm499_vm2, %v3338_v56, 0.0 }
 0x46d   :  { %3339 = vpow2.f32 %v1517_v42  ;;  %1554 = vadd.xlane.f32.xlu0 %v1553_v54 }
 0x470   :  { %v1465_v37 = vpop.xlane.xlu1 %1464 }
 0x471   :  { %v1495_v59 = vsub.f32 %v4120_v41, %v1465_v37 }
 0x473   :  { %v3340_v61 = vpop.eup %3339  ;;  %v1519_v0 = vmul.f32 1.442695, %v1495_v59 }
 0x474   :  { %3084 = vmatmul.msk.f32.gmra.mxu0 %vm499_vm2, %v3340_v61  ;;  %v1556_v63 = vsel %vm499_vm2, %v3340_v61, 0.0 }
 0x475   :  { %3341 = vpow2.f32 %v1519_v0  ;;  %1557 = vadd.xlane.f32.xlu1 %v1556_v63 }
 0x478   :  { %v1468_v39 = vpop.xlane.xlu2 %1467 }
 0x479   :  { %v1496_v2 = vsub.f32 %v4124_v44, %v1468_v39 }
 0x47b   :  { %v3342_v4 = vpop.eup %3341  ;;  %v1521_v21 = vmul.f32 1.442695, %v1496_v2  ;;  %v3112_v2 = vld [vmem:[%s4688_s0 + $0x88] sm:$0xff] }
 0x47c   :  { %3085 = vmatmul.msk.f32.vlgmr.msrb.gmra.mxu1 %vm499_vm2, %v3342_v4  ;;  %v1559_v5 = vsel %vm499_vm2, %v3342_v4, 0.0 }
 0x47d   :  { %3343 = vpow2.f32 %v1521_v21  ;;  %1560 = vadd.xlane.f32.xlu2 %v1559_v5 }
 0x480   :  { %v1471_v41 = vpop.xlane.xlu0 %1470 }
 0x481   :  { %v1497_v6 = vsub.f32 %v4128_v47, %v1471_v41 }
 0x483   :  { %v3344_v10 = vpop.eup %3343  ;;  %v1523_v12 = vmul.f32 1.442695, %v1497_v6 }
 0x484   :  { %3086 = vmatmul.msk.f32.gmra.mxu1 %vm499_vm2, %v3344_v10  ;;  %v1562_v14 = vsel %vm499_vm2, %v3344_v10, 0.0 }
 0x485   :  { %3345 = vpow2.f32 %v1523_v12  ;;  %1563 = vadd.xlane.f32.xlu0 %v1562_v14  ;;  %v3113_v12 = vld [vmem:[%s4688_s0 + $0x90] sm:$0xff] }
 0x488   :  { %v1474_v44 = vpop.xlane.xlu1 %1473 }
 0x489   :  { %v1498_v18 = vsub.f32 %v4132_v49, %v1474_v44 }
 0x48b   :  { %v3346_v20 = vpop.eup %3345  ;;  %v1525_v23 = vmul.f32 1.442695, %v1498_v18 }
 0x48c   :  { %3087 = vmatmul.msk.f32.gmra.mxu1 %vm499_vm2, %v3346_v20  ;;  %v1565_v24 = vsel %vm499_vm2, %v3346_v20, 0.0 }
 0x48d   :  { %3347 = vpow2.f32 %v1525_v23  ;;  %1566 = vadd.xlane.f32.xlu1 %v1565_v24 }
 0x490   :  { %v1477_v47 = vpop.xlane.xlu2 %1476 }
 0x491   :  { %v1499_v28 = vsub.f32 %v4136_v52, %v1477_v47  ;;  %v3093_v52 = vld [vmem:[%s4694_s7 + $0x4] sm:$0xf]  ;;  %v3114_v47 = vld [vmem:[%s4688_s0 + $0x98] sm:$0xff] }
 0x492   :  { %3094 = vmatpush.msk.msrb.mxu2 %vm106_vm0, %v3093_v52 }
 0x493   :  { %v3348_v29 = vpop.eup %3347  ;;  %v1527_v15 = vmul.f32 1.442695, %v1499_v28 }
 0x494   :  { %3088 = vmatmul.msk.f32.gmra.mxu1 %vm499_vm2, %v3348_v29  ;;  %v1568_v30 = vsel %vm499_vm2, %v3348_v29, 0.0 }
 0x495   :  { %3349 = vpow2.f32 %v1527_v15  ;;  %1569 = vadd.xlane.f32.xlu2 %v1568_v30 }
 0x498   :  { %v1480_v49 = vpop.xlane.xlu0 %1479 }
 0x499   :  { %v1500_v31 = vsub.f32 %v4140_v55, %v1480_v49 }
 0x49b   :  { %v3350_v33 = vpop.eup %3349  ;;  %v1529_v27 = vmul.f32 1.442695, %v1500_v31 }
 0x49c   :  { %3089 = vmatmul.msk.f32.gmra.mxu1 %vm499_vm2, %v3350_v33  ;;  %v1571_v17 = vsel %vm499_vm2, %v3350_v33, 0.0  ;;  %v3115_v33 = vld [vmem:[%s4688_s0 + $0xa0] sm:$0xff] }
 0x49d   :  { %3351 = vpow2.f32 %v1529_v27  ;;  %1572 = vadd.xlane.f32.xlu0 %v1571_v17 }
 0x4a0   :  { %v1483_v34 = vpop.xlane.xlu1 %1482 }
 0x4a1   :  { %v1501_v36 = vsub.f32 %v4144_v57, %v1483_v34 }
 0x4a3   :  { %v3352_v38 = vpop.eup %3351  ;;  %v1531_v40 = vmul.f32 1.442695, %v1501_v36 }
 0x4a4   :  { %3090 = vmatmul.msk.f32.gmra.mxu1 %vm499_vm2, %v3352_v38  ;;  %v1574_v55 = vsel %vm499_vm2, %v3352_v38, 0.0 }
 0x4a5   :  { %3353 = vpow2.f32 %v1531_v40  ;;  %1575 = vadd.xlane.f32.xlu1 %v1574_v55  ;;  %v3116_v40 = vld [vmem:[%s4688_s0 + $0xa8] sm:$0xff] }
 0x4a8   :  { %v1486_v8 = vpop.xlane.xlu2 %1485 }
 0x4a9   :  { %v1502_v43 = vsub.f32 %v4148_v62, %v1486_v8  ;;  %v3111_v62 = vld [vmem:[%s4688_s0 + $0x80] sm:$0xff] }
 0x4ab   :  { %v3354_v46 = vpop.eup %3353  ;;  %v1533_v48 = vmul.f32 1.442695, %v1502_v43 }
 0x4ac   :  { %3091 = vmatmul.msk.f32.gmra.mxu1 %vm499_vm2, %v3354_v46  ;;  %v1577_v50 = vsel %vm499_vm2, %v3354_v46, 0.0 }
 0x4ad   :  { %3355 = vpow2.f32 %v1533_v48  ;;  %1578 = vadd.xlane.f32.xlu2 %v1577_v50 }
 0x4b0   :  { %v1537_v57 = vpop.xlane.xlu0 %1536 }
 0x4b1   :  { %3357 = vrcp.f32 %v1537_v57  ;;  %v3117_v57 = vld [vmem:[%s4688_s0 + $0xb0] sm:$0xff] }
 0x4b3   :  { %v3356_v35 = vpop.eup %3355 }
 0x4b4   :  { %3092 = vmatmul.msk.f32.gmra.mxu1 %vm499_vm2, %v3356_v35  ;;  %v1580_v45 = vsel %vm499_vm2, %v3356_v35, 0.0 }
 0x4b5   :  { %1581 = vadd.xlane.f32.xlu0 %v1580_v45 }
 0x4b7   :  { %v3358_v42 = vpop.eup %3357 }
 0x4b8   :  { %v1540_v56 = vpop.xlane.xlu1 %1539 }
 0x4b9   :  { %v1624_v54 = vpop.f32.mrf.mxu0  ;;  %3359 = vrcp.f32 %v1540_v56 }
 0x4ba   :  { %v1729_v37 = vmul.f32 %v3358_v42, %v1624_v54 }
 0x4bc   :  { %v1745_v59 = vmax.f32 %v1729_v37, 0.0  ;;  %v1912_v61 = vadd.f32 %v3111_v62, %v1729_v37  ;;  %v3118_v37 = vld [vmem:[%s4688_s0 + $0xb8] sm:$0xff] }
 0x4be   :  { %3095 = vmatmul.msk.f32.vlgmr.msrb.gmra.mxu2 %vm57_vm1, %v1745_v59  ;;  %3130 = vmatmul.msk.f32.vlgmr.msrb.gmra.mxu3 %vm57_vm1, %v1912_v61 }
 0x4bf   :  { %3149 = vmatmul.msk.f32.vlgmr.msra.gmra.mxu0 %vm57_vm1, %v1912_v61  ;;  %3168 = vmatmul.msk.f32.vlgmr.msra.gmra.mxu1 %vm57_vm1, %v1912_v61  ;;  %v3360_v63 = vpop.eup %3359 }
 0x4c0   :  { %v1543_v0 = vpop.xlane.xlu2 %1542 }
 0x4c1   :  { %v1627_v39 = vpop.f32.mrf.mxu0  ;;  %3361 = vrcp.f32 %v1543_v0 }
 0x4c2   :  { %v1730_v4 = vmul.f32 %v3360_v63, %v1627_v39 }
 0x4c4   :  { %v1746_v21 = vmax.f32 %v1730_v4, 0.0  ;;  %v1913_v5 = vadd.f32 %v3112_v2, %v1730_v4  ;;  %v3119_v4 = vld [vmem:[%s4688_s0 + $0x140] sm:$0xff] }
 0x4c6   :  { %3096 = vmatmul.msk.f32.gmra.mxu2 %vm57_vm1, %v1746_v21  ;;  %3131 = vmatmul.msk.f32.gmra.mxu3 %vm57_vm1, %v1913_v5 }
 0x4c7   :  { %3150 = vmatmul.msk.f32.gmra.mxu0 %vm57_vm1, %v1913_v5  ;;  %3169 = vmatmul.msk.f32.gmra.mxu1 %vm57_vm1, %v1913_v5  ;;  %v3362_v6 = vpop.eup %3361 }
 0x4c8   :  { %v1546_v41 = vpop.xlane.xlu0 %1545 }
 0x4c9   :  { %v1630_v10 = vpop.f32.mrf.mxu0  ;;  %3363 = vrcp.f32 %v1546_v41 }
 0x4ca   :  { %v1731_v14 = vmul.f32 %v3362_v6, %v1630_v10 }
 0x4cc   :  { %v1747_v44 = vmax.f32 %v1731_v14, 0.0  ;;  %v1914_v18 = vadd.f32 %v3113_v12, %v1731_v14  ;;  %v3120_v14 = vld [vmem:[%s4688_s0 + $0x148] sm:$0xff] }
 0x4ce   :  { %3097 = vmatmul.msk.f32.gmra.mxu2 %vm57_vm1, %v1747_v44  ;;  %3132 = vmatmul.msk.f32.gmra.mxu3 %vm57_vm1, %v1914_v18 }
 0x4cf   :  { %3151 = vmatmul.msk.f32.gmra.mxu0 %vm57_vm1, %v1914_v18  ;;  %3170 = vmatmul.msk.f32.gmra.mxu1 %vm57_vm1, %v1914_v18  ;;  %v3364_v23 = vpop.eup %3363 }
 0x4d0   :  { %v1549_v20 = vpop.xlane.xlu1 %1548 }
 0x4d1   :  { %v1633_v24 = vpop.f32.mrf.mxu0  ;;  %3365 = vrcp.f32 %v1549_v20 }
 0x4d2   :  { %v1732_v28 = vmul.f32 %v3364_v23, %v1633_v24 }
 0x4d4   :  { %v1748_v29 = vmax.f32 %v1732_v28, 0.0  ;;  %v1915_v15 = vadd.f32 %v3114_v47, %v1732_v28  ;;  %v3121_v28 = vld [vmem:[%s4688_s0 + $0x150] sm:$0xff] }
 0x4d6   :  { %3098 = vmatmul.msk.f32.gmra.mxu2 %vm57_vm1, %v1748_v29  ;;  %3133 = vmatmul.msk.f32.gmra.mxu3 %vm57_vm1, %v1915_v15 }
 0x4d7   :  { %3152 = vmatmul.msk.f32.gmra.mxu0 %vm57_vm1, %v1915_v15  ;;  %3171 = vmatmul.msk.f32.gmra.mxu1 %vm57_vm1, %v1915_v15  ;;  %v3366_v49 = vpop.eup %3365 }
 0x4d8   :  { %v1552_v30 = vpop.xlane.xlu2 %1551 }
 0x4d9   :  { %v1636_v31 = vpop.f32.mrf.mxu0  ;;  %3367 = vrcp.f32 %v1552_v30 }
 0x4da   :  { %v1733_v27 = vmul.f32 %v3366_v49, %v1636_v31 }
 0x4dc   :  { %v1749_v17 = vmax.f32 %v1733_v27, 0.0  ;;  %v1916_v52 = vadd.f32 %v3115_v33, %v1733_v27  ;;  %v3122_v27 = vld [vmem:[%s4688_s0 + $0x158] sm:$0xff] }
 0x4de   :  { %3099 = vmatmul.msk.f32.gmra.mxu2 %vm57_vm1, %v1749_v17  ;;  %3134 = vmatmul.msk.f32.gmra.mxu3 %vm57_vm1, %v1916_v52 }
 0x4df   :  { %3153 = vmatmul.msk.f32.gmra.mxu0 %vm57_vm1, %v1916_v52  ;;  %3172 = vmatmul.msk.f32.gmra.mxu1 %vm57_vm1, %v1916_v52  ;;  %v3368_v36 = vpop.eup %3367 }
 0x4e0   :  { %v1555_v34 = vpop.xlane.xlu0 %1554 }
 0x4e1   :  { %v1639_v38 = vpop.f32.mrf.mxu0  ;;  %3369 = vrcp.f32 %v1555_v34 }
 0x4e2   :  { %v1734_v55 = vmul.f32 %v3368_v36, %v1639_v38 }
 0x4e4   :  { %v1750_v8 = vmax.f32 %v1734_v55, 0.0  ;;  %v1917_v43 = vadd.f32 %v3116_v40, %v1734_v55  ;;  %v3123_v55 = vld [vmem:[%s4688_s0 + $0x160] sm:$0xff] }
 0x4e6   :  { %3100 = vmatmul.msk.f32.gmra.mxu2 %vm57_vm1, %v1750_v8  ;;  %3135 = vmatmul.msk.f32.gmra.mxu3 %vm57_vm1, %v1917_v43 }
 0x4e7   :  { %3154 = vmatmul.msk.f32.gmra.mxu0 %vm57_vm1, %v1917_v43  ;;  %3173 = vmatmul.msk.f32.gmra.mxu1 %vm57_vm1, %v1917_v43  ;;  %v3370_v48 = vpop.eup %3369 }
 0x4e8   :  { %v1558_v46 = vpop.xlane.xlu1 %1557 }
 0x4e9   :  { %v1642_v50 = vpop.f32.mrf.mxu0  ;;  %3371 = vrcp.f32 %v1558_v46 }
 0x4ea   :  { %v1735_v35 = vmul.f32 %v3370_v48, %v1642_v50 }
 0x4ec   :  { %v1751_v45 = vmax.f32 %v1735_v35, 0.0  ;;  %v1918_v56 = vadd.f32 %v3117_v57, %v1735_v35  ;;  %v3124_v35 = vld [vmem:[%s4688_s0 + $0x168] sm:$0xff] }
 0x4ee   :  { %3101 = vmatmul.msk.f32.gmra.mxu2 %vm57_vm1, %v1751_v45  ;;  %3136 = vmatmul.msk.f32.gmra.mxu3 %vm57_vm1, %v1918_v56 }
 0x4ef   :  { %3155 = vmatmul.msk.f32.gmra.mxu0 %vm57_vm1, %v1918_v56  ;;  %3174 = vmatmul.msk.f32.gmra.mxu1 %vm57_vm1, %v1918_v56  ;;  %v3372_v54 = vpop.eup %3371 }
 0x4f0   :  { %v1561_v42 = vpop.xlane.xlu2 %1560 }
 0x4f1   :  { %v1645_v62 = vpop.f32.mrf.mxu0  ;;  %3373 = vrcp.f32 %v1561_v42 }
 0x4f2   :  { %v1736_v59 = vmul.f32 %v3372_v54, %v1645_v62 }
 0x4f4   :  { %v1752_v61 = vmax.f32 %v1736_v59, 0.0  ;;  %v1919_v0 = vadd.f32 %v3118_v37, %v1736_v59  ;;  %v3125_v59 = vld [vmem:[%s4688_s0 + $0x170] sm:$0xff] }
 0x4f6   :  { %3102 = vmatmul.msk.f32.gmra.mxu2 %vm57_vm1, %v1752_v61  ;;  %3137 = vmatmul.msk.f32.gmra.mxu3 %vm57_vm1, %v1919_v0 }
 0x4f7   :  { %3156 = vmatmul.msk.f32.gmra.mxu0 %vm57_vm1, %v1919_v0  ;;  %3175 = vmatmul.msk.f32.gmra.mxu1 %vm57_vm1, %v1919_v0  ;;  %v3374_v39 = vpop.eup %3373 }
 0x4f8   :  { %v1564_v63 = vpop.xlane.xlu0 %1563 }
 0x4f9   :  { %v1689_v2 = vpop.f32.mrf.mxu1  ;;  %3375 = vrcp.f32 %v1564_v63 }
 0x4fa   :  { %v1737_v21 = vmul.f32 %v3374_v39, %v1689_v2 }
 0x4fc   :  { %v1753_v5 = vmax.f32 %v1737_v21, 0.0  ;;  %v1920_v41 = vadd.f32 %v3119_v4, %v1737_v21  ;;  %v3126_v4 = vld [vmem:[%s4688_s0 + $0x178] sm:$0xff] }
 0x4fe   :  { %3103 = vmatmul.msk.f32.gmra.mxu2 %vm57_vm1, %v1753_v5  ;;  %3138 = vmatmul.msk.f32.gmra.mxu3 %vm57_vm1, %v1920_v41 }
 0x4ff   :  { %3157 = vmatmul.msk.f32.gmra.mxu0 %vm57_vm1, %v1920_v41  ;;  %3176 = vmatmul.msk.f32.gmra.mxu1 %vm57_vm1, %v1920_v41  ;;  %v3376_v10 = vpop.eup %3375 }
 0x500   :  { %v1567_v6 = vpop.xlane.xlu1 %1566 }
 0x501   :  { %v1692_v12 = vpop.f32.mrf.mxu1  ;;  %3377 = vrcp.f32 %v1567_v6 }
 0x502   :  { %v1738_v44 = vmul.f32 %v3376_v10, %v1692_v12 }
 0x504   :  { %v1754_v18 = vmax.f32 %v1738_v44, 0.0  ;;  %v1921_v20 = vadd.f32 %v3120_v14, %v1738_v44 }
 0x506   :  { %3104 = vmatmul.msk.f32.gmra.mxu2 %vm57_vm1, %v1754_v18  ;;  %3139 = vmatmul.msk.f32.gmra.mxu3 %vm57_vm1, %v1921_v20 }
 0x507   :  { %3158 = vmatmul.msk.f32.gmra.mxu0 %vm57_vm1, %v1921_v20  ;;  %3177 = vmatmul.msk.f32.gmra.mxu1 %vm57_vm1, %v1921_v20  ;;  %v3378_v24 = vpop.eup %3377 }
 0x508   :  { %v1570_v23 = vpop.xlane.xlu2 %1569 }
 0x509   :  { %v1695_v47 = vpop.f32.mrf.mxu1  ;;  %3379 = vrcp.f32 %v1570_v23 }
 0x50a   :  { %v1739_v29 = vmul.f32 %v3378_v24, %v1695_v47 }
 0x50c   :  { %v1755_v15 = vmax.f32 %v1739_v29, 0.0  ;;  %v1922_v30 = vadd.f32 %v3121_v28, %v1739_v29 }
 0x50e   :  { %3105 = vmatmul.msk.f32.gmra.mxu2 %vm57_vm1, %v1755_v15  ;;  %3140 = vmatmul.msk.f32.gmra.mxu3 %vm57_vm1, %v1922_v30 }
 0x50f   :  { %3159 = vmatmul.msk.f32.gmra.mxu0 %vm57_vm1, %v1922_v30  ;;  %3178 = vmatmul.msk.f32.gmra.mxu1 %vm57_vm1, %v1922_v30  ;;  %v3380_v31 = vpop.eup %3379 }
 0x510   :  { %v1573_v49 = vpop.xlane.xlu0 %1572 }
 0x511   :  { %v1698_v33 = vpop.f32.mrf.mxu1  ;;  %3381 = vrcp.f32 %v1573_v49  ;;  %v4315_v49 = vld [vmem:[%s4689_s5 + $0x2] ss:$0 sm:$0xff] }
 0x512   :  { %v1740_v17 = vmul.f32 %v3380_v31, %v1698_v33  ;;  %v4320_v31 = vld [vmem:[%s4693_s6 + $0x2] ss:$0 sm:$0xff] }
 0x514   :  { %v1756_v52 = vmax.f32 %v1740_v17, 0.0  ;;  %v1923_v34 = vadd.f32 %v3122_v27, %v1740_v17 }
 0x516   :  { %3106 = vmatmul.msk.f32.gmra.mxu2 %vm57_vm1, %v1756_v52  ;;  %3141 = vmatmul.msk.f32.gmra.mxu3 %vm57_vm1, %v1923_v34 }
 0x517   :  { %3160 = vmatmul.msk.f32.gmra.mxu0 %vm57_vm1, %v1923_v34  ;;  %3179 = vmatmul.msk.f32.gmra.mxu1 %vm57_vm1, %v1923_v34  ;;  %v3382_v38 = vpop.eup %3381 }
 0x518   :  { %v1576_v36 = vpop.xlane.xlu1 %1575 }
 0x519   :  { %v1701_v40 = vpop.f32.mrf.mxu1  ;;  %3383 = vrcp.f32 %v1576_v36 }
 0x51a   :  { %v1741_v8 = vmul.f32 %v3382_v38, %v1701_v40 }
 0x51c   :  { %v1757_v43 = vmax.f32 %v1741_v8, 0.0  ;;  %v1924_v46 = vadd.f32 %v3123_v55, %v1741_v8 }
 0x51e   :  { %3107 = vmatmul.msk.f32.gmra.mxu2 %vm57_vm1, %v1757_v43  ;;  %3142 = vmatmul.msk.f32.gmra.mxu3 %vm57_vm1, %v1924_v46 }
 0x51f   :  { %3161 = vmatmul.msk.f32.gmra.mxu0 %vm57_vm1, %v1924_v46  ;;  %3180 = vmatmul.msk.f32.gmra.mxu1 %vm57_vm1, %v1924_v46  ;;  %v3384_v50 = vpop.eup %3383 }
 0x520   :  { %v1579_v48 = vpop.xlane.xlu2 %1578 }
 0x521   :  { %v1704_v57 = vpop.f32.mrf.mxu1  ;;  %3385 = vrcp.f32 %v1579_v48 }
 0x522   :  { %v1742_v45 = vmul.f32 %v3384_v50, %v1704_v57 }
 0x524   :  { %v1758_v56 = vmax.f32 %v1742_v45, 0.0  ;;  %v1925_v42 = vadd.f32 %v3124_v35, %v1742_v45 }
 0x526   :  { %3108 = vmatmul.msk.f32.gmra.mxu2 %vm57_vm1, %v1758_v56  ;;  %3143 = vmatmul.msk.f32.gmra.mxu3 %vm57_vm1, %v1925_v42 }
 0x527   :  { %3162 = vmatmul.msk.f32.gmra.mxu0 %vm57_vm1, %v1925_v42  ;;  %3181 = vmatmul.msk.f32.gmra.mxu1 %vm57_vm1, %v1925_v42  ;;  %v3386_v62 = vpop.eup %3385 }
 0x528   :  { %v1582_v54 = vpop.xlane.xlu0 %1581 }
 0x529   :  { %v1707_v37 = vpop.f32.mrf.mxu1  ;;  %3387 = vrcp.f32 %v1582_v54 }
 0x52a   :  { %v1743_v61 = vmul.f32 %v3386_v62, %v1707_v37 }
 0x52c   :  { %v1759_v0 = vmax.f32 %v1743_v61, 0.0  ;;  %v1926_v63 = vadd.f32 %v3125_v59, %v1743_v61 }
 0x52e   :  { %3109 = vmatmul.msk.f32.gmra.mxu2 %vm57_vm1, %v1759_v0  ;;  %3144 = vmatmul.msk.f32.gmra.mxu3 %vm57_vm1, %v1926_v63 }
 0x52f   :  { %3163 = vmatmul.msk.f32.gmra.mxu0 %vm57_vm1, %v1926_v63  ;;  %3182 = vmatmul.msk.f32.gmra.mxu1 %vm57_vm1, %v1926_v63  ;;  %v3388_v39 = vpop.eup %3387 }
 0x531   :  { %v1710_v2 = vpop.f32.mrf.mxu1 }
 0x532   :  { %v1744_v21 = vmul.f32 %v3388_v39, %v1710_v2 }
 0x534   :  { %v1760_v5 = vmax.f32 %v1744_v21, 0.0  ;;  %v1927_v41 = vadd.f32 %v3126_v4, %v1744_v21  ;;  %v4363_v21 = vld [vmem:[%s4692_s4 + $0x2] ss:$0 sm:$0xff] }
 0x536   :  { %3110 = vmatmul.msk.f32.gmra.mxu2 %vm57_vm1, %v1760_v5  ;;  %3145 = vmatmul.msk.f32.gmra.mxu3 %vm57_vm1, %v1927_v41 }
 0x537   :  { %3164 = vmatmul.msk.f32.gmra.mxu0 %vm57_vm1, %v1927_v41  ;;  %3183 = vmatmul.msk.f32.gmra.mxu1 %vm57_vm1, %v1927_v41 }
 0x53c   :  { %v2078_v6 = vpop.f32.mrf.mxu0  ;;  %v2153_v10 = vpop.f32.mrf.mxu1 }
 0x53d   :  { %v2154_v42 = vadd.f32 %v4320_v31, %v2153_v10  ;;  %v2079_v5 = vadd.f32 %v4315_v49, %v2078_v6 }
 0x541   :  { %v2003_v33 = vpop.f32.mrf.mxu3  ;;  %v4328_v55 = vpop.f32.mrf.mxu2 }
 0x542   :  { %v2004_v10 = vadd.f32 %v4363_v21, %v2003_v33 }
 0x544   :  { %v2081_v12 = vpop.f32.mrf.mxu0  ;;  %v2156_v14 = vpop.f32.mrf.mxu1 }
 0x545   :  { %v2157_v45 = vadd.f32 %v4320_v31, %v2156_v14  ;;  %v2082_v2 = vadd.f32 %v4315_v49, %v2081_v12 }
 0x549   :  { %v2006_v48 = vpop.f32.mrf.mxu3  ;;  %v4348_v37 = vpop.f32.mrf.mxu2 }
 0x54c   :  { %v2084_v44 = vpop.f32.mrf.mxu0  ;;  %v2159_v18 = vpop.f32.mrf.mxu1 }
 0x54d   :  { %v2160_v35 = vadd.f32 %v4320_v31, %v2159_v18  ;;  %v2085_v0 = vadd.f32 %v4315_v49, %v2084_v44 }
 0x551   :  { %v2009_v61 = vpop.f32.mrf.mxu3  ;;  %v4357_v4 = vpop.f32.mrf.mxu2 }
 0x552   :  { %v2010_v6 = vadd.f32 %v4363_v21, %v2009_v61 }
 0x554   :  { %v2087_v20 = vpop.f32.mrf.mxu0  ;;  %v2162_v23 = vpop.f32.mrf.mxu1 }
 0x555   :  { %v2163_v50 = vadd.f32 %v4320_v31, %v2162_v23  ;;  %v2088_v59 = vadd.f32 %v4315_v49, %v2087_v20  ;;  %v2007_v20 = vadd.f32 %v4363_v21, %v2006_v48 }
 0x559   :  { %v2012_v41 = vpop.f32.mrf.mxu3  ;;  %v4369_v12 = vpop.f32.mrf.mxu2 }
 0x55c   :  { %v2090_v24 = vpop.f32.mrf.mxu0  ;;  %v2165_v47 = vpop.f32.mrf.mxu1 }
 0x55d   :  { %v2166_v8 = vadd.f32 %v4320_v31, %v2165_v47  ;;  %v2091_v56 = vadd.f32 %v4315_v49, %v2090_v24 }
 0x561   :  { %v2015_v18 = vpop.f32.mrf.mxu3  ;;  %v4373_v47 = vpop.f32.mrf.mxu2 }
 0x564   :  { %v2093_v28 = vpop.f32.mrf.mxu0  ;;  %v2168_v29 = vpop.f32.mrf.mxu1 }
 0x565   :  { %v2169_v38 = vadd.f32 %v4320_v31, %v2168_v29  ;;  %v2094_v57 = vadd.f32 %v4315_v49, %v2093_v28 }
 0x56c   :  { %v2096_v15 = vpop.f32.mrf.mxu0  ;;  %v2171_v30 = vpop.f32.mrf.mxu1 }
 0x56d   :  { %v2172_v36 = vadd.f32 %v4320_v31, %v2171_v30  ;;  %v2097_v40 = vadd.f32 %v4315_v49, %v2096_v15  ;;  %v2018_v15 = vpop.f32.mrf.mxu3  ;;  %v2013_v30 = vadd.f32 %v4363_v21, %v2012_v41 }
 0x574   :  { %v2099_v27 = vpop.f32.mrf.mxu0  ;;  %v2174_v17 = vpop.f32.mrf.mxu1 }
 0x575   :  { %v2100_v52 = vadd.f32 %v4315_v49, %v2099_v27  ;;  %v2175_v34 = vadd.f32 %v4320_v31, %v2174_v17  ;;  %v4378_v17 = vpop.f32.mrf.mxu2 }
 0x577   :  { %3184 = vmatpush.xpose.msk.msra.mxu2 %vm57_vm1, %v2100_v52  ;;  %2555 = vmatpush.msrb.mxu0 %v2175_v34  ;;  %v2021_v52 = vpop.f32.mrf.mxu3  ;;  %v2016_v34 = vadd.f32 %v4363_v21, %v2015_v18 }
 0x579   :  { %2556 = vmatpush.msrb.mxu0 %v2172_v36 }
 0x57b   :  { %3185 = vmatpush.xpose.msk.msra.mxu2 %vm57_vm1, %v2097_v40  ;;  %2557 = vmatpush.msrb.mxu0 %v2169_v38 }
 0x57c   :  { %v4332_v43 = vpop.f32.mrf.mxu0  ;;  %v4334_v46 = vpop.f32.mrf.mxu1 }
 0x57d   :  { %2558 = vmatpush.msrb.mxu0 %v2166_v8  ;;  %v4385_v48 = vpop.f32.mrf.mxu2 }
 0x57f   :  { %3186 = vmatpush.xpose.msk.msra.mxu2 %vm57_vm1, %v2094_v57  ;;  %2559 = vmatpush.msrb.mxu0 %v2163_v50  ;;  %v2024_v57 = vpop.f32.mrf.mxu3 }
 0x581   :  { %2560 = vmatpush.msrb.mxu0 %v2160_v35 }
 0x583   :  { %3187 = vmatpush.xpose.msk.msra.mxu2 %vm57_vm1, %v2091_v56  ;;  %2561 = vmatpush.msrb.mxu0 %v2157_v45 }
 0x584   :  { %v4344_v54 = vpop.f32.mrf.mxu0  ;;  %v4346_v62 = vpop.f32.mrf.mxu1 }
 0x585   :  { %2562 = vmatpush.msrb.mxu0 %v2154_v42  ;;  %v2019_v42 = vadd.f32 %v4363_v21, %v2018_v15 }
 0x587   :  { %3188 = vmatpush.xpose.msk.msra.mxu2 %vm57_vm1, %v2088_v59 }
 0x58b   :  { %3189 = vmatpush.xpose.msk.msra.mxu2 %vm57_vm1, %v2085_v0 }
 0x58c   :  { %v4354_v63 = vpop.f32.mrf.mxu0  ;;  %v2183_v39 = vpop.f32.mrf.mxu1 }
 0x58d   :  { %v2184_v0 = vadd.f32 %v4320_v31, %v2183_v39  ;;  %v2022_v39 = vadd.f32 %v4363_v21, %v2021_v52 }
 0x58f   :  { %3190 = vmatpush.xpose.msk.msra.mxu2 %vm57_vm1, %v2082_v2  ;;  %v4399_v2 = vpop.f32.mrf.mxu2 }
 0x593   :  { %3191 = vmatpush.xpose.msk.msra.mxu2 %vm57_vm1, %v2079_v5  ;;  %v2181_v5 = vadd.f32 %v4320_v31, %v4346_v62  ;;  %v2109_v62 = vadd.f32 %v4315_v49, %v4354_v63 }
 0x594   :  { %v2111_v14 = vpop.f32.mrf.mxu0  ;;  %v2186_v44 = vpop.f32.mrf.mxu1 }
 0x595   :  { %v2187_v59 = vadd.f32 %v4320_v31, %v2186_v44  ;;  %v2027_v44 = vpop.f32.mrf.mxu3  ;;  %v2112_v18 = vadd.f32 %v4315_v49, %v2111_v14  ;;  %v2103_v14 = vadd.f32 %v4315_v49, %v4332_v43 }
 0x596   :  { %3192 = vmatmul.msk.f32.vlgmr.msra.gmra.mxu2 %vm57_vm1, %v2004_v10  ;;  %v2178_v10 = vadd.f32 %v4320_v31, %v4334_v46  ;;  %v2106_v46 = vadd.f32 %v4315_v49, %v4344_v54  ;;  %v2028_v63 = vadd.f32 %v4363_v21, %v2027_v44 }
 0x59c   :  { %v2114_v23 = vpop.f32.mrf.mxu0  ;;  %v2189_v24 = vpop.f32.mrf.mxu1 }
 0x59d   :  { %v2190_v56 = vadd.f32 %v4320_v31, %v2189_v24  ;;  %v2115_v41 = vadd.f32 %v4315_v49, %v2114_v23  ;;  %v2030_v23 = vpop.f32.mrf.mxu3 }
 0x59e   :  { %3193 = vmatmul.msk.f32.gmra.mxu2 %vm57_vm1, %v2007_v20  ;;  %v4413_v20 = vpop.f32.mrf.mxu2 }
 0x5a4   :  { %v2117_v28 = vpop.f32.mrf.mxu0  ;;  %v2192_v29 = vpop.f32.mrf.mxu1 }
 0x5a5   :  { %v2193_v35 = vadd.f32 %v4320_v31, %v2192_v29  ;;  %v2118_v61 = vadd.f32 %v4315_v49, %v2117_v28  ;;  %v2031_v28 = vadd.f32 %v4363_v21, %v2030_v23 }
 0x5a6   :  { %3194 = vmatmul.msk.f32.gmra.mxu2 %vm57_vm1, %v2010_v6  ;;  %v4425_v24 = vpop.f32.mrf.mxu2  ;;  %v2033_v6 = vpop.f32.mrf.mxu3 }
 0x5a7   :  { %v2034_v15 = vadd.f32 %v4363_v21, %v2033_v6 }
 0x5ac   :  { %v2120_v33 = vpop.f32.mrf.mxu0  ;;  %v2195_v27 = vpop.f32.mrf.mxu1 }
 0x5ad   :  { %v2196_v50 = vadd.f32 %v4320_v31, %v2195_v27  ;;  %v2121_v45 = vadd.f32 %v4315_v49, %v2120_v33 }
 0x5ae   :  { %3195 = vmatmul.msk.f32.gmra.mxu2 %vm57_vm1, %v2013_v30  ;;  %v4430_v54 = vpop.f32.mrf.mxu2  ;;  %v2036_v29 = vpop.f32.mrf.mxu3 }
 0x5af   :  { %v2037_v30 = vadd.f32 %v4363_v21, %v2036_v29 }
 0x5b4   :  { %v2123_v36 = vpop.f32.mrf.mxu0  ;;  %v2198_v38 = vpop.f32.mrf.mxu1 }
 0x5b5   :  { %v2124_v40 = vadd.f32 %v4315_v49, %v2123_v36  ;;  %v2199_v8 = vadd.f32 %v4320_v31, %v2198_v38  ;;  %v2025_v31 = vadd.f32 %v4363_v21, %v2024_v57 }
 0x5b6   :  { %3196 = vmatmul.msk.f32.gmra.mxu2 %vm57_vm1, %v2016_v34  ;;  %v4434_v49 = vpop.f32.mrf.mxu2  ;;  %v2039_v43 = vpop.f32.mrf.mxu3 }
 0x5b7   :  { %3200 = vmatpush.xpose.msk.msra.mxu3 %vm57_vm1, %v2124_v40  ;;  %2620 = vmatpush.msrb.mxu1 %v2199_v8  ;;  %v2040_v27 = vadd.f32 %v4363_v21, %v2039_v43 }
 0x5b9   :  { %2621 = vmatpush.msrb.mxu1 %v2196_v50 }
 0x5bb   :  { %3201 = vmatpush.xpose.msk.msra.mxu3 %vm57_vm1, %v2121_v45  ;;  %2622 = vmatpush.msrb.mxu1 %v2193_v35 }
 0x5bd   :  { %2623 = vmatpush.msrb.mxu1 %v2190_v56 }
 0x5be   :  { %3197 = vmatmul.msk.f32.gmra.mxu2 %vm57_vm1, %v2019_v42  ;;  %v4438_v33 = vpop.f32.mrf.mxu2  ;;  %v2042_v52 = vpop.f32.mrf.mxu3 }
 0x5bf   :  { %3202 = vmatpush.xpose.msk.msra.mxu3 %vm57_vm1, %v2118_v61  ;;  %2624 = vmatpush.msrb.mxu1 %v2187_v59  ;;  %v2043_v34 = vadd.f32 %v4363_v21, %v2042_v52 }
 0x5c1   :  { %2625 = vmatpush.msrb.mxu1 %v2184_v0 }
 0x5c3   :  { %3203 = vmatpush.xpose.msk.msra.mxu3 %vm57_vm1, %v2115_v41  ;;  %2626 = vmatpush.msrb.mxu1 %v2181_v5 }
 0x5c5   :  { %2627 = vmatpush.msrb.mxu1 %v2178_v10 }
 0x5c6   :  { %3198 = vmatmul.msk.f32.gmra.mxu2 %vm57_vm1, %v2022_v39  ;;  %v4443_v36 = vpop.f32.mrf.mxu2  ;;  %v2045_v38 = vpop.f32.mrf.mxu3 }
 0x5c7   :  { %3204 = vmatpush.xpose.msk.msra.mxu3 %vm57_vm1, %v2112_v18  ;;  %v2046_v40 = vadd.f32 %v4363_v21, %v2045_v38 }
 0x5cb   :  { %3205 = vmatpush.xpose.msk.msra.mxu3 %vm57_vm1, %v2109_v62 }
 0x5ce   :  { %3199 = vmatmul.msk.f32.gmra.mxu2 %vm57_vm1, %v2025_v31  ;;  %v4448_v8 = vpop.f32.mrf.mxu2  ;;  %v2048_v50 = vpop.f32.mrf.mxu3 }
 0x5cf   :  { %3206 = vmatpush.xpose.msk.msra.mxu3 %vm57_vm1, %v2106_v46  ;;  %v2049_v57 = vadd.f32 %v4363_v21, %v2048_v50 }
 0x5d3   :  { %3207 = vmatpush.xpose.msk.msra.mxu3 %vm57_vm1, %v2103_v14 }
 0x5d6   :  { %3208 = vmatmul.msk.f32.vlgmr.msra.gmra.mxu3 %vm57_vm1, %v2028_v63  ;;  %v4452_v35 = vpop.f32.mrf.mxu2 }
 0x5de   :  { %3209 = vmatmul.msk.f32.gmra.mxu3 %vm57_vm1, %v2031_v28 }
 0x5e6   :  { %3210 = vmatmul.msk.f32.gmra.mxu3 %vm57_vm1, %v2034_v15 }
 0x5ee   :  { %3211 = vmatmul.msk.f32.gmra.mxu3 %vm57_vm1, %v2037_v30 }
 0x5f6   :  { %3212 = vmatmul.msk.f32.gmra.mxu3 %vm57_vm1, %v2040_v27 }
 0x5fe   :  { %3213 = vmatmul.msk.f32.gmra.mxu3 %vm57_vm1, %v2043_v34 }
 0x606   :  { %3214 = vmatmul.msk.f32.gmra.mxu3 %vm57_vm1, %v2046_v40 }
 0x60e   :  { %3215 = vmatmul.msk.f32.gmra.mxu3 %vm57_vm1, %v2049_v57 }
 0x619   :  { %v2266_v45 = vpop.f32.mrf.mxu2 }
 0x61a   :  { %v2379_v56 = vsel %vm499_vm2, %v2266_v45, -inf }
 0x61b   :  { %2380 = vmax.xlane.f32.xlu1 %v2379_v56 }
 0x621   :  { %v2269_v42 = vpop.f32.mrf.mxu2 }
 0x622   :  { %v2382_v59 = vsel %vm499_vm2, %v2269_v42, -inf }
 0x623   :  { %2383 = vmax.xlane.f32.xlu2 %v2382_v59 }
 0x629   :  { %v2272_v61 = vpop.f32.mrf.mxu2 }
 0x62a   :  { %v2385_v0 = vsel %vm499_vm2, %v2272_v61, -inf }
 0x62b   :  { %2386 = vmax.xlane.f32.xlu0 %v2385_v0 }
 0x631   :  { %v2275_v5 = vpop.f32.mrf.mxu2 }
 0x632   :  { %v2388_v41 = vsel %vm499_vm2, %v2275_v5, -inf }
 0x633   :  { %2389 = vmax.xlane.f32.xlu1 %v2388_v41 }
 0x639   :  { %v4458_v21 = vpop.f32.mrf.mxu2 }
 0x63a   :  { %v2391_v10 = vsel %vm499_vm2, %v4458_v21, -inf }
 0x63b   :  { %2392 = vmax.xlane.f32.xlu2 %v2391_v10 }
 0x641   :  { %v4462_v44 = vpop.f32.mrf.mxu2 }
 0x642   :  { %v2394_v39 = vsel %vm499_vm2, %v4462_v44, -inf }
 0x643   :  { %2395 = vmax.xlane.f32.xlu0 %v2394_v39 }
 0x649   :  { %v4466_v18 = vpop.f32.mrf.mxu2 }
 0x64a   :  { %v2397_v62 = vsel %vm499_vm2, %v4466_v18, -inf }
 0x64b   :  { %2398 = vmax.xlane.f32.xlu1 %v2397_v62 }
 0x651   :  { %v4470_v31 = vpop.f32.mrf.mxu2 }
 0x652   :  { %v2400_v46 = vsel %vm499_vm2, %v4470_v31, -inf }
 0x653   :  { %2401 = vmax.xlane.f32.xlu2 %v2400_v46 }
 0x659   :  { %v4474_v23 = vpop.f32.mrf.mxu3 }
 0x65a   :  { %v2403_v14 = vsel %vm499_vm2, %v4474_v23, -inf }
 0x65b   :  { %2404 = vmax.xlane.f32.xlu0 %v2403_v14 }
 0x661   :  { %v4478_v63 = vpop.f32.mrf.mxu3 }
 0x662   :  { %v2406_v6 = vsel %vm499_vm2, %v4478_v63, -inf }
 0x663   :  { %2407 = vmax.xlane.f32.xlu1 %v2406_v6 }
 0x669   :  { %v4482_v28 = vpop.f32.mrf.mxu3 }
 0x66a   :  { %v2409_v29 = vsel %vm499_vm2, %v4482_v28, -inf }
 0x66b   :  { %2410 = vmax.xlane.f32.xlu2 %v2409_v29 }
 0x671   :  { %v4486_v15 = vpop.f32.mrf.mxu3 }
 0x672   :  { %v2412_v43 = vsel %vm499_vm2, %v4486_v15, -inf }
 0x673   :  { %2413 = vmax.xlane.f32.xlu0 %v2412_v43 }
 0x679   :  { %v4490_v30 = vpop.f32.mrf.mxu3 }
 0x67a   :  { %v2415_v27 = vsel %vm499_vm2, %v4490_v30, -inf }
 0x67b   :  { %2416 = vmax.xlane.f32.xlu1 %v2415_v27 }
 0x681   :  { %v4494_v52 = vpop.f32.mrf.mxu3 }
 0x682   :  { %v2418_v34 = vsel %vm499_vm2, %v4494_v52, -inf }
 0x683   :  { %2419 = vmax.xlane.f32.xlu2 %v2418_v34 }
 0x689   :  { %v4498_v38 = vpop.f32.mrf.mxu3 }
 0x68a   :  { %v2421_v40 = vsel %vm499_vm2, %v4498_v38, -inf }
 0x68b   :  { %2422 = vmax.xlane.f32.xlu0 %v2421_v40 }
 0x68e   :  { %v2381_v50 = vpop.xlane.xlu1 %2380 }
 0x68f   :  { %v2427_v57 = vsub.f32 %v2266_v45, %v2381_v50 }
 0x691   :  { %v2443_v56 = vmul.f32 1.442695, %v2427_v57  ;;  %v4502_v59 = vpop.f32.mrf.mxu3 }
 0x692   :  { %v2424_v0 = vsel %vm499_vm2, %v4502_v59, -inf }
 0x693   :  { %3389 = vpow2.f32 %v2443_v56  ;;  %2425 = vmax.xlane.f32.xlu1 %v2424_v0 }
 0x696   :  { %v2384_v41 = vpop.xlane.xlu2 %2383 }
 0x697   :  { %v2428_v10 = vsub.f32 %v2269_v42, %v2384_v41 }
 0x699   :  { %v3390_v39 = vpop.eup %3389  ;;  %v2445_v62 = vmul.f32 1.442695, %v2428_v10 }
 0x69a   :  { %3216 = vmatmul.msk.f32.vlgmr.msrb.gmra.mxu0 %vm499_vm2, %v3390_v39  ;;  %v2475_v46 = vsel %vm499_vm2, %v3390_v39, 0.0 }
 0x69b   :  { %3391 = vpow2.f32 %v2445_v62  ;;  %2476 = vadd.xlane.f32.xlu2 %v2475_v46 }
 0x69e   :  { %v2387_v14 = vpop.xlane.xlu0 %2386 }
 0x69f   :  { %v2429_v45 = vsub.f32 %v2272_v61, %v2387_v14 }
 0x6a1   :  { %v3392_v6 = vpop.eup %3391  ;;  %v2447_v29 = vmul.f32 1.442695, %v2429_v45 }
 0x6a2   :  { %3217 = vmatmul.msk.f32.gmra.mxu0 %vm499_vm2, %v3392_v6  ;;  %v2478_v43 = vsel %vm499_vm2, %v3392_v6, 0.0 }
 0x6a3   :  { %3393 = vpow2.f32 %v2447_v29  ;;  %2479 = vadd.xlane.f32.xlu0 %v2478_v43 }
 0x6a6   :  { %v2390_v27 = vpop.xlane.xlu1 %2389 }
 0x6a7   :  { %v2430_v42 = vsub.f32 %v2275_v5, %v2390_v27 }
 0x6a9   :  { %v3394_v34 = vpop.eup %3393  ;;  %v2449_v40 = vmul.f32 1.442695, %v2430_v42 }
 0x6aa   :  { %3218 = vmatmul.msk.f32.gmra.mxu0 %vm499_vm2, %v3394_v34  ;;  %v2481_v50 = vsel %vm499_vm2, %v3394_v34, 0.0 }
 0x6ab   :  { %3395 = vpow2.f32 %v2449_v40  ;;  %2482 = vadd.xlane.f32.xlu1 %v2481_v50 }
 0x6ae   :  { %v2393_v57 = vpop.xlane.xlu2 %2392 }
 0x6af   :  { %v2431_v61 = vsub.f32 %v4458_v21, %v2393_v57 }
 0x6b1   :  { %v3396_v56 = vpop.eup %3395  ;;  %v2451_v0 = vmul.f32 1.442695, %v2431_v61 }
 0x6b2   :  { %3219 = vmatmul.msk.f32.gmra.mxu0 %vm499_vm2, %v3396_v56  ;;  %v2484_v41 = vsel %vm499_vm2, %v3396_v56, 0.0 }
 0x6b3   :  { %3397 = vpow2.f32 %v2451_v0  ;;  %2485 = vadd.xlane.f32.xlu2 %v2484_v41 }
 0x6b6   :  { %v2396_v5 = vpop.xlane.xlu0 %2395 }
 0x6b7   :  { %v2432_v10 = vsub.f32 %v4462_v44, %v2396_v5 }
 0x6b9   :  { %v3398_v39 = vpop.eup %3397  ;;  %v2453_v62 = vmul.f32 1.442695, %v2432_v10 }
 0x6ba   :  { %3220 = vmatmul.msk.f32.gmra.mxu0 %vm499_vm2, %v3398_v39  ;;  %v2487_v46 = vsel %vm499_vm2, %v3398_v39, 0.0 }
 0x6bb   :  { %3399 = vpow2.f32 %v2453_v62  ;;  %2488 = vadd.xlane.f32.xlu0 %v2487_v46 }
 0x6be   :  { %v2399_v21 = vpop.xlane.xlu1 %2398 }
 0x6bf   :  { %v2433_v14 = vsub.f32 %v4466_v18, %v2399_v21 }
 0x6c1   :  { %v3400_v45 = vpop.eup %3399  ;;  %v2455_v6 = vmul.f32 1.442695, %v2433_v14 }
 0x6c2   :  { %3221 = vmatmul.msk.f32.gmra.mxu0 %vm499_vm2, %v3400_v45  ;;  %v2490_v29 = vsel %vm499_vm2, %v3400_v45, 0.0 }
 0x6c3   :  { %3401 = vpow2.f32 %v2455_v6  ;;  %2491 = vadd.xlane.f32.xlu1 %v2490_v29 }
 0x6c6   :  { %v2402_v44 = vpop.xlane.xlu2 %2401 }
 0x6c7   :  { %v2434_v43 = vsub.f32 %v4470_v31, %v2402_v44 }
 0x6c9   :  { %v3402_v27 = vpop.eup %3401  ;;  %v2457_v42 = vmul.f32 1.442695, %v2434_v43 }
 0x6ca   :  { %3222 = vmatmul.msk.f32.gmra.mxu0 %vm499_vm2, %v3402_v27  ;;  %v2493_v34 = vsel %vm499_vm2, %v3402_v27, 0.0 }
 0x6cb   :  { %3403 = vpow2.f32 %v2457_v42  ;;  %2494 = vadd.xlane.f32.xlu2 %v2493_v34 }
 0x6ce   :  { %v2405_v18 = vpop.xlane.xlu0 %2404 }
 0x6cf   :  { %v2435_v40 = vsub.f32 %v4474_v23, %v2405_v18 }
 0x6d1   :  { %v3404_v50 = vpop.eup %3403  ;;  %v2459_v57 = vmul.f32 1.442695, %v2435_v40 }
 0x6d2   :  { %3223 = vmatmul.msk.f32.gmra.mxu0 %vm499_vm2, %v3404_v50  ;;  %v2496_v61 = vsel %vm499_vm2, %v3404_v50, 0.0 }
 0x6d3   :  { %3405 = vpow2.f32 %v2459_v57  ;;  %2497 = vadd.xlane.f32.xlu0 %v2496_v61 }
 0x6d6   :  { %v2408_v31 = vpop.xlane.xlu1 %2407 }
 0x6d7   :  { %v2436_v56 = vsub.f32 %v4478_v63, %v2408_v31 }
 0x6d9   :  { %v3406_v0 = vpop.eup %3405  ;;  %v2461_v41 = vmul.f32 1.442695, %v2436_v56 }
 0x6da   :  { %3224 = vmatmul.msk.f32.vlgmr.msrb.gmra.mxu1 %vm499_vm2, %v3406_v0  ;;  %v2499_v5 = vsel %vm499_vm2, %v3406_v0, 0.0 }
 0x6db   :  { %3407 = vpow2.f32 %v2461_v41  ;;  %2500 = vadd.xlane.f32.xlu1 %v2499_v5 }
 0x6de   :  { %v2411_v23 = vpop.xlane.xlu2 %2410 }
 0x6df   :  { %v2437_v10 = vsub.f32 %v4482_v28, %v2411_v23 }
 0x6e1   :  { %v3408_v39 = vpop.eup %3407  ;;  %v2463_v62 = vmul.f32 1.442695, %v2437_v10 }
 0x6e2   :  { %3225 = vmatmul.msk.f32.gmra.mxu1 %vm499_vm2, %v3408_v39  ;;  %v2502_v46 = vsel %vm499_vm2, %v3408_v39, 0.0 }
 0x6e3   :  { %3409 = vpow2.f32 %v2463_v62  ;;  %2503 = vadd.xlane.f32.xlu2 %v2502_v46 }
 0x6e6   :  { %v2414_v63 = vpop.xlane.xlu0 %2413 }
 0x6e7   :  { %v2438_v21 = vsub.f32 %v4486_v15, %v2414_v63 }
 0x6e9   :  { %v3410_v14 = vpop.eup %3409  ;;  %v2465_v45 = vmul.f32 1.442695, %v2438_v21 }
 0x6ea   :  { %3226 = vmatmul.msk.f32.gmra.mxu1 %vm499_vm2, %v3410_v14  ;;  %v2505_v6 = vsel %vm499_vm2, %v3410_v14, 0.0 }
 0x6eb   :  { %3411 = vpow2.f32 %v2465_v45  ;;  %2506 = vadd.xlane.f32.xlu0 %v2505_v6 }
 0x6ee   :  { %v2417_v28 = vpop.xlane.xlu1 %2416 }
 0x6ef   :  { %v2439_v29 = vsub.f32 %v4490_v30, %v2417_v28  ;;  %v3232_v30 = vld [vmem:[%s4694_s7 + $0x8] sm:$0xf] }
 0x6f0   :  { %3233 = vmatpush.msk.msrb.mxu2 %vm106_vm0, %v3232_v30 }
 0x6f1   :  { %v3412_v44 = vpop.eup %3411  ;;  %v2467_v43 = vmul.f32 1.442695, %v2439_v29 }
 0x6f2   :  { %3227 = vmatmul.msk.f32.gmra.mxu1 %vm499_vm2, %v3412_v44  ;;  %v2508_v27 = vsel %vm499_vm2, %v3412_v44, 0.0 }
 0x6f3   :  { %3413 = vpow2.f32 %v2467_v43  ;;  %2509 = vadd.xlane.f32.xlu1 %v2508_v27 }
 0x6f6   :  { %v2420_v15 = vpop.xlane.xlu2 %2419 }
 0x6f7   :  { %v2440_v42 = vsub.f32 %v4494_v52, %v2420_v15 }
 0x6f9   :  { %v3414_v34 = vpop.eup %3413  ;;  %v2469_v18 = vmul.f32 1.442695, %v2440_v42 }
 0x6fa   :  { %3228 = vmatmul.msk.f32.gmra.mxu1 %vm499_vm2, %v3414_v34  ;;  %v2511_v40 = vsel %vm499_vm2, %v3414_v34, 0.0 }
 0x6fb   :  { %3415 = vpow2.f32 %v2469_v18  ;;  %2512 = vadd.xlane.f32.xlu2 %v2511_v40 }
 0x6fe   :  { %v2423_v50 = vpop.xlane.xlu0 %2422 }
 0x6ff   :  { %v2441_v57 = vsub.f32 %v4498_v38, %v2423_v50 }
 0x701   :  { %v3416_v61 = vpop.eup %3415  ;;  %v2471_v31 = vmul.f32 1.442695, %v2441_v57 }
 0x702   :  { %3229 = vmatmul.msk.f32.gmra.mxu1 %vm499_vm2, %v3416_v61  ;;  %v2514_v52 = vsel %vm499_vm2, %v3416_v61, 0.0 }
 0x703   :  { %3417 = vpow2.f32 %v2471_v31  ;;  %2515 = vadd.xlane.f32.xlu0 %v2514_v52 }
 0x706   :  { %v2426_v56 = vpop.xlane.xlu1 %2425 }
 0x707   :  { %v2442_v0 = vsub.f32 %v4502_v59, %v2426_v56 }
 0x709   :  { %v3418_v41 = vpop.eup %3417  ;;  %v2473_v5 = vmul.f32 1.442695, %v2442_v0 }
 0x70a   :  { %3230 = vmatmul.msk.f32.gmra.mxu1 %vm499_vm2, %v3418_v41  ;;  %v2517_v23 = vsel %vm499_vm2, %v3418_v41, 0.0 }
 0x70b   :  { %3419 = vpow2.f32 %v2473_v5  ;;  %2518 = vadd.xlane.f32.xlu1 %v2517_v23 }
 0x70e   :  { %v2477_v38 = vpop.xlane.xlu2 %2476 }
 0x70f   :  { %3421 = vrcp.f32 %v2477_v38 }
 0x711   :  { %v3420_v10 = vpop.eup %3419 }
 0x712   :  { %3231 = vmatmul.msk.f32.gmra.mxu1 %vm499_vm2, %v3420_v10  ;;  %v2520_v39 = vsel %vm499_vm2, %v3420_v10, 0.0 }
 0x713   :  { %2521 = vadd.xlane.f32.xlu2 %v2520_v39 }
 0x715   :  { %v3422_v46 = vpop.eup %3421 }
 0x716   :  { %v2480_v62 = vpop.xlane.xlu0 %2479 }
 0x717   :  { %v2564_v63 = vpop.f32.mrf.mxu0  ;;  %3423 = vrcp.f32 %v2480_v62 }
 0x718   :  { %v2669_v59 = vmul.f32 %v3422_v46, %v2564_v63 }
 0x71a   :  { %v2685_v21 = vmax.f32 %v2669_v59, 0.0 }
 0x71c   :  { %3234 = vmatmul.msk.f32.vlgmr.msrb.gmra.mxu2 %vm57_vm1, %v2685_v21 }
 0x71d   :  { %v3424_v45 = vpop.eup %3423 }
 0x71e   :  { %v2483_v14 = vpop.xlane.xlu1 %2482 }
 0x71f   :  { %v2567_v6 = vpop.f32.mrf.mxu0  ;;  %3425 = vrcp.f32 %v2483_v14 }
 0x720   :  { %v2670_v28 = vmul.f32 %v3424_v45, %v2567_v6 }
 0x722   :  { %v2686_v29 = vmax.f32 %v2670_v28, 0.0 }
 0x724   :  { %3235 = vmatmul.msk.f32.gmra.mxu2 %vm57_vm1, %v2686_v29 }
 0x725   :  { %v3426_v43 = vpop.eup %3425 }
 0x726   :  { %v2486_v44 = vpop.xlane.xlu2 %2485 }
 0x727   :  { %v2570_v27 = vpop.f32.mrf.mxu0  ;;  %3427 = vrcp.f32 %v2486_v44 }
 0x728   :  { %v2671_v15 = vmul.f32 %v3426_v43, %v2570_v27 }
 0x72a   :  { %v2687_v42 = vmax.f32 %v2671_v15, 0.0 }
 0x72c   :  { %3236 = vmatmul.msk.f32.gmra.mxu2 %vm57_vm1, %v2687_v42 }
 0x72d   :  { %v3428_v18 = vpop.eup %3427 }
 0x72e   :  { %v2489_v34 = vpop.xlane.xlu0 %2488 }
 0x72f   :  { %v2573_v40 = vpop.f32.mrf.mxu0  ;;  %3429 = vrcp.f32 %v2489_v34 }
 0x730   :  { %v2672_v30 = vmul.f32 %v3428_v18, %v2573_v40 }
 0x732   :  { %v2688_v50 = vmax.f32 %v2672_v30, 0.0 }
 0x734   :  { %3237 = vmatmul.msk.f32.gmra.mxu2 %vm57_vm1, %v2688_v50 }
 0x735   :  { %v3430_v61 = vpop.eup %3429 }
 0x736   :  { %v2492_v57 = vpop.xlane.xlu1 %2491 }
 0x737   :  { %v2576_v31 = vpop.f32.mrf.mxu0  ;;  %3431 = vrcp.f32 %v2492_v57 }
 0x738   :  { %v2673_v52 = vmul.f32 %v3430_v61, %v2576_v31 }
 0x73a   :  { %v2689_v56 = vmax.f32 %v2673_v52, 0.0 }
 0x73c   :  { %3238 = vmatmul.msk.f32.gmra.mxu2 %vm57_vm1, %v2689_v56 }
 0x73d   :  { %v3432_v41 = vpop.eup %3431 }
 0x73e   :  { %v2495_v0 = vpop.xlane.xlu2 %2494 }
 0x73f   :  { %v2579_v5 = vpop.f32.mrf.mxu0  ;;  %3433 = vrcp.f32 %v2495_v0 }
 0x740   :  { %v2674_v23 = vmul.f32 %v3432_v41, %v2579_v5 }
 0x742   :  { %v2690_v38 = vmax.f32 %v2674_v23, 0.0 }
 0x744   :  { %3239 = vmatmul.msk.f32.gmra.mxu2 %vm57_vm1, %v2690_v38 }
 0x745   :  { %v3434_v39 = vpop.eup %3433 }
 0x746   :  { %v2498_v10 = vpop.xlane.xlu0 %2497 }
 0x747   :  { %v2582_v62 = vpop.f32.mrf.mxu0  ;;  %3435 = vrcp.f32 %v2498_v10 }
 0x748   :  { %v2675_v46 = vmul.f32 %v3434_v39, %v2582_v62 }
 0x74a   :  { %v2691_v63 = vmax.f32 %v2675_v46, 0.0 }
 0x74c   :  { %3240 = vmatmul.msk.f32.gmra.mxu2 %vm57_vm1, %v2691_v63 }
 0x74d   :  { %v3436_v21 = vpop.eup %3435 }
 0x74e   :  { %v2501_v59 = vpop.xlane.xlu1 %2500 }
 0x74f   :  { %v2585_v14 = vpop.f32.mrf.mxu0  ;;  %3437 = vrcp.f32 %v2501_v59 }
 0x750   :  { %v2676_v45 = vmul.f32 %v3436_v21, %v2585_v14 }
 0x752   :  { %v2692_v6 = vmax.f32 %v2676_v45, 0.0 }
 0x754   :  { %3241 = vmatmul.msk.f32.gmra.mxu2 %vm57_vm1, %v2692_v6 }
 0x755   :  { %v3438_v29 = vpop.eup %3437 }
 0x756   :  { %v2504_v28 = vpop.xlane.xlu2 %2503 }
 0x757   :  { %v2629_v44 = vpop.f32.mrf.mxu1  ;;  %3439 = vrcp.f32 %v2504_v28 }
 0x758   :  { %v2677_v43 = vmul.f32 %v3438_v29, %v2629_v44 }
 0x75a   :  { %v2693_v27 = vmax.f32 %v2677_v43, 0.0 }
 0x75c   :  { %3242 = vmatmul.msk.f32.gmra.mxu2 %vm57_vm1, %v2693_v27 }
 0x75d   :  { %v3440_v42 = vpop.eup %3439 }
 0x75e   :  { %v2507_v15 = vpop.xlane.xlu0 %2506 }
 0x75f   :  { %v2632_v34 = vpop.f32.mrf.mxu1  ;;  %3441 = vrcp.f32 %v2507_v15 }
 0x760   :  { %v2678_v18 = vmul.f32 %v3440_v42, %v2632_v34  ;;  %v4573_v34 = vld [vmem:[%s4695_s8] ss:$0 sm:$0xff] }
 0x762   :  { %v2694_v40 = vmax.f32 %v2678_v18, 0.0  ;;  %v939_v18 = vadd.f32 %v4573_v34, %v3961_v51  ;;  %v941_v51 = vadd.f32 %v4573_v34, %v3994_v7  ;;  %v943_v7 = vadd.f32 %v4573_v34, %v4011_v13 }
 0x763   :  { %v945_v13 = vadd.f32 %v4573_v34, %v4023_v19  ;;  %v947_v19 = vadd.f32 %v4573_v34, %v4055_v58  ;;  %v949_v58 = vadd.f32 %v4573_v34, %v4076_v3  ;;  %v951_v3 = vadd.f32 %v4573_v34, %v4084_v9 }
 0x764   :  { %3243 = vmatmul.msk.f32.gmra.mxu2 %vm57_vm1, %v2694_v40  ;;  %v1879_v40 = vadd.f32 %v4328_v55, %v939_v18  ;;  %v1881_v55 = vadd.f32 %v4357_v4, %v941_v51  ;;  %v1883_v4 = vadd.f32 %v4373_v47, %v943_v7  ;;  %v953_v9 = vadd.f32 %v4573_v34, %v4094_v22 }
 0x765   :  { %v3442_v50 = vpop.eup %3441  ;;  %v1885_v47 = vadd.f32 %v4385_v48, %v945_v13  ;;  %v1887_v48 = vadd.f32 %v4413_v20, %v947_v19  ;;  %v1889_v20 = vadd.f32 %v4430_v54, %v949_v58  ;;  %v1891_v54 = vadd.f32 %v4438_v33, %v951_v3 }
 0x766   :  { %v2510_v30 = vpop.xlane.xlu1 %2509  ;;  %v1893_v33 = vadd.f32 %v4448_v8, %v953_v9 }
 0x767   :  { %v2635_v57 = vpop.f32.mrf.mxu1  ;;  %3443 = vrcp.f32 %v2510_v30 }
 0x768   :  { %v2679_v61 = vmul.f32 %v3442_v50, %v2635_v57  ;;  %v940_v57 = vadd.f32 %v4573_v34, %v3984_v1  ;;  %v942_v1 = vadd.f32 %v4573_v34, %v4007_v11  ;;  %v944_v11 = vadd.f32 %v4573_v34, %v4016_v32 }
 0x769   :  { %v946_v32 = vadd.f32 %v4573_v34, %v4037_v26  ;;  %v948_v26 = vadd.f32 %v4573_v34, %v4071_v60  ;;  %v950_v60 = vadd.f32 %v4573_v34, %v4080_v53  ;;  %v952_v53 = vadd.f32 %v4573_v34, %v4089_v16 }
 0x76a   :  { %v2695_v31 = vmax.f32 %v2679_v61, 0.0  ;;  %v1880_v61 = vadd.f32 %v4348_v37, %v940_v57  ;;  %v1882_v37 = vadd.f32 %v4369_v12, %v942_v1  ;;  %v1884_v12 = vadd.f32 %v4378_v17, %v944_v11 }
 0x76b   :  { %v1886_v17 = vadd.f32 %v4399_v2, %v946_v32  ;;  %v1888_v2 = vadd.f32 %v4425_v24, %v948_v26  ;;  %v1890_v24 = vadd.f32 %v4434_v49, %v950_v60  ;;  %v1892_v49 = vadd.f32 %v4443_v36, %v952_v53 }
 0x76c   :  { %3244 = vmatmul.msk.f32.gmra.mxu2 %vm57_vm1, %v2695_v31  ;;  %v954_v16 = vadd.f32 %v4573_v34, %v4098_v25 }
 0x76d   :  { %v3444_v56 = vpop.eup %3443 }
 0x76e   :  { %v2513_v52 = vpop.xlane.xlu2 %2512  ;;  %v1894_v36 = vadd.f32 %v4452_v35, %v954_v16 }
 0x76f   :  { %v2638_v0 = vpop.f32.mrf.mxu1  ;;  %3445 = vrcp.f32 %v2513_v52 }
 0x770   :  { %v2680_v41 = vmul.f32 %v3444_v56, %v2638_v0 }
 0x772   :  { %v2696_v5 = vmax.f32 %v2680_v41, 0.0 }
 0x774   :  { %3245 = vmatmul.msk.f32.gmra.mxu2 %vm57_vm1, %v2696_v5 }
 0x775   :  { %v3446_v38 = vpop.eup %3445 }
 0x776   :  { %v2516_v23 = vpop.xlane.xlu0 %2515 }
 0x777   :  { %v2641_v10 = vpop.f32.mrf.mxu1  ;;  %3447 = vrcp.f32 %v2516_v23 }
 0x778   :  { %v2681_v39 = vmul.f32 %v3446_v38, %v2641_v10 }
 0x77a   :  { %v2697_v62 = vmax.f32 %v2681_v39, 0.0 }
 0x77c   :  { %3246 = vmatmul.msk.f32.gmra.mxu2 %vm57_vm1, %v2697_v62 }
 0x77d   :  { %v3448_v63 = vpop.eup %3447 }
 0x77e   :  { %v2519_v46 = vpop.xlane.xlu1 %2518 }
 0x77f   :  { %v2644_v59 = vpop.f32.mrf.mxu1  ;;  %3449 = vrcp.f32 %v2519_v46 }
 0x780   :  { %v2682_v21 = vmul.f32 %v3448_v63, %v2644_v59 }
 0x782   :  { %v2698_v14 = vmax.f32 %v2682_v21, 0.0 }
 0x784   :  { %3247 = vmatmul.msk.f32.gmra.mxu2 %vm57_vm1, %v2698_v14 }
 0x785   :  { %v3450_v6 = vpop.eup %3449 }
 0x786   :  { %v2522_v45 = vpop.xlane.xlu2 %2521 }
 0x787   :  { %v2647_v28 = vpop.f32.mrf.mxu1  ;;  %3451 = vrcp.f32 %v2522_v45 }
 0x788   :  { %v2683_v29 = vmul.f32 %v3450_v6, %v2647_v28 }
 0x78a   :  { %v2699_v44 = vmax.f32 %v2683_v29, 0.0 }
 0x78c   :  { %3248 = vmatmul.msk.f32.gmra.mxu2 %vm57_vm1, %v2699_v44 }
 0x78d   :  { %v3452_v43 = vpop.eup %3451 }
 0x78f   :  { %v2650_v27 = vpop.f32.mrf.mxu1 }
 0x790   :  { %v2684_v15 = vmul.f32 %v3452_v43, %v2650_v27 }
 0x792   :  { %v2700_v42 = vmax.f32 %v2684_v15, 0.0 }
 0x794   :  { %3249 = vmatmul.msk.f32.gmra.mxu2 %vm57_vm1, %v2700_v42 }
 0x79f   :  { %v2771_v30 = vpop.f32.mrf.mxu2 }
 0x7a0   :  { %v2819_v50 = vadd.f32 %v2771_v30, %v1879_v40 }
 0x7a2   :  { %2836 = vst.msk [vmem:[%s4696_s9] sm:$0xff] %vm2835_vm3, %v2819_v50 }
 0x7a7   :  { %v2774_v31 = vpop.f32.mrf.mxu2 }
 0x7a8   :  { %v2820_v52 = vadd.f32 %v2774_v31, %v1880_v61 }
 0x7aa   :  { %2837 = vst.msk [vmem:[%s4696_s9 + $0x8] sm:$0xff] %vm2835_vm3, %v2820_v52 }
 0x7af   :  { %v2777_v56 = vpop.f32.mrf.mxu2 }
 0x7b0   :  { %v2821_v0 = vadd.f32 %v2777_v56, %v1881_v55 }
 0x7b2   :  { %2838 = vst.msk [vmem:[%s4696_s9 + $0x10] sm:$0xff] %vm2835_vm3, %v2821_v0 }
 0x7b7   :  { %v2780_v41 = vpop.f32.mrf.mxu2 }
 0x7b8   :  { %v2822_v5 = vadd.f32 %v2780_v41, %v1882_v37 }
 0x7ba   :  { %2839 = vst.msk [vmem:[%s4696_s9 + $0x18] sm:$0xff] %vm2835_vm3, %v2822_v5 }
 0x7bf   :  { %v2783_v23 = vpop.f32.mrf.mxu2 }
 0x7c0   :  { %v2823_v38 = vadd.f32 %v2783_v23, %v1883_v4 }
 0x7c2   :  { %2840 = vst.msk [vmem:[%s4696_s9 + $0x20] sm:$0xff] %vm2835_vm3, %v2823_v38 }
 0x7c7   :  { %v2786_v10 = vpop.f32.mrf.mxu2 }
 0x7c8   :  { %v2824_v39 = vadd.f32 %v2786_v10, %v1884_v12 }
 0x7ca   :  { %2841 = vst.msk [vmem:[%s4696_s9 + $0x28] sm:$0xff] %vm2835_vm3, %v2824_v39 }
 0x7cf   :  { %v2789_v62 = vpop.f32.mrf.mxu2 }
 0x7d0   :  { %v2825_v46 = vadd.f32 %v2789_v62, %v1885_v47 }
 0x7d2   :  { %2842 = vst.msk [vmem:[%s4696_s9 + $0x30] sm:$0xff] %vm2835_vm3, %v2825_v46 }
 0x7d7   :  { %v2792_v63 = vpop.f32.mrf.mxu2 }
 0x7d8   :  { %v2826_v59 = vadd.f32 %v2792_v63, %v1886_v17 }
 0x7da   :  { %2843 = vst.msk [vmem:[%s4696_s9 + $0x38] sm:$0xff] %vm2835_vm3, %v2826_v59 }
 0x7df   :  { %v2795_v21 = vpop.f32.mrf.mxu2 }
 0x7e0   :  { %v2827_v14 = vadd.f32 %v2795_v21, %v1887_v48 }
 0x7e2   :  { %2844 = vst.msk [vmem:[%s4696_s9 + $0x40] sm:$0xff] %vm2835_vm3, %v2827_v14 }
 0x7e7   :  { %v2798_v45 = vpop.f32.mrf.mxu2 }
 0x7e8   :  { %v2828_v6 = vadd.f32 %v2798_v45, %v1888_v2 }
 0x7ea   :  { %2845 = vst.msk [vmem:[%s4696_s9 + $0x48] sm:$0xff] %vm2835_vm3, %v2828_v6 }
 0x7ef   :  { %v2801_v28 = vpop.f32.mrf.mxu2 }
 0x7f0   :  { %v2829_v29 = vadd.f32 %v2801_v28, %v1889_v20 }
 0x7f2   :  { %2846 = vst.msk [vmem:[%s4696_s9 + $0x50] sm:$0xff] %vm2835_vm3, %v2829_v29 }
 0x7f7   :  { %v2804_v44 = vpop.f32.mrf.mxu2 }
 0x7f8   :  { %v2830_v43 = vadd.f32 %v2804_v44, %v1890_v24 }
 0x7fa   :  { %2847 = vst.msk [vmem:[%s4696_s9 + $0x58] sm:$0xff] %vm2835_vm3, %v2830_v43 }
 0x7ff   :  { %v2807_v27 = vpop.f32.mrf.mxu2 }
 0x800   :  { %v2831_v15 = vadd.f32 %v2807_v27, %v1891_v54 }
 0x802   :  { %2848 = vst.msk [vmem:[%s4696_s9 + $0x60] sm:$0xff] %vm2835_vm3, %v2831_v15 }
 0x807   :  { %v2810_v42 = vpop.f32.mrf.mxu2 }
 0x808   :  { %v2832_v18 = vadd.f32 %v2810_v42, %v1892_v49 }
 0x80a   :  { %2849 = vst.msk [vmem:[%s4696_s9 + $0x68] sm:$0xff] %vm2835_vm3, %v2832_v18 }
 0x80f   :  { %v2813_v40 = vpop.f32.mrf.mxu2 }
 0x810   :  { %v2833_v30 = vadd.f32 %v2813_v40, %v1893_v33 }
 0x812   :  { %2850 = vst.msk [vmem:[%s4696_s9 + $0x70] sm:$0xff] %vm2835_vm3, %v2833_v30 }
 0x817   :  { %v2816_v50 = vpop.f32.mrf.mxu2 }
 0x818   :  { %v2834_v57 = vadd.f32 %v2816_v50, %v1894_v36 }
 0x81a   :  { %2851 = vst.msk [vmem:[%s4696_s9 + $0x78] sm:$0xff] %vm2835_vm3, %v2834_v57 }

</bundles_post_ra>
